<compile_context>
chip_gen: v7x
topology: tpu7x:2x2x1
jax: 0.10.0
libtpu: 0.0.40
codegen_flags: <defaults>
</compile_context>

<pallas_src>
import math
import functools

import jax
import jax.numpy as jnp
from jax import lax
from jax.experimental import pallas as pl
from jax.experimental.pallas import tpu as pltpu


def _round_up(x, m):
    return ((x + m - 1) // m) * m


def _vmem_limit(in_tile_bytes, out_tile_bytes, scratch_bytes=0):
    """Explicit scoped-VMEM budget: 2x-buffered in/out tiles + scratch + slack,
    capped below v7x's 64 MiB physical VMEM."""
    need = 2 * (in_tile_bytes + out_tile_bytes) + scratch_bytes
    return int(min(need + (8 << 20), 60 << 20))


# ----------------------------- Pallas kernels -----------------------------

def _conv1x1(x, w, b2d, vpu_conv):
    """1x1 conv of a (Cin, thw) bf16 tile -> (C, thw) f32."""
    if vpu_conv:
        # Tiny Cin: a K=Cin MXU contraction runs at <4-7% utilization, so do the
        # 1x1 conv as Cin broadcast-multiply-accumulates on the VPU instead.
        xf = x.astype(jnp.float32)
        wf = w.astype(jnp.float32)
        y = jnp.zeros((wf.shape[0], xf.shape[1]), jnp.float32)
        for ci in range(xf.shape[0]):
            y = y + wf[:, ci:ci + 1] * xf[ci:ci + 1, :]
        return y + b2d
    return jnp.dot(w, x, preferred_element_type=jnp.float32) + b2d


def _conv_gn_stats_kernel(x_ref, w_ref, b_ref, mean_ref, rstd_ref, s1_ref, s2_ref,
                          *, inv_n, eps, hw, need_mask, cg, vpu_conv):
    """Pass 1: conv + per-channel sum / sum-of-squares over HW tiles (reduction axis),
    emitting per-channel GroupNorm mean / rstd at the last tile."""
    t = pl.program_id(1)

    @pl.when(t == 0)
    def _():
        s1_ref[...] = jnp.zeros_like(s1_ref)
        s2_ref[...] = jnp.zeros_like(s2_ref)

    y = _conv1x1(x_ref[0], w_ref[...], b_ref[...], vpu_conv)
    if need_mask:
        thw = y.shape[-1]
        cols = t * thw + lax.broadcasted_iota(jnp.int32, y.shape, 1)
        y = jnp.where(cols < hw, y, 0.0)

    s1_ref[...] += jnp.sum(y, axis=-1, keepdims=True)
    s2_ref[...] += jnp.sum(y * y, axis=-1, keepdims=True)

    @pl.when(t == pl.num_programs(1) - 1)
    def _():
        s1 = s1_ref[...]
        s2 = s2_ref[...]
        if cg > 1:
            # Group reduction on the VPU (replaces the old (C,C) agg matvec operand).
            C = s1.shape[0]
            G = C // cg
            s1 = jnp.broadcast_to(
                jnp.sum(s1.reshape(G, cg), axis=-1, keepdims=True), (G, cg)).reshape(C, 1)
            s2 = jnp.broadcast_to(
                jnp.sum(s2.reshape(G, cg), axis=-1, keepdims=True), (G, cg)).reshape(C, 1)
        mean = s1 * inv_n
        var = jnp.maximum(s2 * inv_n - mean * mean, 0.0)   # clamp E[y^2]-E[y]^2 rounding
        mean_ref[0] = mean
        rstd_ref[0] = lax.rsqrt(var + eps)


def _conv_gn_relu_kernel(x_ref, w_ref, b_ref, mean_ref, rstd_ref, gamma_ref, beta_ref,
                         o_ref, *, vpu_conv):
    """Pass 2: recompute the cheap 1x1 conv per HW tile, normalize + affine + ReLU."""
    y = _conv1x1(x_ref[0], w_ref[...], b_ref[...], vpu_conv)
    yn = (y - mean_ref[0]) * rstd_ref[0]
    out = yn * gamma_ref[...] + beta_ref[...]
    o_ref[0] = jnp.maximum(out, 0.0).astype(o_ref.dtype)


def _fc_matmul_kernel(x_ref, w_ref, b_ref, o_ref, acc_ref):
    """Tiled (M,K)x(K,N)+bias matmul; K is the innermost ("arbitrary") grid axis."""
    k = pl.program_id(2)

    @pl.when(k == 0)
    def _():
        acc_ref[...] = jnp.zeros_like(acc_ref)

    acc_ref[...] += jnp.dot(x_ref[...], w_ref[...],
                            preferred_element_type=jnp.float32)

    @pl.when(k == pl.num_programs(2) - 1)
    def _():
        o_ref[...] = (acc_ref[...] + b_ref[...]).astype(o_ref.dtype)


def _resample_kernel(band_ref, f_ref, idx_ref, wgt_ref, o_ref, acc_ref):
    """Bilinear grid_sample as a band-sparse tiled masked matmul.

    For the current (tq, tp) tile the 4-sparse sampling matrix
        S[q, p] = sum_corner wgt[q, corner] * (idx[q, corner] == p)
    is rebuilt on the VPU (never touching HBM) and contracted with the (C, tp) bf16
    feature tile on the MXU.  band_ref (scalar prefetch, SMEM) gives the [lo, hi]
    range of P tiles the current q-tile can touch; out-of-band steps do nothing.
    """
    b = pl.program_id(0)
    qi = pl.program_id(1)
    pi = pl.program_id(2)

    @pl.when(pi == 0)
    def _():
        acc_ref[...] = jnp.zeros_like(acc_ref)

    lo = band_ref[b, qi, 0]
    hi = band_ref[b, qi, 1]

    @pl.when((pi >= lo) & (pi <= hi))
    def _():
        f = f_ref[0]                                    # (C, tp)  bf16
        idx = idx_ref[0]                                # (tq, 4)  int32
        wgt = wgt_ref[0]                                # (tq, 4)  f32
        tq = idx.shape[0]
        tp = f.shape[-1]

        cols = pi * tp + lax.broadcasted_iota(jnp.int32, (tq, tp), 1)
        s = jnp.zeros((tq, tp), jnp.float32)
        for c in range(4):
            s = s + jnp.where(idx[:, c:c + 1] == cols, wgt[:, c:c + 1], 0.0)

        # acc[c, q] += sum_p f[c, p] * S[q, p]   (bf16 S: ~3 sig. digits, inference-grade)
        acc_ref[...] += lax.dot_general(
            f, s.astype(jnp.bfloat16), (((1,), (1,)), ((), ())),
            preferred_element_type=jnp.float32)

    @pl.when(pi == pl.num_programs(2) - 1)
    def _():
        o_ref[0] = acc_ref[...].astype(o_ref.dtype)


# ----------------------------- Module wrapper -----------------------------

class HorizontalDenseTransformerPallas:
    def __init__(self, in_channels, out_channels, in_width, resolution,
                 grid_extents, xmin, xmax, ymin, ymax, zmin, zmax, focal_length,
                 groups=1, key=None):
        # TODO(synk): grouped Conv1d (groups > 1) not implemented; only the groups=1 path.
        assert groups == 1
        assert out_channels % 16 == 0, "GroupNorm(16, C) requires C % 16 == 0"

        self.in_channels = in_channels
        self.out_channels = out_channels
        self.in_width = in_width
        self.num_groups = 16
        self.out_depth = math.ceil((zmax - zmin) / resolution)
        self.out_width = math.ceil((xmax - xmin) / resolution)
        self.zmin_ext, self.zmax_ext = grid_extents[1], grid_extents[3]
        self.xmin_ext, self.xmax_ext = grid_extents[0], grid_extents[2]

        # Resampler state (standard Resampler(resolution, [xmin, zmin, xmax, zmax])).
        self.near, self.far = float(zmin), float(zmax)
        zs = jnp.arange(zmin, zmax, resolution, dtype=jnp.float32)
        xs = jnp.arange(xmin, xmax, resolution, dtype=jnp.float32)
        zz, xx = jnp.meshgrid(zs, xs, indexing="ij")
        self.grid = jnp.stack([xx, zz], axis=-1)        # (D, Wo, 2): (x, z) per cell

        # Deterministic parameter init (synthetic, not a checkpoint).
        if key is None:
            key = jax.random.PRNGKey(0)
        k = jax.random.split(key, 6)
        C = out_channels
        N = C * self.out_width
        K = C * in_width
        conv_w = 0.10 * jax.random.normal(k[0], (C, in_channels), jnp.float32)
        conv_b = 0.10 * jax.random.normal(k[1], (C,), jnp.float32)
        gn_gamma = 1.0 + 0.10 * jax.random.normal(k[2], (C,), jnp.float32)
        gn_beta = 0.10 * jax.random.normal(k[3], (C,), jnp.float32)
        fc_w = 0.05 * jax.random.normal(k[4], (N, K), jnp.float32)   # Conv1d weight (N, K, 1)
        fc_b = 0.05 * jax.random.normal(k[5], (N,), jnp.float32)

        # Matmul operands prepared ONCE (no per-forward transpose/cast). bf16 operands,
        # f32 accumulation and GroupNorm affine parameters.
        self.conv_w_bf = conv_w.astype(jnp.bfloat16)
        self.conv_b2d = conv_b[:, None]
        self.gn_gamma2d = gn_gamma[:, None]
        self.gn_beta2d = gn_beta[:, None]

        # fc tiling is fixed by (K, N): pre-transpose + pre-pad + cast the weight here.
        # TODO(synk): on v7x (2 TC), when Mp//tm == Np//tn == 1 splitting tn/tm would let
        # the grid shard across both cores; not done here (single-step grid at demo size).
        self.K, self.N = K, N
        self.tk = min(512, _round_up(K, 128))
        self.tn = min(512, _round_up(N, 128))
        self.Kp = _round_up(K, self.tk)
        self.Np = _round_up(N, self.tn)
        self.fc_w_t = jnp.pad(fc_w.T, ((0, self.Kp - K), (0, self.Np - N))
                              ).astype(jnp.bfloat16)                     # (Kp, Np)
        self.fc_b2d = jnp.pad(fc_b[None, :], ((0, 0), (0, self.Np - N)))  # (1, Np) f32

    # ---- stage 1: conv + GroupNorm + ReLU (two-pass, HW-tiled) ----
    def _conv_gn_relu(self, features):
        B, Cin, H, W = features.shape
        C = self.out_channels
        HW = H * W
        cg = C // self.num_groups

        thw = min(2048, _round_up(HW, 128))
        HWp = _round_up(HW, thw)
        nT = HWp // thw
        need_mask = HWp != HW
        vpu_conv = Cin <= 16

        x = features.astype(jnp.bfloat16).reshape(B, Cin, HW)
        if HWp != HW:
            x = jnp.pad(x, ((0, 0), (0, 0), (0, HWp - HW)))

        common_in = [
            pl.BlockSpec((1, Cin, thw), lambda b, t: (b, 0, t)),
            pl.BlockSpec((C, Cin), lambda b, t: (0, 0)),
            pl.BlockSpec((C, 1), lambda b, t: (0, 0)),
        ]

        # Pass 1: per-group statistics (HW is the reduction grid axis).
        stats_kern = functools.partial(
            _conv_gn_stats_kernel, inv_n=1.0 / (cg * HW), eps=1e-5,
            hw=HW, need_mask=need_mask, cg=cg, vpu_conv=vpu_conv)
        in_bytes = Cin * thw * 2 + C * Cin * 2 + C * 4
        mean, rstd = pl.pallas_call(
            stats_kern,
            out_shape=(jax.ShapeDtypeStruct((B, C, 1), jnp.float32),
                       jax.ShapeDtypeStruct((B, C, 1), jnp.float32)),
            grid_spec=pltpu.PrefetchScalarGridSpec(
                num_scalar_prefetch=0, grid=(B, nT),
                in_specs=common_in,
                out_specs=[pl.BlockSpec((1, C, 1), lambda b, t: (b, 0, 0)),
                           pl.BlockSpec((1, C, 1), lambda b, t: (b, 0, 0))],
                scratch_shapes=[pltpu.VMEM((C, 1), jnp.float32),
                                pltpu.VMEM((C, 1), jnp.float32)]),
            compiler_params=pltpu.CompilerParams(
                dimension_semantics=("parallel", "arbitrary"),
                vmem_limit_bytes=_vmem_limit(in_bytes, 2 * C * 4, 2 * C * 4)),
        )(x, self.conv_w_bf, self.conv_b2d)

        # Pass 2: re-run the cheap 1x1 conv per tile, normalize + affine + ReLU, bf16 out.
        apply_kern = functools.partial(_conv_gn_relu_kernel, vpu_conv=vpu_conv)
        in_bytes = Cin * thw * 2 + C * Cin * 2 + 5 * C * 4
        out = pl.pallas_call(
            apply_kern,
            out_shape=jax.ShapeDtypeStruct((B, C, HWp), jnp.bfloat16),
            grid_spec=pltpu.PrefetchScalarGridSpec(
                num_scalar_prefetch=0, grid=(B, nT),
                in_specs=common_in + [
                    pl.BlockSpec((1, C, 1), lambda b, t: (b, 0, 0)),
                    pl.BlockSpec((1, C, 1), lambda b, t: (b, 0, 0)),
                    pl.BlockSpec((C, 1), lambda b, t: (0, 0)),
                    pl.BlockSpec((C, 1), lambda b, t: (0, 0)),
                ],
                out_specs=pl.BlockSpec((1, C, thw), lambda b, t: (b, 0, t))),
            compiler_params=pltpu.CompilerParams(
                dimension_semantics=("parallel", "parallel"),
                vmem_limit_bytes=_vmem_limit(in_bytes, C * thw * 2)),
        )(x, self.conv_w_bf, self.conv_b2d, mean, rstd, self.gn_gamma2d, self.gn_beta2d)

        if HWp != HW:
            out = out[:, :, :HW]
        return out.reshape(B, C, H, W)                  # bf16

    # ---- stage 2: fc (Conv1d k=1) on permuted/flattened features, tiled matmul ----
    def _fc(self, feats):
        B, C, H, W = feats.shape
        assert C == self.out_channels and W == self.in_width
        K, N, Kp, Np, tk, tn = self.K, self.N, self.Kp, self.Np, self.tk, self.tn
        M = B * H
        tm = min(512, _round_up(M, 8))
        Mp = _round_up(M, tm)

        # flat_feats[b, c*W + w, h] = feats[b, c, h, w]  -> rows (b, h), cols (c, w)
        # TODO(synk): this activation transpose is still an XLA copy (now bf16); fusing it
        # into the stage-1 out_spec (writing (B, H, C*W) directly) is the remaining lever.
        x2d = feats.transpose(0, 2, 1, 3).reshape(M, K)
        if (Mp, Kp) != (M, K):
            x2d = jnp.pad(x2d, ((0, Mp - M), (0, Kp - K)))

        in_bytes = tm * tk * 2 + tk * tn * 2 + tn * 4
        out = pl.pallas_call(
            _fc_matmul_kernel,
            out_shape=jax.ShapeDtypeStruct((Mp, Np), jnp.bfloat16),
            grid_spec=pltpu.PrefetchScalarGridSpec(
                num_scalar_prefetch=0, grid=(Mp // tm, Np // tn, Kp // tk),
                in_specs=[
                    pl.BlockSpec((tm, tk), lambda i, j, k: (i, k)),
                    pl.BlockSpec((tk, tn), lambda i, j, k: (k, j)),
                    pl.BlockSpec((1, tn), lambda i, j, k: (0, j)),
                ],
                out_specs=pl.BlockSpec((tm, tn), lambda i, j, k: (i, j)),
                scratch_shapes=[pltpu.VMEM((tm, tn), jnp.float32)]),
            compiler_params=pltpu.CompilerParams(
                dimension_semantics=("parallel", "parallel", "arbitrary"),
                vmem_limit_bytes=_vmem_limit(in_bytes, tm * tn * 2, tm * tn * 4)),
        )(x2d, self.fc_w_t, self.fc_b2d)

        out2d = out[:M, :N]
        # Conv1d output layout is (B, N, H); PyTorch's .view(B, C, H, -1) on that
        # contiguous tensor == row-major reshape (index-mixing semantics preserved).
        fc_out = out2d.reshape(B, H, N).transpose(0, 2, 1)
        return fc_out.reshape(B, C, H, self.out_width)   # bf16

    # ---- stage 3: Resampler (grid_sample, bilinear, zeros padding, align_corners=False) ----
    def _resample(self, feats, calib):
        B, C, Hin, Win = feats.shape
        grid = self.grid
        D, Wo, _ = grid.shape

        # Sampling coordinates (cheap JAX glue: B*D*Wo elements).
        calib22 = calib[:, jnp.array([0, 2])][:, :, jnp.array([0, 2])]     # (B, 2, 2)
        cam = jnp.einsum("bij,dwj->bdwi", calib22, grid)                    # (B, D, Wo, 2)
        z = cam[..., 1]
        # Guard z ~ 0 so 0/0 does not inject NaN into the sampling weights.
        zsafe = jnp.where(jnp.abs(z) < 1e-6, jnp.where(z < 0.0, -1e-6, 1e-6), z)
        ucoords = cam[..., 0] / zsafe
        ucoords = ucoords / Win * 2.0 - 1.0
        zcoords = (z - self.near) / (self.far - self.near) * 2.0 - 1.0
        gc = jnp.clip(jnp.stack([ucoords, zcoords], axis=-1), -1.1, 1.1)

        # Bilinear corner indices / weights (align_corners=False, zeros padding).
        Q, P = D * Wo, Hin * Win
        gx = gc[..., 0].reshape(B, Q)
        gy = gc[..., 1].reshape(B, Q)
        ix = ((gx + 1.0) * Win - 1.0) / 2.0
        iy = ((gy + 1.0) * Hin - 1.0) / 2.0
        ix0, iy0 = jnp.floor(ix), jnp.floor(iy)
        ix1, iy1 = ix0 + 1.0, iy0 + 1.0
        wx1, wy1 = ix - ix0, iy - iy0
        wx0, wy0 = 1.0 - wx1, 1.0 - wy1

        def corner(iyc, ixc, wy, wx):
            valid = (ixc >= 0) & (ixc <= Win - 1) & (iyc >= 0) & (iyc <= Hin - 1)
            ixi = jnp.clip(ixc, 0, Win - 1).astype(jnp.int32)
            iyi = jnp.clip(iyc, 0, Hin - 1).astype(jnp.int32)
            return iyi * Win + ixi, (wy * wx) * valid.astype(jnp.float32)

        corners = [corner(iy0, ix0, wy0, wx0), corner(iy0, ix1, wy0, wx1),
                   corner(iy1, ix0, wy1, wx0), corner(iy1, ix1, wy1, wx1)]
        idx_all = jnp.stack([c[0] for c in corners], axis=-1)   # (B, Q, 4) int32
        wgt_all = jnp.stack([c[1] for c in corners], axis=-1)   # (B, Q, 4) f32

        tq = min(1024, _round_up(Q, 128))
        tp = min(256, _round_up(P, 128))
        Qp, Pp = _round_up(Q, tq), _round_up(P, tp)
        nQ, nP = Qp // tq, Pp // tp

        f2d = feats.reshape(B, C, P)                              # bf16, no per-call cast
        if Pp != P:
            f2d = jnp.pad(f2d, ((0, 0), (0, 0), (0, Pp - P)))
        if Qp != Q:
            idx_all = jnp.pad(idx_all, ((0, 0), (0, Qp - Q), (0, 0)))
            wgt_all = jnp.pad(wgt_all, ((0, 0), (0, Qp - Q), (0, 0)))

        # Block-sparse band per (batch, q-tile): bilinear corners of a contiguous q-tile
        # touch only a narrow range of P, so most (qi, pi) tiles are empty.  Prefetch the
        # [lo, hi] feature-tile range to SMEM; out-of-band tiles skip S-rebuild + MXU work
        # and have their feature index_map clamped into the band.
        idx_tiles = idx_all.reshape(B, nQ, tq * 4)
        band = jnp.stack([jnp.min(idx_tiles, axis=-1) // tp,
                          jnp.max(idx_tiles, axis=-1) // tp], axis=-1).astype(jnp.int32)

        in_bytes = C * tp * 2 + 2 * tq * 4 * 4
        out = pl.pallas_call(
            _resample_kernel,
            out_shape=jax.ShapeDtypeStruct((B, C, Qp), jnp.float32),
            grid_spec=pltpu.PrefetchScalarGridSpec(
                num_scalar_prefetch=1, grid=(B, nQ, nP),
                in_specs=[
                    pl.BlockSpec(
                        (1, C, tp),
                        lambda b, qi, pi, band: (b, 0,
                                                 jnp.clip(pi, band[b, qi, 0], band[b, qi, 1]))),
                    pl.BlockSpec((1, tq, 4), lambda b, qi, pi, band: (b, qi, 0)),
                    pl.BlockSpec((1, tq, 4), lambda b, qi, pi, band: (b, qi, 0)),
                ],
                out_specs=pl.BlockSpec((1, C, tq), lambda b, qi, pi, band: (b, 0, qi)),
                scratch_shapes=[pltpu.VMEM((C, tq), jnp.float32)]),
            compiler_params=pltpu.CompilerParams(
                dimension_semantics=("parallel", "parallel", "arbitrary"),
                vmem_limit_bytes=_vmem_limit(in_bytes, C * tq * 4, C * tq * 4)),
        )(band, f2d, idx_all, wgt_all)
        return out[:, :, :Q].reshape(B, C, D, Wo)

    def __call__(self, features, calib, *args):
        feats = self._conv_gn_relu(features)    # F.relu(bn(conv(features)))
        bev = self._fc(feats)                   # fc(permute/flatten).view(B, C, H, -1)
        return self._resample(bev, calib)       # resampler(bev, calib)


# ----------------------------- demo -----------------------------

if __name__ == "__main__":
    key = jax.random.PRNGKey(0)
    k_feat, k_param = jax.random.split(key)

    in_channels, out_channels = 8, 16
    B, H, W = 2, 16, 16
    in_width = W
    resolution = 0.5
    xmin, xmax = -4.0, 4.0
    ymin, ymax = -2.0, 2.0
    zmin, zmax = 1.0, 9.0
    focal_length = 8.0
    grid_extents = [xmin, zmin, xmax, zmax]

    model = HorizontalDenseTransformerPallas(
        in_channels, out_channels, in_width, resolution, grid_extents,
        xmin, xmax, ymin, ymax, zmin, zmax, focal_length, groups=1, key=k_param)

    features = jax.random.normal(k_feat, (B, in_channels, H, W), dtype=jnp.float32)
    calib = jnp.stack([
        jnp.array([[focal_length + b, 0.0, model.out_width / 2.0],
                   [0.0, focal_length + b, H / 2.0],
                   [0.0, 0.0, 1.0]], dtype=jnp.float32)
        for b in range(B)
    ])

    fwd = jax.jit(lambda f, c: model(f, c))
    out = fwd(features, calib)
    out = jax.block_until_ready(out)
    assert out.shape == (B, out_channels, model.out_depth, model.out_width), out.shape
    assert bool(jnp.all(jnp.isfinite(out)))
    print("KERNEL_OK")
</pallas_src>

<mosaic_0001>
module attributes {stable_mosaic.version = 11 : i64} {
  func.func @_conv_gn_stats_kernel(%arg0: i32, %arg1: i32, %arg2: memref<1x8x256xbf16, #tpu.memory_space<vmem>>, %arg3: memref<16x8xbf16, #tpu.memory_space<vmem>>, %arg4: memref<16x1xf32, #tpu.memory_space<vmem>>, %arg5: memref<1x16x1xf32, #tpu.memory_space<vmem>>, %arg6: memref<1x16x1xf32, #tpu.memory_space<vmem>>, %arg7: memref<16x1xf32, #tpu.memory_space<vmem>>, %arg8: memref<16x1xf32, #tpu.memory_space<vmem>>) attributes {dimension_semantics = [#tpu.dimension_semantics<parallel>, #tpu.dimension_semantics<arbitrary>], iteration_bounds = array<i64: 2, 1>, scalar_prefetch = 0 : i64, scratch_operands = 2 : i64, tpu.core_type = #tpu.core_type<tc>, window_params = [{transform_indices = @transform_0, window_bounds = array<i64: 1, 8, 256>}, {pipeline_mode = #tpu.pipeline_mode<synchronous>, transform_indices = @transform_1, window_bounds = array<i64: 16, 8>}, {pipeline_mode = #tpu.pipeline_mode<synchronous>, transform_indices = @transform_2, window_bounds = array<i64: 16, 1>}, {transform_indices = @transform_3, window_bounds = array<i64: 1, 16, 1>}, {transform_indices = @transform_4, window_bounds = array<i64: 1, 16, 1>}]} {
    %c0_i32 = arith.constant 0 : i32
    %0 = arith.cmpi eq, %arg1, %c0_i32 : i32
    %1 = arith.extui %0 : i1 to i32
    %c0_i32_0 = arith.constant 0 : i32
    %2 = arith.cmpi ne, %1, %c0_i32_0 : i32
    scf.if %2 {
      %cst_19 = arith.constant 0.000000e+00 : f32
      %74 = vector.broadcast %cst_19 : f32 to vector<16x1xf32>
      %c0_20 = arith.constant 0 : index
      %c0_21 = arith.constant 0 : index
      %75 = vector.load %arg7[%c0_20, %c0_21] : memref<16x1xf32, #tpu.memory_space<vmem>>, vector<16x1xf32>
      tpu.vector_store %arg7[%c0_20, %c0_21], %74 {strides = array<i32>} : memref<16x1xf32, #tpu.memory_space<vmem>>, vector<16x1xf32>,
      %cst_22 = arith.constant 0.000000e+00 : f32
      %76 = vector.broadcast %cst_22 : f32 to vector<16x1xf32>
      %c0_23 = arith.constant 0 : index
      %c0_24 = arith.constant 0 : index
      %77 = vector.load %arg8[%c0_23, %c0_24] : memref<16x1xf32, #tpu.memory_space<vmem>>, vector<16x1xf32>
      tpu.vector_store %arg8[%c0_23, %c0_24], %76 {strides = array<i32>} : memref<16x1xf32, #tpu.memory_space<vmem>>, vector<16x1xf32>,
    } else {
    }
    %c0 = arith.constant 0 : index
    %c0_1 = arith.constant 0 : index
    %c0_2 = arith.constant 0 : index
    %3 = vector.load %arg2[%c0, %c0_1, %c0_2] : memref<1x8x256xbf16, #tpu.memory_space<vmem>>, vector<1x8x256xbf16>
    %4 = vector.shape_cast %3 : vector<1x8x256xbf16> to vector<8x256xbf16>
    %c0_3 = arith.constant 0 : index
    %c0_4 = arith.constant 0 : index
    %5 = vector.load %arg3[%c0_3, %c0_4] : memref<16x8xbf16, #tpu.memory_space<vmem>>, vector<16x8xbf16>
    %c0_5 = arith.constant 0 : index
    %c0_6 = arith.constant 0 : index
    %6 = vector.load %arg4[%c0_5, %c0_6] : memref<16x1xf32, #tpu.memory_space<vmem>>, vector<16x1xf32>
    %7 = arith.extf %4 : vector<8x256xbf16> to vector<8x256xf32>
    %8 = arith.extf %5 : vector<16x8xbf16> to vector<16x8xf32>
    %cst = arith.constant 0.000000e+00 : f32
    %9 = vector.broadcast %cst : f32 to vector<16x256xf32>
    %10 = vector.extract_strided_slice %8 {offsets = [0, 0], sizes = [16, 1], strides = [1, 1]} : vector<16x8xf32> to vector<16x1xf32>
    %11 = vector.extract_strided_slice %7 {offsets = [0, 0], sizes = [1, 256], strides = [1, 1]} : vector<8x256xf32> to vector<1x256xf32>
    %12 = vector.broadcast %10 : vector<16x1xf32> to vector<16x256xf32>
    %13 = vector.broadcast %11 : vector<1x256xf32> to vector<16x256xf32>
    %14 = arith.mulf %12, %13 : vector<16x256xf32>
    %15 = arith.addf %9, %14 : vector<16x256xf32>
    %16 = vector.extract_strided_slice %8 {offsets = [0, 1], sizes = [16, 1], strides = [1, 1]} : vector<16x8xf32> to vector<16x1xf32>
    %17 = vector.extract_strided_slice %7 {offsets = [1, 0], sizes = [1, 256], strides = [1, 1]} : vector<8x256xf32> to vector<1x256xf32>
    %18 = vector.broadcast %16 : vector<16x1xf32> to vector<16x256xf32>
    %19 = vector.broadcast %17 : vector<1x256xf32> to vector<16x256xf32>
    %20 = arith.mulf %18, %19 : vector<16x256xf32>
    %21 = arith.addf %15, %20 : vector<16x256xf32>
    %22 = vector.extract_strided_slice %8 {offsets = [0, 2], sizes = [16, 1], strides = [1, 1]} : vector<16x8xf32> to vector<16x1xf32>
    %23 = vector.extract_strided_slice %7 {offsets = [2, 0], sizes = [1, 256], strides = [1, 1]} : vector<8x256xf32> to vector<1x256xf32>
    %24 = vector.broadcast %22 : vector<16x1xf32> to vector<16x256xf32>
    %25 = vector.broadcast %23 : vector<1x256xf32> to vector<16x256xf32>
    %26 = arith.mulf %24, %25 : vector<16x256xf32>
    %27 = arith.addf %21, %26 : vector<16x256xf32>
    %28 = vector.extract_strided_slice %8 {offsets = [0, 3], sizes = [16, 1], strides = [1, 1]} : vector<16x8xf32> to vector<16x1xf32>
    %29 = vector.extract_strided_slice %7 {offsets = [3, 0], sizes = [1, 256], strides = [1, 1]} : vector<8x256xf32> to vector<1x256xf32>
    %30 = vector.broadcast %28 : vector<16x1xf32> to vector<16x256xf32>
    %31 = vector.broadcast %29 : vector<1x256xf32> to vector<16x256xf32>
    %32 = arith.mulf %30, %31 : vector<16x256xf32>
    %33 = arith.addf %27, %32 : vector<16x256xf32>
    %34 = vector.extract_strided_slice %8 {offsets = [0, 4], sizes = [16, 1], strides = [1, 1]} : vector<16x8xf32> to vector<16x1xf32>
    %35 = vector.extract_strided_slice %7 {offsets = [4, 0], sizes = [1, 256], strides = [1, 1]} : vector<8x256xf32> to vector<1x256xf32>
    %36 = vector.broadcast %34 : vector<16x1xf32> to vector<16x256xf32>
    %37 = vector.broadcast %35 : vector<1x256xf32> to vector<16x256xf32>
    %38 = arith.mulf %36, %37 : vector<16x256xf32>
    %39 = arith.addf %33, %38 : vector<16x256xf32>
    %40 = vector.extract_strided_slice %8 {offsets = [0, 5], sizes = [16, 1], strides = [1, 1]} : vector<16x8xf32> to vector<16x1xf32>
    %41 = vector.extract_strided_slice %7 {offsets = [5, 0], sizes = [1, 256], strides = [1, 1]} : vector<8x256xf32> to vector<1x256xf32>
    %42 = vector.broadcast %40 : vector<16x1xf32> to vector<16x256xf32>
    %43 = vector.broadcast %41 : vector<1x256xf32> to vector<16x256xf32>
    %44 = arith.mulf %42, %43 : vector<16x256xf32>
    %45 = arith.addf %39, %44 : vector<16x256xf32>
    %46 = vector.extract_strided_slice %8 {offsets = [0, 6], sizes = [16, 1], strides = [1, 1]} : vector<16x8xf32> to vector<16x1xf32>
    %47 = vector.extract_strided_slice %7 {offsets = [6, 0], sizes = [1, 256], strides = [1, 1]} : vector<8x256xf32> to vector<1x256xf32>
    %48 = vector.broadcast %46 : vector<16x1xf32> to vector<16x256xf32>
    %49 = vector.broadcast %47 : vector<1x256xf32> to vector<16x256xf32>
    %50 = arith.mulf %48, %49 : vector<16x256xf32>
    %51 = arith.addf %45, %50 : vector<16x256xf32>
    %52 = vector.extract_strided_slice %8 {offsets = [0, 7], sizes = [16, 1], strides = [1, 1]} : vector<16x8xf32> to vector<16x1xf32>
    %53 = vector.extract_strided_slice %7 {offsets = [7, 0], sizes = [1, 256], strides = [1, 1]} : vector<8x256xf32> to vector<1x256xf32>
    %54 = vector.broadcast %52 : vector<16x1xf32> to vector<16x256xf32>
    %55 = vector.broadcast %53 : vector<1x256xf32> to vector<16x256xf32>
    %56 = arith.mulf %54, %55 : vector<16x256xf32>
    %57 = arith.addf %51, %56 : vector<16x256xf32>
    %58 = vector.broadcast %6 : vector<16x1xf32> to vector<16x256xf32>
    %59 = arith.addf %57, %58 : vector<16x256xf32>
    %c0_7 = arith.constant 0 : index
    %c0_8 = arith.constant 0 : index
    %60 = vector.load %arg7[%c0_7, %c0_8] : memref<16x1xf32, #tpu.memory_space<vmem>>, vector<16x1xf32>
    %cst_9 = arith.constant dense<0.000000e+00> : vector<16xf32>
    %61 = vector.multi_reduction <add>, %59, %cst_9 [1] : vector<16x256xf32> to vector<16xf32>
    %62 = vector.shape_cast %61 : vector<16xf32> to vector<16x1xf32>
    %63 = arith.addf %60, %62 : vector<16x1xf32>
    %c0_10 = arith.constant 0 : index
    %c0_11 = arith.constant 0 : index
    %64 = vector.load %arg7[%c0_10, %c0_11] : memref<16x1xf32, #tpu.memory_space<vmem>>, vector<16x1xf32>
    tpu.vector_store %arg7[%c0_10, %c0_11], %63 {strides = array<i32>} : memref<16x1xf32, #tpu.memory_space<vmem>>, vector<16x1xf32>,
    %c0_12 = arith.constant 0 : index
    %c0_13 = arith.constant 0 : index
    %65 = vector.load %arg8[%c0_12, %c0_13] : memref<16x1xf32, #tpu.memory_space<vmem>>, vector<16x1xf32>
    %66 = arith.mulf %59, %59 : vector<16x256xf32>
    %cst_14 = arith.constant dense<0.000000e+00> : vector<16xf32>
    %67 = vector.multi_reduction <add>, %66, %cst_14 [1] : vector<16x256xf32> to vector<16xf32>
    %68 = vector.shape_cast %67 : vector<16xf32> to vector<16x1xf32>
    %69 = arith.addf %65, %68 : vector<16x1xf32>
    %c0_15 = arith.constant 0 : index
    %c0_16 = arith.constant 0 : index
    %70 = vector.load %arg8[%c0_15, %c0_16] : memref<16x1xf32, #tpu.memory_space<vmem>>, vector<16x1xf32>
    tpu.vector_store %arg8[%c0_15, %c0_16], %69 {strides = array<i32>} : memref<16x1xf32, #tpu.memory_space<vmem>>, vector<16x1xf32>,
    %c0_i32_17 = arith.constant 0 : i32
    %71 = arith.cmpi eq, %arg1, %c0_i32_17 : i32
    %72 = arith.extui %71 : i1 to i32
    %c0_i32_18 = arith.constant 0 : i32
    %73 = arith.cmpi ne, %72, %c0_i32_18 : i32
    scf.if %73 {
      %c0_19 = arith.constant 0 : index
      %c0_20 = arith.constant 0 : index
      %74 = vector.load %arg7[%c0_19, %c0_20] : memref<16x1xf32, #tpu.memory_space<vmem>>, vector<16x1xf32>
      %c0_21 = arith.constant 0 : index
      %c0_22 = arith.constant 0 : index
      %75 = vector.load %arg8[%c0_21, %c0_22] : memref<16x1xf32, #tpu.memory_space<vmem>>, vector<16x1xf32>
      %cst_23 = arith.constant 3.906250e-03 : f32
      %76 = vector.broadcast %cst_23 : f32 to vector<16x1xf32>
      %77 = arith.mulf %74, %76 : vector<16x1xf32>
      %cst_24 = arith.constant 3.906250e-03 : f32
      %78 = vector.broadcast %cst_24 : f32 to vector<16x1xf32>
      %79 = arith.mulf %75, %78 : vector<16x1xf32>
      %80 = arith.mulf %77, %77 : vector<16x1xf32>
      %81 = arith.subf %79, %80 : vector<16x1xf32>
      %cst_25 = arith.constant 0.000000e+00 : f32
      %82 = vector.broadcast %cst_25 : f32 to vector<16x1xf32>
      %83 = arith.maximumf %81, %82 : vector<16x1xf32>
      %c0_26 = arith.constant 0 : index
      %c0_27 = arith.constant 0 : index
      %c0_28 = arith.constant 0 : index
      %84 = vector.load %arg5[%c0_26, %c0_27, %c0_28] : memref<1x16x1xf32, #tpu.memory_space<vmem>>, vector<1x16x1xf32>
      %85 = vector.shape_cast %84 : vector<1x16x1xf32> to vector<16x1xf32>
      %86 = vector.shape_cast %77 : vector<16x1xf32> to vector<1x16x1xf32>
      tpu.vector_store %arg5[%c0_26, %c0_27, %c0_28], %86 {strides = array<i32>} : memref<1x16x1xf32, #tpu.memory_space<vmem>>, vector<1x16x1xf32>,
      %cst_29 = arith.constant 9.99999974E-6 : f32
      %87 = vector.broadcast %cst_29 : f32 to vector<16x1xf32>
      %88 = arith.addf %83, %87 : vector<16x1xf32>
      %89 = math.rsqrt %88 : vector<16x1xf32>
      %c0_30 = arith.constant 0 : index
      %c0_31 = arith.constant 0 : index
      %c0_32 = arith.constant 0 : index
      %90 = vector.load %arg6[%c0_30, %c0_31, %c0_32] : memref<1x16x1xf32, #tpu.memory_space<vmem>>, vector<1x16x1xf32>
      %91 = vector.shape_cast %90 : vector<1x16x1xf32> to vector<16x1xf32>
      %92 = vector.shape_cast %89 : vector<16x1xf32> to vector<1x16x1xf32>
      tpu.vector_store %arg6[%c0_30, %c0_31, %c0_32], %92 {strides = array<i32>} : memref<1x16x1xf32, #tpu.memory_space<vmem>>, vector<1x16x1xf32>,
    } else {
    }
    return
  }
  func.func @transform_0(%arg0: i32, %arg1: i32) -> (i32, i32, i32) {
    %c0_i32 = arith.constant 0 : i32
    %c0_i32_0 = arith.constant 0 : i32
    return %arg0, %c0_i32, %arg1 : i32, i32, i32
  }
  func.func @transform_1(%arg0: i32, %arg1: i32) -> (i32, i32) {
    %c0_i32 = arith.constant 0 : i32
    %c0_i32_0 = arith.constant 0 : i32
    %c0_i32_1 = arith.constant 0 : i32
    return %c0_i32, %c0_i32_0 : i32, i32
  }
  func.func @transform_2(%arg0: i32, %arg1: i32) -> (i32, i32) {
    %c0_i32 = arith.constant 0 : i32
    %c0_i32_0 = arith.constant 0 : i32
    %c0_i32_1 = arith.constant 0 : i32
    return %c0_i32, %c0_i32_0 : i32, i32
  }
  func.func @transform_3(%arg0: i32, %arg1: i32) -> (i32, i32, i32) {
    %c0_i32 = arith.constant 0 : i32
    %c0_i32_0 = arith.constant 0 : i32
    %c0_i32_1 = arith.constant 0 : i32
    return %arg0, %c0_i32, %c0_i32_0 : i32, i32, i32
  }
  func.func @transform_4(%arg0: i32, %arg1: i32) -> (i32, i32, i32) {
    %c0_i32 = arith.constant 0 : i32
    %c0_i32_0 = arith.constant 0 : i32
    %c0_i32_1 = arith.constant 0 : i32
    return %arg0, %c0_i32, %c0_i32_0 : i32, i32, i32
  }
}

module attributes {stable_mosaic.version = 11 : i64} {
  func.func @_conv_gn_relu_kernel(%arg0: i32, %arg1: i32, %arg2: memref<1x8x256xbf16, #tpu.memory_space<vmem>>, %arg3: memref<16x8xbf16, #tpu.memory_space<vmem>>, %arg4: memref<16x1xf32, #tpu.memory_space<vmem>>, %arg5: memref<1x16x1xf32, #tpu.memory_space<vmem>>, %arg6: memref<1x16x1xf32, #tpu.memory_space<vmem>>, %arg7: memref<16x1xf32, #tpu.memory_space<vmem>>, %arg8: memref<16x1xf32, #tpu.memory_space<vmem>>, %arg9: memref<1x16x256xbf16, #tpu.memory_space<vmem>>) attributes {dimension_semantics = [#tpu.dimension_semantics<parallel>, #tpu.dimension_semantics<parallel>], iteration_bounds = array<i64: 2, 1>, scalar_prefetch = 0 : i64, scratch_operands = 0 : i64, tpu.core_type = #tpu.core_type<tc>, window_params = [{transform_indices = @transform_0, window_bounds = array<i64: 1, 8, 256>}, {pipeline_mode = #tpu.pipeline_mode<synchronous>, transform_indices = @transform_1, window_bounds = array<i64: 16, 8>}, {pipeline_mode = #tpu.pipeline_mode<synchronous>, transform_indices = @transform_2, window_bounds = array<i64: 16, 1>}, {transform_indices = @transform_3, window_bounds = array<i64: 1, 16, 1>}, {transform_indices = @transform_4, window_bounds = array<i64: 1, 16, 1>}, {pipeline_mode = #tpu.pipeline_mode<synchronous>, transform_indices = @transform_5, window_bounds = array<i64: 16, 1>}, {pipeline_mode = #tpu.pipeline_mode<synchronous>, transform_indices = @transform_6, window_bounds = array<i64: 16, 1>}, {transform_indices = @transform_7, window_bounds = array<i64: 1, 16, 256>}]} {
    %c0 = arith.constant 0 : index
    %c0_0 = arith.constant 0 : index
    %c0_1 = arith.constant 0 : index
    %0 = vector.load %arg2[%c0, %c0_0, %c0_1] : memref<1x8x256xbf16, #tpu.memory_space<vmem>>, vector<1x8x256xbf16>
    %1 = vector.shape_cast %0 : vector<1x8x256xbf16> to vector<8x256xbf16>
    %c0_2 = arith.constant 0 : index
    %c0_3 = arith.constant 0 : index
    %2 = vector.load %arg3[%c0_2, %c0_3] : memref<16x8xbf16, #tpu.memory_space<vmem>>, vector<16x8xbf16>
    %c0_4 = arith.constant 0 : index
    %c0_5 = arith.constant 0 : index
    %3 = vector.load %arg4[%c0_4, %c0_5] : memref<16x1xf32, #tpu.memory_space<vmem>>, vector<16x1xf32>
    %4 = arith.extf %1 : vector<8x256xbf16> to vector<8x256xf32>
    %5 = arith.extf %2 : vector<16x8xbf16> to vector<16x8xf32>
    %cst = arith.constant 0.000000e+00 : f32
    %6 = vector.broadcast %cst : f32 to vector<16x256xf32>
    %7 = vector.extract_strided_slice %5 {offsets = [0, 0], sizes = [16, 1], strides = [1, 1]} : vector<16x8xf32> to vector<16x1xf32>
    %8 = vector.extract_strided_slice %4 {offsets = [0, 0], sizes = [1, 256], strides = [1, 1]} : vector<8x256xf32> to vector<1x256xf32>
    %9 = vector.broadcast %7 : vector<16x1xf32> to vector<16x256xf32>
    %10 = vector.broadcast %8 : vector<1x256xf32> to vector<16x256xf32>
    %11 = arith.mulf %9, %10 : vector<16x256xf32>
    %12 = arith.addf %6, %11 : vector<16x256xf32>
    %13 = vector.extract_strided_slice %5 {offsets = [0, 1], sizes = [16, 1], strides = [1, 1]} : vector<16x8xf32> to vector<16x1xf32>
    %14 = vector.extract_strided_slice %4 {offsets = [1, 0], sizes = [1, 256], strides = [1, 1]} : vector<8x256xf32> to vector<1x256xf32>
    %15 = vector.broadcast %13 : vector<16x1xf32> to vector<16x256xf32>
    %16 = vector.broadcast %14 : vector<1x256xf32> to vector<16x256xf32>
    %17 = arith.mulf %15, %16 : vector<16x256xf32>
    %18 = arith.addf %12, %17 : vector<16x256xf32>
    %19 = vector.extract_strided_slice %5 {offsets = [0, 2], sizes = [16, 1], strides = [1, 1]} : vector<16x8xf32> to vector<16x1xf32>
    %20 = vector.extract_strided_slice %4 {offsets = [2, 0], sizes = [1, 256], strides = [1, 1]} : vector<8x256xf32> to vector<1x256xf32>
    %21 = vector.broadcast %19 : vector<16x1xf32> to vector<16x256xf32>
    %22 = vector.broadcast %20 : vector<1x256xf32> to vector<16x256xf32>
    %23 = arith.mulf %21, %22 : vector<16x256xf32>
    %24 = arith.addf %18, %23 : vector<16x256xf32>
    %25 = vector.extract_strided_slice %5 {offsets = [0, 3], sizes = [16, 1], strides = [1, 1]} : vector<16x8xf32> to vector<16x1xf32>
    %26 = vector.extract_strided_slice %4 {offsets = [3, 0], sizes = [1, 256], strides = [1, 1]} : vector<8x256xf32> to vector<1x256xf32>
    %27 = vector.broadcast %25 : vector<16x1xf32> to vector<16x256xf32>
    %28 = vector.broadcast %26 : vector<1x256xf32> to vector<16x256xf32>
    %29 = arith.mulf %27, %28 : vector<16x256xf32>
    %30 = arith.addf %24, %29 : vector<16x256xf32>
    %31 = vector.extract_strided_slice %5 {offsets = [0, 4], sizes = [16, 1], strides = [1, 1]} : vector<16x8xf32> to vector<16x1xf32>
    %32 = vector.extract_strided_slice %4 {offsets = [4, 0], sizes = [1, 256], strides = [1, 1]} : vector<8x256xf32> to vector<1x256xf32>
    %33 = vector.broadcast %31 : vector<16x1xf32> to vector<16x256xf32>
    %34 = vector.broadcast %32 : vector<1x256xf32> to vector<16x256xf32>
    %35 = arith.mulf %33, %34 : vector<16x256xf32>
    %36 = arith.addf %30, %35 : vector<16x256xf32>
    %37 = vector.extract_strided_slice %5 {offsets = [0, 5], sizes = [16, 1], strides = [1, 1]} : vector<16x8xf32> to vector<16x1xf32>
    %38 = vector.extract_strided_slice %4 {offsets = [5, 0], sizes = [1, 256], strides = [1, 1]} : vector<8x256xf32> to vector<1x256xf32>
    %39 = vector.broadcast %37 : vector<16x1xf32> to vector<16x256xf32>
    %40 = vector.broadcast %38 : vector<1x256xf32> to vector<16x256xf32>
    %41 = arith.mulf %39, %40 : vector<16x256xf32>
    %42 = arith.addf %36, %41 : vector<16x256xf32>
    %43 = vector.extract_strided_slice %5 {offsets = [0, 6], sizes = [16, 1], strides = [1, 1]} : vector<16x8xf32> to vector<16x1xf32>
    %44 = vector.extract_strided_slice %4 {offsets = [6, 0], sizes = [1, 256], strides = [1, 1]} : vector<8x256xf32> to vector<1x256xf32>
    %45 = vector.broadcast %43 : vector<16x1xf32> to vector<16x256xf32>
    %46 = vector.broadcast %44 : vector<1x256xf32> to vector<16x256xf32>
    %47 = arith.mulf %45, %46 : vector<16x256xf32>
    %48 = arith.addf %42, %47 : vector<16x256xf32>
    %49 = vector.extract_strided_slice %5 {offsets = [0, 7], sizes = [16, 1], strides = [1, 1]} : vector<16x8xf32> to vector<16x1xf32>
    %50 = vector.extract_strided_slice %4 {offsets = [7, 0], sizes = [1, 256], strides = [1, 1]} : vector<8x256xf32> to vector<1x256xf32>
    %51 = vector.broadcast %49 : vector<16x1xf32> to vector<16x256xf32>
    %52 = vector.broadcast %50 : vector<1x256xf32> to vector<16x256xf32>
    %53 = arith.mulf %51, %52 : vector<16x256xf32>
    %54 = arith.addf %48, %53 : vector<16x256xf32>
    %55 = vector.broadcast %3 : vector<16x1xf32> to vector<16x256xf32>
    %56 = arith.addf %54, %55 : vector<16x256xf32>
    %c0_6 = arith.constant 0 : index
    %c0_7 = arith.constant 0 : index
    %c0_8 = arith.constant 0 : index
    %57 = vector.load %arg5[%c0_6, %c0_7, %c0_8] : memref<1x16x1xf32, #tpu.memory_space<vmem>>, vector<1x16x1xf32>
    %58 = vector.shape_cast %57 : vector<1x16x1xf32> to vector<16x1xf32>
    %59 = vector.broadcast %58 : vector<16x1xf32> to vector<16x256xf32>
    %60 = arith.subf %56, %59 : vector<16x256xf32>
    %c0_9 = arith.constant 0 : index
    %c0_10 = arith.constant 0 : index
    %c0_11 = arith.constant 0 : index
    %61 = vector.load %arg6[%c0_9, %c0_10, %c0_11] : memref<1x16x1xf32, #tpu.memory_space<vmem>>, vector<1x16x1xf32>
    %62 = vector.shape_cast %61 : vector<1x16x1xf32> to vector<16x1xf32>
    %63 = vector.broadcast %62 : vector<16x1xf32> to vector<16x256xf32>
    %64 = arith.mulf %60, %63 : vector<16x256xf32>
    %c0_12 = arith.constant 0 : index
    %c0_13 = arith.constant 0 : index
    %65 = vector.load %arg7[%c0_12, %c0_13] : memref<16x1xf32, #tpu.memory_space<vmem>>, vector<16x1xf32>
    %66 = vector.broadcast %65 : vector<16x1xf32> to vector<16x256xf32>
    %67 = arith.mulf %64, %66 : vector<16x256xf32>
    %c0_14 = arith.constant 0 : index
    %c0_15 = arith.constant 0 : index
    %68 = vector.load %arg8[%c0_14, %c0_15] : memref<16x1xf32, #tpu.memory_space<vmem>>, vector<16x1xf32>
    %69 = vector.broadcast %68 : vector<16x1xf32> to vector<16x256xf32>
    %70 = arith.addf %67, %69 : vector<16x256xf32>
    %cst_16 = arith.constant 0.000000e+00 : f32
    %71 = vector.broadcast %cst_16 : f32 to vector<16x256xf32>
    %72 = arith.maximumf %70, %71 : vector<16x256xf32>
    %73 = arith.truncf %72 : vector<16x256xf32> to vector<16x256xbf16>
    %c0_17 = arith.constant 0 : index
    %c0_18 = arith.constant 0 : index
    %c0_19 = arith.constant 0 : index
    %74 = vector.load %arg9[%c0_17, %c0_18, %c0_19] : memref<1x16x256xbf16, #tpu.memory_space<vmem>>, vector<1x16x256xbf16>
    %75 = vector.shape_cast %74 : vector<1x16x256xbf16> to vector<16x256xbf16>
    %76 = vector.shape_cast %73 : vector<16x256xbf16> to vector<1x16x256xbf16>
    tpu.vector_store %arg9[%c0_17, %c0_18, %c0_19], %76 {strides = array<i32>} : memref<1x16x256xbf16, #tpu.memory_space<vmem>>, vector<1x16x256xbf16>,
    return
  }
  func.func @transform_0(%arg0: i32, %arg1: i32) -> (i32, i32, i32) {
    %c0_i32 = arith.constant 0 : i32
    %c0_i32_0 = arith.constant 0 : i32
    return %arg0, %c0_i32, %arg1 : i32, i32, i32
  }
  func.func @transform_1(%arg0: i32, %arg1: i32) -> (i32, i32) {
    %c0_i32 = arith.constant 0 : i32
    %c0_i32_0 = arith.constant 0 : i32
    %c0_i32_1 = arith.constant 0 : i32
    return %c0_i32, %c0_i32_0 : i32, i32
  }
  func.func @transform_2(%arg0: i32, %arg1: i32) -> (i32, i32) {
    %c0_i32 = arith.constant 0 : i32
    %c0_i32_0 = arith.constant 0 : i32
    %c0_i32_1 = arith.constant 0 : i32
    return %c0_i32, %c0_i32_0 : i32, i32
  }
  func.func @transform_3(%arg0: i32, %arg1: i32) -> (i32, i32, i32) {
    %c0_i32 = arith.constant 0 : i32
    %c0_i32_0 = arith.constant 0 : i32
    %c0_i32_1 = arith.constant 0 : i32
    return %arg0, %c0_i32, %c0_i32_0 : i32, i32, i32
  }
  func.func @transform_4(%arg0: i32, %arg1: i32) -> (i32, i32, i32) {
    %c0_i32 = arith.constant 0 : i32
    %c0_i32_0 = arith.constant 0 : i32
    %c0_i32_1 = arith.constant 0 : i32
    return %arg0, %c0_i32, %c0_i32_0 : i32, i32, i32
  }
  func.func @transform_5(%arg0: i32, %arg1: i32) -> (i32, i32) {
    %c0_i32 = arith.constant 0 : i32
    %c0_i32_0 = arith.constant 0 : i32
    %c0_i32_1 = arith.constant 0 : i32
    return %c0_i32, %c0_i32_0 : i32, i32
  }
  func.func @transform_6(%arg0: i32, %arg1: i32) -> (i32, i32) {
    %c0_i32 = arith.constant 0 : i32
    %c0_i32_0 = arith.constant 0 : i32
    %c0_i32_1 = arith.constant 0 : i32
    return %c0_i32, %c0_i32_0 : i32, i32
  }
  func.func @transform_7(%arg0: i32, %arg1: i32) -> (i32, i32, i32) {
    %c0_i32 = arith.constant 0 : i32
    %c0_i32_0 = arith.constant 0 : i32
    return %arg0, %c0_i32, %arg1 : i32, i32, i32
  }
}

module attributes {stable_mosaic.version = 11 : i64} {
  func.func @_fc_matmul_kernel(%arg0: i32, %arg1: i32, %arg2: i32, %arg3: memref<32x256xbf16, #tpu.memory_space<vmem>>, %arg4: memref<256x256xbf16, #tpu.memory_space<vmem>>, %arg5: memref<1x256xf32, #tpu.memory_space<vmem>>, %arg6: memref<32x256xbf16, #tpu.memory_space<vmem>>, %arg7: memref<32x256xf32, #tpu.memory_space<vmem>>) attributes {dimension_semantics = [#tpu.dimension_semantics<parallel>, #tpu.dimension_semantics<parallel>, #tpu.dimension_semantics<arbitrary>], iteration_bounds = array<i64: 1, 1, 1>, scalar_prefetch = 0 : i64, scratch_operands = 1 : i64, tpu.core_type = #tpu.core_type<tc>, window_params = [{transform_indices = @transform_0, window_bounds = array<i64: 32, 256>}, {transform_indices = @transform_1, window_bounds = array<i64: 256, 256>}, {transform_indices = @transform_2, window_bounds = array<i64: 1, 256>}, {transform_indices = @transform_3, window_bounds = array<i64: 32, 256>}]} {
    %c0_i32 = arith.constant 0 : i32
    %0 = arith.cmpi eq, %arg2, %c0_i32 : i32
    %1 = arith.extui %0 : i1 to i32
    %c0_i32_0 = arith.constant 0 : i32
    %2 = arith.cmpi ne, %1, %c0_i32_0 : i32
    scf.if %2 {
      %cst_10 = arith.constant 0.000000e+00 : f32
      %12 = vector.broadcast %cst_10 : f32 to vector<32x256xf32>
      %c0_11 = arith.constant 0 : index
      %c0_12 = arith.constant 0 : index
      %13 = vector.load %arg7[%c0_11, %c0_12] : memref<32x256xf32, #tpu.memory_space<vmem>>, vector<32x256xf32>
      tpu.vector_store %arg7[%c0_11, %c0_12], %12 {strides = array<i32>} : memref<32x256xf32, #tpu.memory_space<vmem>>, vector<32x256xf32>,
    } else {
    }
    %c0 = arith.constant 0 : index
    %c0_1 = arith.constant 0 : index
    %3 = vector.load %arg7[%c0, %c0_1] : memref<32x256xf32, #tpu.memory_space<vmem>>, vector<32x256xf32>
    %c0_2 = arith.constant 0 : index
    %c0_3 = arith.constant 0 : index
    %4 = vector.load %arg3[%c0_2, %c0_3] : memref<32x256xbf16, #tpu.memory_space<vmem>>, vector<32x256xbf16>
    %c0_4 = arith.constant 0 : index
    %c0_5 = arith.constant 0 : index
    %5 = vector.load %arg4[%c0_4, %c0_5] : memref<256x256xbf16, #tpu.memory_space<vmem>>, vector<256x256xbf16>
    %cst = arith.constant dense<0.000000e+00> : vector<32x256xf32>
    %6 = tpu.matmul %4, %5, %cst {dimension_numbers = #tpu.dot_dimension_numbers<[1], [0], [0], [1], [0, 0, 1, 1], [], []>} : vector<32x256xbf16>, vector<256x256xbf16>, vector<32x256xf32> -> vector<32x256xf32>
    %7 = arith.addf %3, %6 : vector<32x256xf32>
    %c0_6 = arith.constant 0 : index
    %c0_7 = arith.constant 0 : index
    %8 = vector.load %arg7[%c0_6, %c0_7] : memref<32x256xf32, #tpu.memory_space<vmem>>, vector<32x256xf32>
    tpu.vector_store %arg7[%c0_6, %c0_7], %7 {strides = array<i32>} : memref<32x256xf32, #tpu.memory_space<vmem>>, vector<32x256xf32>,
    %c0_i32_8 = arith.constant 0 : i32
    %9 = arith.cmpi eq, %arg2, %c0_i32_8 : i32
    %10 = arith.extui %9 : i1 to i32
    %c0_i32_9 = arith.constant 0 : i32
    %11 = arith.cmpi ne, %10, %c0_i32_9 : i32
    scf.if %11 {
      %c0_10 = arith.constant 0 : index
      %c0_11 = arith.constant 0 : index
      %12 = vector.load %arg7[%c0_10, %c0_11] : memref<32x256xf32, #tpu.memory_space<vmem>>, vector<32x256xf32>
      %c0_12 = arith.constant 0 : index
      %c0_13 = arith.constant 0 : index
      %13 = vector.load %arg5[%c0_12, %c0_13] : memref<1x256xf32, #tpu.memory_space<vmem>>, vector<1x256xf32>
      %14 = vector.broadcast %13 : vector<1x256xf32> to vector<32x256xf32>
      %15 = arith.addf %12, %14 : vector<32x256xf32>
      %16 = arith.truncf %15 : vector<32x256xf32> to vector<32x256xbf16>
      %c0_14 = arith.constant 0 : index
      %c0_15 = arith.constant 0 : index
      %17 = vector.load %arg6[%c0_14, %c0_15] : memref<32x256xbf16, #tpu.memory_space<vmem>>, vector<32x256xbf16>
      tpu.vector_store %arg6[%c0_14, %c0_15], %16 {strides = array<i32>} : memref<32x256xbf16, #tpu.memory_space<vmem>>, vector<32x256xbf16>,
    } else {
    }
    return
  }
  func.func @transform_0(%arg0: i32, %arg1: i32, %arg2: i32) -> (i32, i32) {
    %c0_i32 = arith.constant 0 : i32
    return %arg0, %arg2 : i32, i32
  }
  func.func @transform_1(%arg0: i32, %arg1: i32, %arg2: i32) -> (i32, i32) {
    %c0_i32 = arith.constant 0 : i32
    return %arg2, %arg1 : i32, i32
  }
  func.func @transform_2(%arg0: i32, %arg1: i32, %arg2: i32) -> (i32, i32) {
    %c0_i32 = arith.constant 0 : i32
    %c0_i32_0 = arith.constant 0 : i32
    return %c0_i32, %arg1 : i32, i32
  }
  func.func @transform_3(%arg0: i32, %arg1: i32, %arg2: i32) -> (i32, i32) {
    %c0_i32 = arith.constant 0 : i32
    return %arg0, %arg1 : i32, i32
  }
}

module attributes {stable_mosaic.version = 11 : i64} {
  func.func @_resample_kernel(%arg0: i32, %arg1: i32, %arg2: i32, %arg3: memref<2x1x2xi32, #tpu.memory_space<smem>>, %arg4: memref<1x16x256xbf16, #tpu.memory_space<vmem>>, %arg5: memref<1x256x4xi32, #tpu.memory_space<vmem>>, %arg6: memref<1x256x4xf32, #tpu.memory_space<vmem>>, %arg7: memref<1x16x256xf32, #tpu.memory_space<vmem>>, %arg8: memref<16x256xf32, #tpu.memory_space<vmem>>) attributes {dimension_semantics = [#tpu.dimension_semantics<parallel>, #tpu.dimension_semantics<parallel>, #tpu.dimension_semantics<arbitrary>], iteration_bounds = array<i64: 2, 1, 1>, scalar_prefetch = 1 : i64, scratch_operands = 1 : i64, tpu.core_type = #tpu.core_type<tc>, window_params = [{transform_indices = @transform_0, window_bounds = array<i64: 1, 16, 256>}, {transform_indices = @transform_1, window_bounds = array<i64: 1, 256, 4>}, {transform_indices = @transform_2, window_bounds = array<i64: 1, 256, 4>}, {transform_indices = @transform_3, window_bounds = array<i64: 1, 16, 256>}]} {
    %c0_i32 = arith.constant 0 : i32
    %0 = arith.cmpi eq, %arg2, %c0_i32 : i32
    %1 = arith.extui %0 : i1 to i32
    %c0_i32_0 = arith.constant 0 : i32
    %2 = arith.cmpi ne, %1, %c0_i32_0 : i32
    scf.if %2 {
      %cst = arith.constant 0.000000e+00 : f32
      %17 = vector.broadcast %cst : f32 to vector<16x256xf32>
      %c0_4 = arith.constant 0 : index
      %c0_5 = arith.constant 0 : index
      %18 = vector.load %arg8[%c0_4, %c0_5] : memref<16x256xf32, #tpu.memory_space<vmem>>, vector<16x256xf32>
      tpu.vector_store %arg8[%c0_4, %c0_5], %17 {strides = array<i32>} : memref<16x256xf32, #tpu.memory_space<vmem>>, vector<16x256xf32>,
    } else {
    }
    %3 = arith.index_cast %arg0 : i32 to index
    %4 = arith.index_cast %arg1 : i32 to index
    %c0 = arith.constant 0 : index
    %5 = memref.load %arg3[%3, %4, %c0] : memref<2x1x2xi32, #tpu.memory_space<smem>>
    %6 = arith.index_cast %arg0 : i32 to index
    %7 = arith.index_cast %arg1 : i32 to index
    %c1 = arith.constant 1 : index
    %8 = memref.load %arg3[%6, %7, %c1] : memref<2x1x2xi32, #tpu.memory_space<smem>>
    %9 = arith.cmpi sge, %arg2, %5 : i32
    %10 = arith.cmpi sle, %arg2, %8 : i32
    %11 = arith.andi %9, %10 : i1
    %12 = arith.extui %11 : i1 to i32
    %c0_i32_1 = arith.constant 0 : i32
    %13 = arith.cmpi ne, %12, %c0_i32_1 : i32
    scf.if %13 {
      %c0_4 = arith.constant 0 : index
      %c0_5 = arith.constant 0 : index
      %c0_6 = arith.constant 0 : index
      %17 = vector.load %arg4[%c0_4, %c0_5, %c0_6] : memref<1x16x256xbf16, #tpu.memory_space<vmem>>, vector<1x16x256xbf16>
      %18 = vector.shape_cast %17 : vector<1x16x256xbf16> to vector<16x256xbf16>
      %c0_7 = arith.constant 0 : index
      %c0_8 = arith.constant 0 : index
      %c0_9 = arith.constant 0 : index
      %19 = vector.load %arg5[%c0_7, %c0_8, %c0_9] : memref<1x256x4xi32, #tpu.memory_space<vmem>>, vector<1x256x4xi32>
      %20 = vector.shape_cast %19 : vector<1x256x4xi32> to vector<256x4xi32>
      %c0_10 = arith.constant 0 : index
      %c0_11 = arith.constant 0 : index
      %c0_12 = arith.constant 0 : index
      %21 = vector.load %arg6[%c0_10, %c0_11, %c0_12] : memref<1x256x4xf32, #tpu.memory_space<vmem>>, vector<1x256x4xf32>
      %22 = vector.shape_cast %21 : vector<1x256x4xf32> to vector<256x4xf32>
      %c256_i32 = arith.constant 256 : i32
      %23 = arith.muli %arg2, %c256_i32 : i32
      %24 = tpu.iota {dimensions = array<i32: 1>} : vector<256x256xi32>
      %25 = vector.broadcast %23 : i32 to vector<256x256xi32>
      %26 = arith.addi %25, %24 : vector<256x256xi32>
      %cst = arith.constant 0.000000e+00 : f32
      %27 = vector.broadcast %cst : f32 to vector<256x256xf32>
      %28 = vector.extract_strided_slice %20 {offsets = [0, 0], sizes = [256, 1], strides = [1, 1]} : vector<256x4xi32> to vector<256x1xi32>
      %29 = vector.broadcast %28 : vector<256x1xi32> to vector<256x256xi32>
      %30 = arith.cmpi eq, %29, %26 : vector<256x256xi32>
      %31 = vector.extract_strided_slice %22 {offsets = [0, 0], sizes = [256, 1], strides = [1, 1]} : vector<256x4xf32> to vector<256x1xf32>
      %cst_13 = arith.constant 0.000000e+00 : f32
      %32 = vector.shape_cast %31 : vector<256x1xf32> to vector<256x1xf32>
      %33 = vector.broadcast %32 : vector<256x1xf32> to vector<256x256xf32>
      %34 = vector.broadcast %cst_13 : f32 to vector<256x256xf32>
      %35 = arith.select %30, %33, %34 : vector<256x256xi1>, vector<256x256xf32>
      %36 = arith.addf %27, %35 : vector<256x256xf32>
      %37 = vector.extract_strided_slice %20 {offsets = [0, 1], sizes = [256, 1], strides = [1, 1]} : vector<256x4xi32> to vector<256x1xi32>
      %38 = vector.broadcast %37 : vector<256x1xi32> to vector<256x256xi32>
      %39 = arith.cmpi eq, %38, %26 : vector<256x256xi32>
      %40 = vector.extract_strided_slice %22 {offsets = [0, 1], sizes = [256, 1], strides = [1, 1]} : vector<256x4xf32> to vector<256x1xf32>
      %cst_14 = arith.constant 0.000000e+00 : f32
      %41 = vector.shape_cast %40 : vector<256x1xf32> to vector<256x1xf32>
      %42 = vector.broadcast %41 : vector<256x1xf32> to vector<256x256xf32>
      %43 = vector.broadcast %cst_14 : f32 to vector<256x256xf32>
      %44 = arith.select %39, %42, %43 : vector<256x256xi1>, vector<256x256xf32>
      %45 = arith.addf %36, %44 : vector<256x256xf32>
      %46 = vector.extract_strided_slice %20 {offsets = [0, 2], sizes = [256, 1], strides = [1, 1]} : vector<256x4xi32> to vector<256x1xi32>
      %47 = vector.broadcast %46 : vector<256x1xi32> to vector<256x256xi32>
      %48 = arith.cmpi eq, %47, %26 : vector<256x256xi32>
      %49 = vector.extract_strided_slice %22 {offsets = [0, 2], sizes = [256, 1], strides = [1, 1]} : vector<256x4xf32> to vector<256x1xf32>
      %cst_15 = arith.constant 0.000000e+00 : f32
      %50 = vector.shape_cast %49 : vector<256x1xf32> to vector<256x1xf32>
      %51 = vector.broadcast %50 : vector<256x1xf32> to vector<256x256xf32>
      %52 = vector.broadcast %cst_15 : f32 to vector<256x256xf32>
      %53 = arith.select %48, %51, %52 : vector<256x256xi1>, vector<256x256xf32>
      %54 = arith.addf %45, %53 : vector<256x256xf32>
      %55 = vector.extract_strided_slice %20 {offsets = [0, 3], sizes = [256, 1], strides = [1, 1]} : vector<256x4xi32> to vector<256x1xi32>
      %56 = vector.broadcast %55 : vector<256x1xi32> to vector<256x256xi32>
      %57 = arith.cmpi eq, %56, %26 : vector<256x256xi32>
      %58 = vector.extract_strided_slice %22 {offsets = [0, 3], sizes = [256, 1], strides = [1, 1]} : vector<256x4xf32> to vector<256x1xf32>
      %cst_16 = arith.constant 0.000000e+00 : f32
      %59 = vector.shape_cast %58 : vector<256x1xf32> to vector<256x1xf32>
      %60 = vector.broadcast %59 : vector<256x1xf32> to vector<256x256xf32>
      %61 = vector.broadcast %cst_16 : f32 to vector<256x256xf32>
      %62 = arith.select %57, %60, %61 : vector<256x256xi1>, vector<256x256xf32>
      %63 = arith.addf %54, %62 : vector<256x256xf32>
      %c0_17 = arith.constant 0 : index
      %c0_18 = arith.constant 0 : index
      %64 = vector.load %arg8[%c0_17, %c0_18] : memref<16x256xf32, #tpu.memory_space<vmem>>, vector<16x256xf32>
      %65 = arith.truncf %63 : vector<256x256xf32> to vector<256x256xbf16>
      %cst_19 = arith.constant dense<0.000000e+00> : vector<16x256xf32>
      %66 = tpu.matmul %18, %65, %cst_19 {dimension_numbers = #tpu.dot_dimension_numbers<[1], [1], [0], [0], [0, 0, 1, 0], [], []>} : vector<16x256xbf16>, vector<256x256xbf16>, vector<16x256xf32> -> vector<16x256xf32>
      %67 = arith.addf %64, %66 : vector<16x256xf32>
      %c0_20 = arith.constant 0 : index
      %c0_21 = arith.constant 0 : index
      %68 = vector.load %arg8[%c0_20, %c0_21] : memref<16x256xf32, #tpu.memory_space<vmem>>, vector<16x256xf32>
      tpu.vector_store %arg8[%c0_20, %c0_21], %67 {strides = array<i32>} : memref<16x256xf32, #tpu.memory_space<vmem>>, vector<16x256xf32>,
    } else {
    }
    %c0_i32_2 = arith.constant 0 : i32
    %14 = arith.cmpi eq, %arg2, %c0_i32_2 : i32
    %15 = arith.extui %14 : i1 to i32
    %c0_i32_3 = arith.constant 0 : i32
    %16 = arith.cmpi ne, %15, %c0_i32_3 : i32
    scf.if %16 {
      %c0_4 = arith.constant 0 : index
      %c0_5 = arith.constant 0 : index
      %17 = vector.load %arg8[%c0_4, %c0_5] : memref<16x256xf32, #tpu.memory_space<vmem>>, vector<16x256xf32>
      %c0_6 = arith.constant 0 : index
      %c0_7 = arith.constant 0 : index
      %c0_8 = arith.constant 0 : index
      %18 = vector.load %arg7[%c0_6, %c0_7, %c0_8] : memref<1x16x256xf32, #tpu.memory_space<vmem>>, vector<1x16x256xf32>
      %19 = vector.shape_cast %18 : vector<1x16x256xf32> to vector<16x256xf32>
      %20 = vector.shape_cast %17 : vector<16x256xf32> to vector<1x16x256xf32>
      tpu.vector_store %arg7[%c0_6, %c0_7, %c0_8], %20 {strides = array<i32>} : memref<1x16x256xf32, #tpu.memory_space<vmem>>, vector<1x16x256xf32>,
    } else {
    }
    return
  }
  func.func @transform_0(%arg0: i32, %arg1: i32, %arg2: i32, %arg3: memref<2x1x2xi32, #tpu.memory_space<smem>>) -> (i32, i32, i32) {
    %0 = arith.index_cast %arg0 : i32 to index
    %1 = arith.index_cast %arg1 : i32 to index
    %c0 = arith.constant 0 : index
    %2 = memref.load %arg3[%0, %1, %c0] : memref<2x1x2xi32, #tpu.memory_space<smem>>
    %3 = arith.index_cast %arg0 : i32 to index
    %4 = arith.index_cast %arg1 : i32 to index
    %c1 = arith.constant 1 : index
    %5 = memref.load %arg3[%3, %4, %c1] : memref<2x1x2xi32, #tpu.memory_space<smem>>
    %6 = arith.maxsi %2, %arg2 : i32
    %7 = arith.minsi %5, %6 : i32
    %c0_i32 = arith.constant 0 : i32
    %c0_i32_0 = arith.constant 0 : i32
    return %arg0, %c0_i32, %7 : i32, i32, i32
  }
  func.func @transform_1(%arg0: i32, %arg1: i32, %arg2: i32, %arg3: memref<2x1x2xi32, #tpu.memory_space<smem>>) -> (i32, i32, i32) {
    %c0_i32 = arith.constant 0 : i32
    %c0_i32_0 = arith.constant 0 : i32
    return %arg0, %arg1, %c0_i32 : i32, i32, i32
  }
  func.func @transform_2(%arg0: i32, %arg1: i32, %arg2: i32, %arg3: memref<2x1x2xi32, #tpu.memory_space<smem>>) -> (i32, i32, i32) {
    %c0_i32 = arith.constant 0 : i32
    %c0_i32_0 = arith.constant 0 : i32
    return %arg0, %arg1, %c0_i32 : i32, i32, i32
  }
  func.func @transform_3(%arg0: i32, %arg1: i32, %arg2: i32, %arg3: memref<2x1x2xi32, #tpu.memory_space<smem>>) -> (i32, i32, i32) {
    %c0_i32 = arith.constant 0 : i32
    %c0_i32_0 = arith.constant 0 : i32
    return %arg0, %c0_i32, %arg1 : i32, i32, i32
  }
}

</mosaic_0001>

<bundles_post_ra>
// kernel: _lambda_.5
= control target key start
LH: loop header
LB: loop body
LE: loop exit
PB: predicated region body
PF: predicated region fallthrough
CT: control target
= control target key end

     0   :  { %s949_s24 = smov 0   ;;  %s951_s25 = smov 0   ;;  %s1048_s0 = inlined_call_operand.vmem [shape: bf16[2,8,256], index: 0, kind: input, shape index: {}]   ;;  %s1049_s1 = inlined_call_operand.vmem [shape: bf16[16,8], index: 1, kind: input, shape index: {}]   ;;  %s1050_s2 = inlined_call_operand.vmem [shape: f32[16,1], index: 2, kind: input, shape index: {}]   ;;  %s1051_s3 = inlined_call_operand.vmem [shape: f32[2,16,1], index: 3, kind: input, shape index: {}]   ;;  %s1052_s4 = inlined_call_operand.vmem [shape: f32[2,16,1], index: 4, kind: input, shape index: {}]   ;;  %s1053_s5 = inlined_call_operand.vmem [shape: f32[16,1], index: 5, kind: input, shape index: {}]   ;;  %s1054_s6 = inlined_call_operand.vmem [shape: f32[16,1], index: 6, kind: input, shape index: {}]   ;;  %s1055_s7 = inlined_call_operand.vmem [shape: bf16[2,16,256], index: 7, kind: output, shape index: {}]  }
   0x1   :  { %s953_s26 = smov 0  }
   0x2 LB: > { %s29_s27 = sadd.s32 1, %s895_s25  ;;  %p772_p0 = scmp.ge.s32.totalorder %s899_s26, 1  ;;  %s899_s26 = sphi %s953_s26, %s17_s26   ;;  %s895_s25 = sphi %s951_s25, %s1057_s25   ;;  %s891_s24 = sphi %s949_s24, %s1056_s24  }
   0x3   : > { %p31_p1 = scmp.ge.s32.totalorder %s29_s27, 2  ;;  %p278_p2 = scmp.lt.s32.totalorder %s899_s26, 3 }
   0x5   : > { %s1059_s27 = smov (%p31_p1, %s29_s27), 0  ;;  %p279_p3 = pnand %p772_p0, %p278_p2 }
   0x6   : > { %v792_v0 = vld [vmem:[%s1049_s1] sm:$0xff] (!%p279_p3)   ;;  %v901_v1 = vmov (!%p279_p3), 2   ;;  %v902_v2 = vmov (!%p279_p3), 0   ;;  %p329_p4 = scmp.lt.s32.totalorder (!%p279_p3), %s891_s24, 1  ;;  %v903_v6 = vmov (!%p279_p3), 3   ;;  %v904_v7 = vmov (!%p279_p3), 1  }
   0x7   : > { %282 = sbr.rel (%p279_p3) target bundleno = 187 (0xbb), region = 48  ;;  %839 = vset.pattern.permute.xlu1 (!%p279_p3), %v901_v1  ;;  %827 = vset.pattern.permute.xlu0 (!%p279_p3), %v902_v2  ;;  %v793_v3 = vunpack.c.l.bf16 (!%p279_p3), %v792_v0  ;;  %v794_v4 = vunpack.c.h.bf16 (!%p279_p3), %v792_v0  ;;  %v905_v8 = vmov (!%p279_p3), 4   ;;  %v906_v9 = vmov (!%p279_p3), 5   ;;  %v361_v10 = vld [vmem:[%s1050_s2] sm:$0xff] (!%p279_p3)  ;;  %v362_v15 = vld [vmem:[%s1050_s2 + $0x8] sm:$0xff] (!%p279_p3) }
   0x8   : > { %v907_v11 = vmov (!%p279_p3), 6   ;;  %v908_v13 = vmov (!%p279_p3), 7   ;;  %v608_v16 = vld [vmem:[%s1053_s5 + $0x8] sm:$0xff] (!%p279_p3)  ;;  %v607_v20 = vld [vmem:[%s1053_s5] sm:$0xff] (!%p279_p3)  ;;  %v377_v22 = vlaneseq (!%p279_p3) }
   0x9   : > { %v840_v5 = vpack.i.bf16 (!%p279_p3), %v794_v4, %v793_v3  ;;  %v624_v18 = vld [vmem:[%s1054_s6 + $0x8] sm:$0xff] (!%p279_p3)  ;;  %v623_v21 = vld [vmem:[%s1054_s6] sm:$0xff] (!%p279_p3) }
   0xa   : > { %v1005_v23 = vshrl.u32 (!%p279_p3), %v377_v22, 7 }
   0xb   : > { %841 = vperm.xlu1 (!%p279_p3), %839, %v840_v5   ;;  %829 = vperm.xlu0 (!%p279_p3), %827, %v840_v5  }
   0xc   : > { %v427_v27 = vsub.s32 (!%p279_p3), 2, %v1005_v23  ;;  %v379_v28 = vsub.s32 (!%p279_p3), 0, %v1005_v23  ;;  %v451_v29 = vsub.s32 (!%p279_p3), 3, %v1005_v23  ;;  %v403_v30 = vsub.s32 (!%p279_p3), 1, %v1005_v23 }
   0xd   : > { %v475_v33 = vsub.s32 (!%p279_p3), 4, %v1005_v23  ;;  %v499_v36 = vsub.s32 (!%p279_p3), 5, %v1005_v23  ;;  %v523_v53 = vsub.s32 (!%p279_p3), 6, %v1005_v23  ;;  %v547_v54 = vsub.s32 (!%p279_p3), 7, %v1005_v23 }
   0xe   : > { %s1061_s24 = smov (!%p329_p4, %s891_s24), 1 }
   0xf   : > { %845 = vset.pattern.permute.xlu1 %v903_v6  ;;  %833 = vset.pattern.permute.xlu0 %v904_v7  ;;  %s973_s30 = sshll.u32 %s1061_s24, 4  ;;  %s785_s8 = sshll.u32 %s1061_s24, 3 }
  0x10   : > { %847 = vperm.xlu1 %845, %v840_v5   ;;  %835 = vperm.xlu0 %833, %v840_v5   ;;  %s342_s12 = scalar_lea.vmem %s1051_s3, %s973_s30  ;;  %s347_s15 = scalar_lea.vmem %s1052_s4, %s973_s30 }
  0x11   : > { %v576_v12 = vld [vmem:[%s342_s12 + $0x8] sm:$0xff]  ;;  %v575_v17 = vld [vmem:[%s342_s12] sm:$0xff]  ;;  %s336_s11 = scalar_lea.vmem %s1048_s0, %s785_s8  ;;  %s356_s13 = scalar_lea.vmem %s1055_s7, %s973_s30 }
  0x12   : > { %v592_v14 = vld [vmem:[%s347_s15 + $0x8] sm:$0xff]  ;;  %v591_v19 = vld [vmem:[%s347_s15] sm:$0xff] }
  0x13   : > { %v358_v24 = vld [vmem:[%s336_s11] sm:$0xff] }
  0x14   : > { %851 = vset.pattern.permute.xlu1 %v905_v8  ;;  %857 = vset.pattern.permute.xlu0 %v906_v9  ;;  %v1007_v25 = vunpack.c.l.bf16 %v358_v24  ;;  %v1009_v26 = vunpack.c.h.bf16 %v358_v24 }
  0x15   : > { %853 = vperm.xlu1 %851, %v840_v5   ;;  %859 = vperm.xlu0 %857, %v840_v5  }
  0x16   : > { %v428_v34 = vrot.slane %v1007_v25, %v427_v27  ;;  %v432_v35 = vrot.slane %v1009_v26, %v427_v27  ;;  %v380_v37 = vrot.slane %v1007_v25, %v379_v28  ;;  %v384_v38 = vrot.slane %v1009_v26, %v379_v28 }
  0x17   : > { %v452_v39 = vrot.slane %v1007_v25, %v451_v29  ;;  %v456_v40 = vrot.slane %v1009_v26, %v451_v29  ;;  %v404_v43 = vrot.slane %v1007_v25, %v403_v30  ;;  %v408_v44 = vrot.slane %v1009_v26, %v403_v30 }
  0x18   : > { %v476_v47 = vrot.slane %v1007_v25, %v475_v33  ;;  %v480_v48 = vrot.slane %v1009_v26, %v475_v33  ;;  %v500_v51 = vrot.slane %v1007_v25, %v499_v36  ;;  %v504_v52 = vrot.slane %v1009_v26, %v499_v36 }
  0x19   : > { %863 = vset.pattern.permute.xlu1 %v907_v11  ;;  %875 = vset.pattern.permute.xlu0 %v902_v2 }
  0x1a   : > { %865 = vperm.xlu1 %863, %v840_v5   ;;  %563 = vperm.xlu0 %875, %v361_v10  }
  0x1e   : > { %869 = vset.pattern.permute.xlu1 %v908_v13  ;;  %584 = vperm.xlu0 %875, %v576_v12  }
  0x1f   : > { %871 = vperm.xlu1 %869, %v840_v5  }
  0x22   : > { %600 = vperm.xlu0 %875, %v592_v14  }
  0x23   : > { %876 = vset.pattern.permute.xlu1 %v902_v2 }
  0x24   : > { %568 = vperm.xlu1 %876, %v362_v15  }
  0x26   : > { %616 = vperm.xlu0 %875, %v608_v16  }
  0x28   : > { %579 = vperm.xlu1 %876, %v575_v17  }
  0x2a   : > { %632 = vperm.xlu0 %875, %v624_v18  }
  0x2c   : > { %595 = vperm.xlu1 %876, %v591_v19  }
  0x30   : > { %611 = vperm.xlu1 %876, %v607_v20  }
  0x34   : > { %627 = vperm.xlu1 %876, %v623_v21  }
  0x8a   : > { %v842_v31 = vpop.permute.xlu1 %841  ;;  %v830_v32 = vpop.permute.xlu0 %829 }
  0x8b   : > { %v832_v41 = vunpack.i.h.bf16 %v830_v32  ;;  %v831_v42 = vunpack.i.l.bf16 %v830_v32  ;;  %v844_v45 = vunpack.i.h.bf16 %v842_v31  ;;  %v843_v46 = vunpack.i.l.bf16 %v842_v31 }
  0x8d   : > { %v385_v59 = vmul.f32 %v831_v42, %v380_v37  ;;  %v386_v60 = vmul.f32 %v831_v42, %v384_v38  ;;  %v387_v61 = vmul.f32 %v832_v41, %v380_v37  ;;  %v388_v62 = vmul.f32 %v832_v41, %v384_v38 }
  0x8e   : > { %v433_v63 = vmul.f32 %v843_v46, %v428_v34  ;;  %v434_v0 = vmul.f32 %v843_v46, %v432_v35  ;;  %v435_v1 = vmul.f32 %v844_v45, %v428_v34  ;;  %v436_v2 = vmul.f32 %v844_v45, %v432_v35 }
  0x8f   : > { %v848_v49 = vpop.permute.xlu1 %847  ;;  %v836_v50 = vpop.permute.xlu0 %835 }
  0x90   : > { %v850_v55 = vunpack.i.h.bf16 %v848_v49  ;;  %v849_v56 = vunpack.i.l.bf16 %v848_v49  ;;  %v838_v57 = vunpack.i.h.bf16 %v836_v50  ;;  %v837_v58 = vunpack.i.l.bf16 %v836_v50 }
  0x92   : > { %v409_v3 = vmul.f32 %v837_v58, %v404_v43  ;;  %v410_v4 = vmul.f32 %v837_v58, %v408_v44  ;;  %v411_v5 = vmul.f32 %v838_v57, %v404_v43  ;;  %v412_v6 = vmul.f32 %v838_v57, %v408_v44 }
  0x93   : > { %v457_v7 = vmul.f32 %v849_v56, %v452_v39  ;;  %v458_v8 = vmul.f32 %v849_v56, %v456_v40  ;;  %v459_v9 = vmul.f32 %v850_v55, %v452_v39  ;;  %v460_v10 = vmul.f32 %v850_v55, %v456_v40 }
  0x94   : > { %v854_v11 = vpop.permute.xlu1 %853  ;;  %v860_v12 = vpop.permute.xlu0 %859  ;;  %v413_v13 = vadd.f32 %v409_v3, %v385_v59  ;;  %v414_v14 = vadd.f32 %v410_v4, %v386_v60  ;;  %v415_v15 = vadd.f32 %v411_v5, %v387_v61  ;;  %v416_v16 = vadd.f32 %v412_v6, %v388_v62 }
  0x95   : > { %v856_v17 = vunpack.i.h.bf16 %v854_v11  ;;  %v855_v18 = vunpack.i.l.bf16 %v854_v11  ;;  %v862_v19 = vunpack.i.h.bf16 %v860_v12  ;;  %v861_v20 = vunpack.i.l.bf16 %v860_v12 }
  0x96   : > { %v437_v21 = vadd.f32 %v433_v63, %v413_v13  ;;  %v438_v22 = vadd.f32 %v434_v0, %v414_v14  ;;  %v439_v23 = vadd.f32 %v435_v1, %v415_v15  ;;  %v440_v24 = vadd.f32 %v436_v2, %v416_v16 }
  0x97   : > { %v481_v27 = vmul.f32 %v855_v18, %v476_v47  ;;  %v482_v28 = vmul.f32 %v855_v18, %v480_v48  ;;  %v483_v29 = vmul.f32 %v856_v17, %v476_v47  ;;  %v484_v30 = vmul.f32 %v856_v17, %v480_v48 }
  0x98   : > { %v461_v31 = vadd.f32 %v457_v7, %v437_v21  ;;  %v462_v32 = vadd.f32 %v458_v8, %v438_v22  ;;  %v463_v33 = vadd.f32 %v459_v9, %v439_v23  ;;  %v464_v34 = vadd.f32 %v460_v10, %v440_v24 }
  0x99   : > { %v866_v35 = vpop.permute.xlu1 %865  ;;  %v564_v36 = vpop.permute.xlu0 %563  ;;  %v507_v37 = vmul.f32 %v862_v19, %v500_v51  ;;  %v508_v38 = vmul.f32 %v862_v19, %v504_v52  ;;  %v524_v39 = vrot.slane %v1007_v25, %v523_v53  ;;  %v528_v40 = vrot.slane %v1009_v26, %v523_v53 }
  0x9a   : > { %v487_v41 = vadd.f32 %v483_v29, %v463_v33  ;;  %v488_v42 = vadd.f32 %v484_v30, %v464_v34  ;;  %v505_v43 = vmul.f32 %v861_v20, %v500_v51  ;;  %v506_v44 = vmul.f32 %v861_v20, %v504_v52 }
  0x9b   : > { %v485_v45 = vadd.f32 %v481_v27, %v461_v31  ;;  %v486_v46 = vadd.f32 %v482_v28, %v462_v32  ;;  %v868_v47 = vunpack.i.h.bf16 %v866_v35  ;;  %v867_v48 = vunpack.i.l.bf16 %v866_v35 }
  0x9c   : > { %v511_v49 = vadd.f32 %v507_v37, %v487_v41  ;;  %v512_v50 = vadd.f32 %v508_v38, %v488_v42  ;;  %v548_v56 = vrot.slane %v1007_v25, %v547_v54  ;;  %v552_v57 = vrot.slane %v1009_v26, %v547_v54 }
  0x9d   : > { %v585_v55 = vpop.permute.xlu0 %584  ;;  %v531_v58 = vmul.f32 %v868_v47, %v524_v39  ;;  %v532_v59 = vmul.f32 %v868_v47, %v528_v40  ;;  %v509_v62 = vadd.f32 %v505_v43, %v485_v45  ;;  %v510_v63 = vadd.f32 %v506_v44, %v486_v46 }
  0x9e   : > { %v872_v60 = vpop.permute.xlu1 %871  ;;  %v529_v51 = vmul.f32 %v867_v48, %v524_v39  ;;  %v530_v52 = vmul.f32 %v867_v48, %v528_v40 }
  0x9f   : > { %v874_v61 = vunpack.i.h.bf16 %v872_v60  ;;  %v873_v53 = vunpack.i.l.bf16 %v872_v60  ;;  %v535_v3 = vadd.f32 %v531_v58, %v511_v49  ;;  %v536_v4 = vadd.f32 %v532_v59, %v512_v50 }
  0xa0   : > { %v533_v26 = vadd.f32 %v529_v51, %v509_v62  ;;  %v534_v54 = vadd.f32 %v530_v52, %v510_v63 }
  0xa1   : > { %v555_v0 = vmul.f32 %v874_v61, %v548_v56  ;;  %v556_v1 = vmul.f32 %v874_v61, %v552_v57  ;;  %v601_v2 = vpop.permute.xlu0 %600  ;;  %v553_v5 = vmul.f32 %v873_v53, %v548_v56  ;;  %v554_v6 = vmul.f32 %v873_v53, %v552_v57 }
  0xa3   : > { %v569_v7 = vpop.permute.xlu1 %568  ;;  %v559_v25 = vadd.f32 %v555_v0, %v535_v3  ;;  %v560_v8 = vadd.f32 %v556_v1, %v536_v4  ;;  %v557_v12 = vadd.f32 %v553_v5, %v533_v26  ;;  %v558_v13 = vadd.f32 %v554_v6, %v534_v54 }
  0xa5   : > { %v573_v9 = vadd.f32 %v569_v7, %v559_v25  ;;  %v574_v10 = vadd.f32 %v569_v7, %v560_v8  ;;  %v617_v11 = vpop.permute.xlu0 %616  ;;  %v571_v19 = vadd.f32 %v564_v36, %v557_v12  ;;  %v572_v20 = vadd.f32 %v564_v36, %v558_v13 }
  0xa7   : > { %v589_v14 = vsub.f32 %v573_v9, %v585_v55  ;;  %v590_v15 = vsub.f32 %v574_v10, %v585_v55  ;;  %v580_v16 = vpop.permute.xlu1 %579 }
  0xa8   : > { %v587_v29 = vsub.f32 %v571_v19, %v580_v16  ;;  %v588_v30 = vsub.f32 %v572_v20, %v580_v16 }
  0xa9   : > { %v605_v17 = vmul.f32 %v601_v2, %v589_v14  ;;  %v606_v18 = vmul.f32 %v601_v2, %v590_v15  ;;  %v633_v24 = vpop.permute.xlu0 %632 }
  0xab   : > { %v621_v21 = vmul.f32 %v617_v11, %v605_v17  ;;  %v622_v22 = vmul.f32 %v617_v11, %v606_v18  ;;  %v596_v23 = vpop.permute.xlu1 %595 }
  0xac   : > { %v603_v34 = vmul.f32 %v596_v23, %v587_v29  ;;  %v604_v35 = vmul.f32 %v596_v23, %v588_v30 }
  0xad   : > { %v637_v27 = vadd.f32 %v633_v24, %v621_v21  ;;  %v638_v28 = vadd.f32 %v633_v24, %v622_v22 }
  0xaf   : > { %v641_v31 = vmax.f32 %v637_v27, 0.0  ;;  %v642_v32 = vmax.f32 %v638_v28, 0.0  ;;  %v612_v33 = vpop.permute.xlu1 %611 }
  0xb0   : > { %v619_v38 = vmul.f32 %v612_v33, %v603_v34  ;;  %v620_v36 = vmul.f32 %v612_v33, %v604_v35 }
  0xb1   : > { %v790_v37 = vpack.c.bf16 %v642_v32, %v641_v31 }
  0xb3   : > { %656 = vst [vmem:[%s356_s13 + $0x8] sm:$0xff] %v790_v37  ;;  %v628_v39 = vpop.permute.xlu1 %627 }
  0xb4   : > { %v635_v40 = vadd.f32 %v628_v39, %v619_v38  ;;  %v636_v41 = vadd.f32 %v628_v39, %v620_v36 }
  0xb6   : > { %v639_v42 = vmax.f32 %v635_v40, 0.0  ;;  %v640_v43 = vmax.f32 %v636_v41, 0.0 }
  0xb8   : > { %v789_v44 = vpack.c.bf16 %v640_v43, %v639_v42 }
  0xba   : > { %655 = vst [vmem:[%s356_s13] sm:$0xff] %v789_v44 }
  0xbb PF: > { %s17_s26 = sadd.s32 1, %s899_s26   ;;  %s1056_s24 = smov %s895_s25 }
  0xbc   : > { %p14_p5 = scmp.ge.s32.totalorder %s17_s26, 4   ;;  %s1057_s25 = smov %s1059_s27 }
  0xbe   :  { %16 = sbr.rel (!%p14_p5) target bundleno = 2 (0x2), region = 84 }

// kernel: _lambda_.4
= control target key start
LH: loop header
LB: loop body
LE: loop exit
PB: predicated region body
PF: predicated region fallthrough
CT: control target
= control target key end

     0   :  { %s786_s15 = smov 0   ;;  %s788_s16 = smov 0   ;;  %s889_s0 = inlined_call_operand.vmem [shape: bf16[2,8,256], index: 0, kind: input, shape index: {}]   ;;  %s890_s1 = inlined_call_operand.vmem [shape: bf16[16,8], index: 1, kind: input, shape index: {}]   ;;  %s891_s2 = inlined_call_operand.vmem [shape: f32[16,1], index: 2, kind: input, shape index: {}]   ;;  %s892_s3 = inlined_call_operand.vmem [shape: f32[2,16,1], index: 3, kind: output, shape index: {0}]   ;;  %s893_s4 = inlined_call_operand.vmem [shape: f32[2,16,1], index: 4, kind: output, shape index: {1}]  }
   0x1   :  { %s790_s17 = smov 0  }
   0x2 LB: > { %s27_s18 = sadd.s32 1, %s746_s16  ;;  %p625_p0 = scmp.ge.s32.totalorder %s750_s17, 1  ;;  %s750_s17 = sphi %s790_s17, %s15_s17   ;;  %s746_s16 = sphi %s788_s16, %s895_s16   ;;  %s742_s15 = sphi %s786_s15, %s894_s15  }
   0x3   : > { %p29_p1 = scmp.ge.s32.totalorder %s27_s18, 2  ;;  %p184_p2 = scmp.lt.s32.totalorder %s750_s17, 3 }
   0x5   : > { %s897_s18 = smov (%p29_p1, %s27_s18), 0  ;;  %p185_p3 = pnand %p625_p0, %p184_p2 }
   0x6   : > { %v638_v0 = vld [vmem:[%s890_s1] sm:$0xff] (!%p185_p3)   ;;  %v752_v1 = vmov (!%p185_p3), 2   ;;  %v753_v2 = vmov (!%p185_p3), 0   ;;  %v754_v6 = vmov (!%p185_p3), 3   ;;  %v755_v7 = vmov (!%p185_p3), 1   ;;  %v252_v13 = vld [vmem:[%s891_s2 + $0x8] sm:$0xff] (!%p185_p3) }
   0x7   : > { %188 = sbr.rel (%p185_p3) target bundleno = 346 (0x15a), region = 32  ;;  %686 = vset.pattern.permute.xlu1 (!%p185_p3), %v752_v1  ;;  %674 = vset.pattern.permute.xlu0 (!%p185_p3), %v753_v2  ;;  %v639_v3 = vunpack.c.l.bf16 (!%p185_p3), %v638_v0  ;;  %v640_v4 = vunpack.c.h.bf16 (!%p185_p3), %v638_v0  ;;  %v756_v8 = vmov (!%p185_p3), 4   ;;  %v757_v9 = vmov (!%p185_p3), 5   ;;  %v251_v10 = vld [vmem:[%s891_s2] sm:$0xff] (!%p185_p3)  ;;  %p220_p4 = scmp.lt.s32.totalorder (!%p185_p3), %s742_s15, 1 }
   0x8   : > { %v758_v11 = vmov (!%p185_p3), 6   ;;  %v759_v12 = vmov (!%p185_p3), 7   ;;  %vm243_vm0 = vcmask (!%p185_p3), 7168   ;;  %v760_v14 = vmov (!%p185_p3), 0.0  }
   0x9   : > { %v687_v5 = vpack.i.bf16 (!%p185_p3), %v640_v4, %v639_v3  ;;  %245 = vst.msk [vmem:[#allocation2 + $0x8] sm:$0xff] (!%p185_p3), %vm243_vm0, %v760_v14  ;;  %244 = vst.msk [vmem:[#allocation2] sm:$0xff] (!%p185_p3), %vm243_vm0, %v760_v14  ;;  %v267_v15 = vlaneseq (!%p185_p3) }
   0xa   : > { %246 = vst.msk [vmem:[#allocation3] sm:$0xff] (!%p185_p3), %vm243_vm0, %v760_v14  ;;  %247 = vst.msk [vmem:[#allocation3 + $0x8] sm:$0xff] (!%p185_p3), %vm243_vm0, %v760_v14 }
   0xb   : > { %688 = vperm.xlu1 (!%p185_p3), %686, %v687_v5   ;;  %676 = vperm.xlu0 (!%p185_p3), %674, %v687_v5   ;;  %v827_v16 = vshrl.u32 (!%p185_p3), %v267_v15, 7 }
   0xd   : > { %v317_v18 = vsub.s32 (!%p185_p3), 2, %v827_v16  ;;  %v269_v21 = vsub.s32 (!%p185_p3), 0, %v827_v16  ;;  %v341_v22 = vsub.s32 (!%p185_p3), 3, %v827_v16  ;;  %v293_v23 = vsub.s32 (!%p185_p3), 1, %v827_v16 }
   0xe   : > { %s899_s15 = smov (!%p220_p4, %s742_s15), 1  ;;  %v365_v24 = vsub.s32 4, %v827_v16  ;;  %v389_v27 = vsub.s32 5, %v827_v16  ;;  %v413_v31 = vsub.s32 6, %v827_v16  ;;  %v437_v49 = vsub.s32 7, %v827_v16 }
   0xf   : > { %692 = vset.pattern.permute.xlu1 %v754_v6  ;;  %680 = vset.pattern.permute.xlu0 %v755_v7  ;;  %s634_s25 = sshll.u32 %s899_s15, 3  ;;  %s635_s29 = sshll.u32 %s899_s15, 4 }
  0x10   : > { %694 = vperm.xlu1 %692, %v687_v5   ;;  %682 = vperm.xlu0 %680, %v687_v5   ;;  %s227_s28 = scalar_lea.vmem %s889_s0, %s634_s25  ;;  %s233_s6 = scalar_lea.vmem %s892_s3, %s635_s29 }
  0x11   : > { %v248_v17 = vld [vmem:[%s227_s28] sm:$0xff]  ;;  %s238_s9 = scalar_lea.vmem %s893_s4, %s635_s29 }
  0x12   : > { %v830_v19 = vunpack.c.l.bf16 %v248_v17  ;;  %v832_v20 = vunpack.c.h.bf16 %v248_v17 }
  0x14   : > { %698 = vset.pattern.permute.xlu1 %v756_v8  ;;  %704 = vset.pattern.permute.xlu0 %v757_v9  ;;  %v318_v28 = vrot.slane %v830_v19, %v317_v18  ;;  %v322_v29 = vrot.slane %v832_v20, %v317_v18  ;;  %v270_v30 = vrot.slane %v830_v19, %v269_v21 }
  0x15   : > { %700 = vperm.xlu1 %698, %v687_v5   ;;  %706 = vperm.xlu0 %704, %v687_v5   ;;  %v274_v32 = vrot.slane %v832_v20, %v269_v21  ;;  %v342_v33 = vrot.slane %v830_v19, %v341_v22  ;;  %v346_v34 = vrot.slane %v832_v20, %v341_v22 }
  0x16   : > { %v294_v35 = vrot.slane %v830_v19, %v293_v23  ;;  %v298_v38 = vrot.slane %v832_v20, %v293_v23  ;;  %v366_v39 = vrot.slane %v830_v19, %v365_v24  ;;  %v370_v42 = vrot.slane %v832_v20, %v365_v24 }
  0x17   : > { %v390_v43 = vrot.slane %v830_v19, %v389_v27  ;;  %v394_v46 = vrot.slane %v832_v20, %v389_v27  ;;  %v853_v47 = vrot.slane %v830_v19, %v413_v31  ;;  %v856_v48 = vrot.slane %v832_v20, %v413_v31 }
  0x19   : > { %710 = vset.pattern.permute.xlu1 %v758_v11  ;;  %722 = vset.pattern.permute.xlu0 %v753_v2 }
  0x1a   : > { %712 = vperm.xlu1 %710, %v687_v5   ;;  %453 = vperm.xlu0 %722, %v251_v10  }
  0x1e   : > { %716 = vset.pattern.permute.xlu1 %v759_v12 }
  0x1f   : > { %718 = vperm.xlu1 %716, %v687_v5  }
  0x23   : > { %723 = vset.pattern.permute.xlu1 %v753_v2 }
  0x24   : > { %458 = vperm.xlu1 %723, %v252_v13  }
  0x8a   : > { %v689_v25 = vpop.permute.xlu1 %688  ;;  %v677_v26 = vpop.permute.xlu0 %676 }
  0x8b   : > { %v691_v36 = vunpack.i.h.bf16 %v689_v25  ;;  %v690_v37 = vunpack.i.l.bf16 %v689_v25  ;;  %v679_v40 = vunpack.i.h.bf16 %v677_v26  ;;  %v678_v41 = vunpack.i.l.bf16 %v677_v26 }
  0x8d   : > { %v323_v54 = vmul.f32 %v690_v37, %v318_v28  ;;  %v324_v55 = vmul.f32 %v690_v37, %v322_v29  ;;  %v325_v56 = vmul.f32 %v691_v36, %v318_v28  ;;  %v326_v57 = vmul.f32 %v691_v36, %v322_v29 }
  0x8e   : > { %v275_v58 = vmul.f32 %v678_v41, %v270_v30  ;;  %v276_v59 = vmul.f32 %v678_v41, %v274_v32  ;;  %v277_v60 = vmul.f32 %v679_v40, %v270_v30  ;;  %v278_v61 = vmul.f32 %v679_v40, %v274_v32 }
  0x8f   : > { %v695_v44 = vpop.permute.xlu1 %694  ;;  %v683_v45 = vpop.permute.xlu0 %682 }
  0x90   : > { %v697_v50 = vunpack.i.h.bf16 %v695_v44  ;;  %v696_v51 = vunpack.i.l.bf16 %v695_v44  ;;  %v685_v52 = vunpack.i.h.bf16 %v683_v45  ;;  %v684_v53 = vunpack.i.l.bf16 %v683_v45 }
  0x91   : > { %v438_v44 = vrot.slane %v830_v19, %v437_v49 }
  0x92   : > { %v299_v62 = vmul.f32 %v684_v53, %v294_v35  ;;  %v300_v63 = vmul.f32 %v684_v53, %v298_v38  ;;  %v301_v0 = vmul.f32 %v685_v52, %v294_v35  ;;  %v302_v1 = vmul.f32 %v685_v52, %v298_v38 }
  0x93   : > { %v347_v2 = vmul.f32 %v696_v51, %v342_v33  ;;  %v348_v3 = vmul.f32 %v696_v51, %v346_v34  ;;  %v349_v4 = vmul.f32 %v697_v50, %v342_v33  ;;  %v350_v5 = vmul.f32 %v697_v50, %v346_v34 }
  0x94   : > { %v701_v6 = vpop.permute.xlu1 %700  ;;  %v707_v7 = vpop.permute.xlu0 %706  ;;  %v303_v8 = vadd.f32 %v299_v62, %v275_v58  ;;  %v304_v9 = vadd.f32 %v300_v63, %v276_v59  ;;  %v305_v10 = vadd.f32 %v301_v0, %v277_v60  ;;  %v306_v11 = vadd.f32 %v302_v1, %v278_v61 }
  0x95   : > { %v703_v12 = vunpack.i.h.bf16 %v701_v6  ;;  %v702_v13 = vunpack.i.l.bf16 %v701_v6  ;;  %v709_v14 = vunpack.i.h.bf16 %v707_v7  ;;  %v708_v15 = vunpack.i.l.bf16 %v707_v7 }
  0x96   : > { %v327_v16 = vadd.f32 %v323_v54, %v303_v8  ;;  %v328_v17 = vadd.f32 %v324_v55, %v304_v9  ;;  %v329_v18 = vadd.f32 %v325_v56, %v305_v10  ;;  %v330_v21 = vadd.f32 %v326_v57, %v306_v11 }
  0x97   : > { %v371_v22 = vmul.f32 %v702_v13, %v366_v39  ;;  %v372_v23 = vmul.f32 %v702_v13, %v370_v42  ;;  %v373_v24 = vmul.f32 %v703_v12, %v366_v39  ;;  %v374_v25 = vmul.f32 %v703_v12, %v370_v42 }
  0x98   : > { %v351_v26 = vadd.f32 %v347_v2, %v327_v16  ;;  %v352_v27 = vadd.f32 %v348_v3, %v328_v17  ;;  %v353_v28 = vadd.f32 %v349_v4, %v329_v18  ;;  %v354_v29 = vadd.f32 %v350_v5, %v330_v21 }
  0x99   : > { %v713_v30 = vpop.permute.xlu1 %712  ;;  %v395_v31 = vmul.f32 %v708_v15, %v390_v43  ;;  %v396_v32 = vmul.f32 %v708_v15, %v394_v46  ;;  %v397_v33 = vmul.f32 %v709_v14, %v390_v43  ;;  %v398_v34 = vmul.f32 %v709_v14, %v394_v46  ;;  %v454_v62 = vpop.permute.xlu0 %453  ;;  %v466_v14 = vld [vmem:[#allocation2 + $0x8] sm:$0xff]  ;;  %v465_v15 = vld [vmem:[#allocation2] sm:$0xff] }
  0x9a   : > { %v375_v35 = vadd.f32 %v371_v22, %v351_v26  ;;  %v376_v36 = vadd.f32 %v372_v23, %v352_v27  ;;  %v377_v37 = vadd.f32 %v373_v24, %v353_v28  ;;  %v378_v38 = vadd.f32 %v374_v25, %v354_v29  ;;  %v478_v22 = vld [vmem:[#allocation3] sm:$0xff]  ;;  %v479_v23 = vld [vmem:[#allocation3 + $0x8] sm:$0xff] }
  0x9b   : > { %v715_v40 = vunpack.i.h.bf16 %v713_v30  ;;  %v714_v41 = vunpack.i.l.bf16 %v713_v30  ;;  %v442_v39 = vrot.slane %v832_v20, %v437_v49 }
  0x9c   : > { %v399_v42 = vadd.f32 %v395_v31, %v375_v35  ;;  %v400_v45 = vadd.f32 %v396_v32, %v376_v36  ;;  %v401_v50 = vadd.f32 %v397_v33, %v377_v37  ;;  %v402_v51 = vadd.f32 %v398_v34, %v378_v38 }
  0x9d   : > { %v419_v52 = vmul.f32 %v714_v41, %v853_v47  ;;  %v420_v53 = vmul.f32 %v714_v41, %v856_v48  ;;  %v421_v43 = vmul.f32 %v715_v40, %v853_v47  ;;  %v422_v46 = vmul.f32 %v715_v40, %v856_v48 }
  0x9e   : > { %v719_v54 = vpop.permute.xlu1 %718 }
  0x9f   : > { %v721_v55 = vunpack.i.h.bf16 %v719_v54  ;;  %v720_v56 = vunpack.i.l.bf16 %v719_v54  ;;  %v425_v57 = vadd.f32 %v421_v43, %v401_v50  ;;  %v426_v58 = vadd.f32 %v422_v46, %v402_v51 }
  0xa0   : > { %v423_v19 = vadd.f32 %v419_v52, %v399_v42  ;;  %v424_v59 = vadd.f32 %v420_v53, %v400_v45 }
  0xa1   : > { %v443_v20 = vmul.f32 %v720_v56, %v438_v44  ;;  %v444_v49 = vmul.f32 %v720_v56, %v442_v39  ;;  %v445_v60 = vmul.f32 %v721_v55, %v438_v44  ;;  %v446_v61 = vmul.f32 %v721_v55, %v442_v39 }
  0xa3   : > { %v459_v63 = vpop.permute.xlu1 %458  ;;  %v449_v0 = vadd.f32 %v445_v60, %v425_v57  ;;  %v450_v1 = vadd.f32 %v446_v61, %v426_v58  ;;  %v447_v2 = vadd.f32 %v443_v20, %v423_v19  ;;  %v448_v3 = vadd.f32 %v444_v49, %v424_v59 }
  0xa5   : > { %v463_v47 = vadd.f32 %v459_v63, %v449_v0  ;;  %v464_v4 = vadd.f32 %v459_v63, %v450_v1  ;;  %v461_v48 = vadd.f32 %v454_v62, %v447_v2  ;;  %v462_v5 = vadd.f32 %v454_v62, %v448_v3 }
  0xa7   : > { %v470_v6 = vadd.f32 %v464_v4, %v463_v47  ;;  %v467_v7 = vadd.f32 %v462_v5, %v461_v48  ;;  %v480_v8 = vmul.f32 %v461_v48, %v461_v48  ;;  %v481_v9 = vmul.f32 %v462_v5, %v462_v5 }
  0xa8   : > { %v482_v10 = vmul.f32 %v463_v47, %v463_v47  ;;  %v483_v11 = vmul.f32 %v464_v4, %v464_v4 }
  0xa9   : > { %471 = vadd.xlane.f32.xlu0 %v470_v6  ;;  %468 = vadd.xlane.f32.xlu1 %v467_v7  ;;  %v484_v12 = vadd.f32 %v481_v9, %v480_v8 }
  0xaa   : > { %v487_v13 = vadd.f32 %v483_v11, %v482_v10 }
  0xad   : > { %485 = vadd.xlane.f32.xlu0 %v484_v12  ;;  %488 = vadd.xlane.f32.xlu1 %v487_v13 }
 0x136   : > { %v472_v16 = vpop.xlane.xlu0 %471  ;;  %v469_v17 = vpop.xlane.xlu1 %468 }
 0x137   : > { %v474_v18 = vadd.f32 %v472_v16, %v466_v14  ;;  %v473_v21 = vadd.f32 %v469_v17, %v465_v15 }
 0x139   : > { %477 = vst.msk [vmem:[#allocation2 + $0x8] sm:$0xff] %vm243_vm0, %v474_v18  ;;  %476 = vst.msk [vmem:[#allocation2] sm:$0xff] %vm243_vm0, %v473_v21 }
 0x13a   : > { %v486_v24 = vpop.xlane.xlu0 %485  ;;  %v489_v25 = vpop.xlane.xlu1 %488 }
 0x13b   : > { %v490_v26 = vadd.f32 %v486_v24, %v478_v22  ;;  %v491_v27 = vadd.f32 %v489_v25, %v479_v23 }
 0x13d   : > { %492 = vst.msk [vmem:[#allocation3] sm:$0xff] %vm243_vm0, %v490_v26  ;;  %493 = vst.msk [vmem:[#allocation3 + $0x8] sm:$0xff] %vm243_vm0, %v491_v27 }
 0x140   : > { %v498_v28 = vld [vmem:[#allocation2 + $0x8] sm:$0xff]  ;;  %v497_v29 = vld [vmem:[#allocation2] sm:$0xff] }
 0x141   : > { %v502_v30 = vmul.f32 0.00390625, %v498_v28  ;;  %v501_v31 = vmul.f32 0.00390625, %v497_v29 }
 0x143   : > { %512 = vst.msk [vmem:[%s233_s6 + $0x8] sm:$0xff] %vm243_vm0, %v502_v30  ;;  %511 = vst.msk [vmem:[%s233_s6] sm:$0xff] %vm243_vm0, %v501_v31  ;;  %v506_v34 = vmul.f32 %v502_v30, %v502_v30  ;;  %v505_v35 = vmul.f32 %v501_v31, %v501_v31 }
 0x144   : > { %v499_v32 = vld [vmem:[#allocation3] sm:$0xff]  ;;  %v500_v33 = vld [vmem:[#allocation3 + $0x8] sm:$0xff] }
 0x145   : > { %v503_v36 = vmul.f32 0.00390625, %v499_v32  ;;  %v504_v37 = vmul.f32 0.00390625, %v500_v33 }
 0x147   : > { %v507_v38 = vsub.f32 %v503_v36, %v505_v35  ;;  %v508_v40 = vsub.f32 %v504_v37, %v506_v34 }
 0x149   : > { %v509_v41 = vmax.f32 %v507_v38, 0.0  ;;  %v510_v44 = vmax.f32 %v508_v40, 0.0 }
 0x14b   : > { %v513_v39 = vadd.f32 1e-05, %v509_v41  ;;  %v514_v42 = vadd.f32 1e-05, %v510_v44 }
 0x14d   : > { %724 = vrsqrt.f32 %v513_v39 }
 0x14e   : > { %726 = vrsqrt.f32 %v514_v42 }
 0x157   : > { %v725_v45 = vpop.eup %724 }
 0x158   : > { %v727_v50 = vpop.eup %726  ;;  %517 = vst.msk [vmem:[%s238_s9] sm:$0xff] %vm243_vm0, %v725_v45 }
 0x159   : > { %518 = vst.msk [vmem:[%s238_s9 + $0x8] sm:$0xff] %vm243_vm0, %v727_v50 }
 0x15a PF: > { %s15_s17 = sadd.s32 1, %s750_s17   ;;  %s894_s15 = smov %s746_s16 }
 0x15b   : > { %p12_p5 = scmp.ge.s32.totalorder %s15_s17, 4   ;;  %s895_s16 = smov %s897_s18 }
 0x15d   :  { %14 = sbr.rel (!%p12_p5) target bundleno = 2 (0x2), region = 82 }

// kernel: _lambda_.6
= control target key start
LH: loop header
LB: loop body
LE: loop exit
PB: predicated region body
PF: predicated region fallthrough
CT: control target
= control target key end

     0   :  { %v332_v36 = vlaneseq  ;;  %s655_s1 = inlined_call_operand.vmem [shape: bf16[256,256], index: 1, kind: input, shape index: {}]   ;;  %s656_s0 = inlined_call_operand.vmem [shape: bf16[32,256], index: 0, kind: input, shape index: {}]   ;;  %s657_s2 = inlined_call_operand.vmem [shape: f32[1,256], index: 2, kind: input, shape index: {}]   ;;  %s658_s3 = inlined_call_operand.vmem [shape: bf16[32,256], index: 3, kind: output, shape index: {}]  }
   0x1   :  { %v458_v0 = vld [vmem:[%s655_s1 + $0x4] ss:$8 sps:$4 sm:$0xff]   ;;  %v460_v1 = vld [vmem:[%s655_s1] ss:$8 sps:$4 sm:$0xff]   ;;  %v461_v2 = vld [vmem:[%s655_s1 + $0x14] ss:$8 sps:$4 sm:$0xff]  }
   0x2   :  { %250 = vmatprep.subr.bf16.mxu0 %v458_v0  ;;  %426 = vmatprep.subr.bf16.mxu1 %v458_v0  ;;  %v463_v3 = vld [vmem:[%s655_s1 + $0x10] ss:$8 sps:$4 sm:$0xff]   ;;  %v464_v4 = vld [vmem:[%s655_s1 + $0x24] ss:$8 sps:$4 sm:$0xff]   ;;  %v466_v5 = vld [vmem:[%s655_s1 + $0x20] ss:$8 sps:$4 sm:$0xff]  }
   0x3   :  { %251 = vmatpush1.bf16.msra.mxu0 %v460_v1  ;;  %442 = vmatpush1.bf16.msra.mxu1 %v460_v1  ;;  %v467_v6 = vld [vmem:[%s655_s1 + $0x34] ss:$8 sps:$4 sm:$0xff]   ;;  %v469_v7 = vld [vmem:[%s655_s1 + $0x30] ss:$8 sps:$4 sm:$0xff]   ;;  %v470_v8 = vld [vmem:[%s655_s1 + $0x44] ss:$8 sps:$4 sm:$0xff]  }
   0x4   :  { %252 = vmatprep.subr.bf16.mxu0 %v461_v2  ;;  %427 = vmatprep.subr.bf16.mxu1 %v461_v2  ;;  %v472_v9 = vld [vmem:[%s655_s1 + $0x40] ss:$8 sps:$4 sm:$0xff]   ;;  %v473_v10 = vld [vmem:[%s655_s1 + $0x54] ss:$8 sps:$4 sm:$0xff]   ;;  %v475_v11 = vld [vmem:[%s655_s1 + $0x50] ss:$8 sps:$4 sm:$0xff]  }
   0x5   :  { %v476_v12 = vld [vmem:[%s655_s1 + $0x64] ss:$8 sps:$4 sm:$0xff]   ;;  %v478_v14 = vld [vmem:[%s655_s1 + $0x60] ss:$8 sps:$4 sm:$0xff]   ;;  %v511_v15 = vld [vmem:[%s656_s0 + $0x14] ss:$8 sps:$4 sm:$0xff]  }
   0x6   :  { %v508_v13 = vld [vmem:[%s656_s0 + $0x4] ss:$8 sps:$4 sm:$0xff]   ;;  %v479_v16 = vld [vmem:[%s655_s1 + $0x74] ss:$8 sps:$4 sm:$0xff]   ;;  %292 = vmatprep.mubr.bf16.mxu1 %v511_v15  ;;  %v481_v17 = vld [vmem:[%s655_s1 + $0x70] ss:$8 sps:$4 sm:$0xff]  }
   0x7   :  { %253 = vmatpush1.bf16.msra.mxu0 %v463_v3  ;;  %443 = vmatpush1.bf16.msra.mxu1 %v463_v3  ;;  %v482_v18 = vld [vmem:[%s655_s1 + $0x84] ss:$8 sps:$4 sm:$0xff]   ;;  %v484_v19 = vld [vmem:[%s655_s1 + $0x80] ss:$8 sps:$4 sm:$0xff]   ;;  %v485_v20 = vld [vmem:[%s655_s1 + $0x94] ss:$8 sps:$4 sm:$0xff]  }
   0x8   :  { %254 = vmatprep.subr.bf16.mxu0 %v464_v4  ;;  %428 = vmatprep.subr.bf16.mxu1 %v464_v4  ;;  %v487_v21 = vld [vmem:[%s655_s1 + $0x90] ss:$8 sps:$4 sm:$0xff]   ;;  %v488_v22 = vld [vmem:[%s655_s1 + $0xa4] ss:$8 sps:$4 sm:$0xff]   ;;  %v490_v23 = vld [vmem:[%s655_s1 + $0xa0] ss:$8 sps:$4 sm:$0xff]  }
   0x9   :  { %282 = vmatprep.mubr.bf16.mxu0 %v508_v13  ;;  %v491_v24 = vld [vmem:[%s655_s1 + $0xb4] ss:$8 sps:$4 sm:$0xff]   ;;  %v493_v25 = vld [vmem:[%s655_s1 + $0xb0] ss:$8 sps:$4 sm:$0xff]   ;;  %v494_v26 = vld [vmem:[%s655_s1 + $0xc4] ss:$8 sps:$4 sm:$0xff]  }
   0xa   :  { %v496_v27 = vld [vmem:[%s655_s1 + $0xc0] ss:$8 sps:$4 sm:$0xff]   ;;  %v497_v28 = vld [vmem:[%s655_s1 + $0xd4] ss:$8 sps:$4 sm:$0xff]   ;;  %v499_v29 = vld [vmem:[%s655_s1 + $0xd0] ss:$8 sps:$4 sm:$0xff]  }
   0xb   :  { %255 = vmatpush1.bf16.msra.mxu0 %v466_v5  ;;  %444 = vmatpush1.bf16.msra.mxu1 %v466_v5  ;;  %v500_v30 = vld [vmem:[%s655_s1 + $0xe4] ss:$8 sps:$4 sm:$0xff]   ;;  %v502_v31 = vld [vmem:[%s655_s1 + $0xe0] ss:$8 sps:$4 sm:$0xff]   ;;  %v503_v32 = vld [vmem:[%s655_s1 + $0xf4] ss:$8 sps:$4 sm:$0xff]  }
   0xc   :  { %256 = vmatprep.subr.bf16.mxu0 %v467_v6  ;;  %429 = vmatprep.subr.bf16.mxu1 %v467_v6  ;;  %v505_v33 = vld [vmem:[%s655_s1 + $0xf0] ss:$8 sps:$4 sm:$0xff]   ;;  %v506_v34 = vld [vmem:[%s656_s0] ss:$8 sps:$4 sm:$0xff]   ;;  %v333_v37 = vshrl.u32 %v332_v36, 7 }
   0xd   :  { %v509_v35 = vld [vmem:[%s656_s0 + $0x10] ss:$8 sps:$4 sm:$0xff]   ;;  %v330_v39 = vld [vmem:[%s657_s2] sm:$0x3] }
   0xe   :  { %v334_v38 = vsub.s32 0, %v333_v37  ;;  %v338_v40 = vsub.s32 1, %v333_v37 }
   0xf   :  { %257 = vmatpush1.bf16.msra.mxu0 %v469_v7  ;;  %445 = vmatpush1.bf16.msra.mxu1 %v469_v7 }
  0x10   :  { %258 = vmatprep.subr.bf16.mxu0 %v470_v8  ;;  %430 = vmatprep.subr.bf16.mxu1 %v470_v8  ;;  %v335_v41 = vrot.slane %v330_v39, %v334_v38  ;;  %v339_v42 = vrot.slane %v330_v39, %v338_v40 }
  0x13   :  { %259 = vmatpush1.bf16.msra.mxu0 %v472_v9  ;;  %446 = vmatpush1.bf16.msra.mxu1 %v472_v9 }
  0x14   :  { %260 = vmatprep.subr.bf16.mxu0 %v473_v10  ;;  %431 = vmatprep.subr.bf16.mxu1 %v473_v10 }
  0x17   :  { %261 = vmatpush1.bf16.msra.mxu0 %v475_v11  ;;  %447 = vmatpush1.bf16.msra.mxu1 %v475_v11 }
  0x18   :  { %262 = vmatprep.subr.bf16.mxu0 %v476_v12  ;;  %432 = vmatprep.subr.bf16.mxu1 %v476_v12 }
  0x1b   :  { %263 = vmatpush1.bf16.msra.mxu0 %v478_v14  ;;  %448 = vmatpush1.bf16.msra.mxu1 %v478_v14 }
  0x1c   :  { %264 = vmatprep.subr.bf16.mxu0 %v479_v16  ;;  %433 = vmatprep.subr.bf16.mxu1 %v479_v16 }
  0x1f   :  { %265 = vmatpush1.bf16.msra.mxu0 %v481_v17  ;;  %449 = vmatpush1.bf16.msra.mxu1 %v481_v17 }
  0x20   :  { %266 = vmatprep.subr.bf16.mxu0 %v482_v18  ;;  %434 = vmatprep.subr.bf16.mxu1 %v482_v18 }
  0x23   :  { %267 = vmatpush1.bf16.msra.mxu0 %v484_v19  ;;  %450 = vmatpush1.bf16.msra.mxu1 %v484_v19 }
  0x24   :  { %268 = vmatprep.subr.bf16.mxu0 %v485_v20  ;;  %435 = vmatprep.subr.bf16.mxu1 %v485_v20 }
  0x27   :  { %269 = vmatpush1.bf16.msra.mxu0 %v487_v21  ;;  %451 = vmatpush1.bf16.msra.mxu1 %v487_v21 }
  0x28   :  { %270 = vmatprep.subr.bf16.mxu0 %v488_v22  ;;  %436 = vmatprep.subr.bf16.mxu1 %v488_v22 }
  0x2b   :  { %271 = vmatpush1.bf16.msra.mxu0 %v490_v23  ;;  %452 = vmatpush1.bf16.msra.mxu1 %v490_v23 }
  0x2c   :  { %272 = vmatprep.subr.bf16.mxu0 %v491_v24  ;;  %437 = vmatprep.subr.bf16.mxu1 %v491_v24 }
  0x2f   :  { %273 = vmatpush1.bf16.msra.mxu0 %v493_v25  ;;  %453 = vmatpush1.bf16.msra.mxu1 %v493_v25 }
  0x30   :  { %274 = vmatprep.subr.bf16.mxu0 %v494_v26  ;;  %438 = vmatprep.subr.bf16.mxu1 %v494_v26 }
  0x33   :  { %275 = vmatpush1.bf16.msra.mxu0 %v496_v27  ;;  %454 = vmatpush1.bf16.msra.mxu1 %v496_v27 }
  0x34   :  { %276 = vmatprep.subr.bf16.mxu0 %v497_v28  ;;  %439 = vmatprep.subr.bf16.mxu1 %v497_v28 }
  0x37   :  { %277 = vmatpush1.bf16.msra.mxu0 %v499_v29  ;;  %455 = vmatpush1.bf16.msra.mxu1 %v499_v29 }
  0x38   :  { %278 = vmatprep.subr.bf16.mxu0 %v500_v30  ;;  %440 = vmatprep.subr.bf16.mxu1 %v500_v30 }
  0x3b   :  { %279 = vmatpush1.bf16.msra.mxu0 %v502_v31  ;;  %456 = vmatpush1.bf16.msra.mxu1 %v502_v31 }
  0x3c   :  { %280 = vmatprep.subr.bf16.mxu0 %v503_v32  ;;  %441 = vmatprep.subr.bf16.mxu1 %v503_v32 }
  0x3f   :  { %281 = vmatpush1.bf16.msra.mxu0 %v505_v33  ;;  %457 = vmatpush1.bf16.msra.mxu1 %v505_v33 }
  0x42   :  { %283 = vmatmul.mubr.bf16.vlgmr.msra.gmra.mrb[0].mxu0 %v506_v34  ;;  %293 = vmatmul.mubr.bf16.vlgmr.msra.gmra.mrb[0].mxu1 %v509_v35 }
 0x115   :  { %v284_v43 = vpop.f32.mrb[0].mxu0  ;;  %v294_v44 = vpop.f32.mrb[0].mxu1 }
 0x116   :  { %v342_v45 = vadd.f32 %v335_v41, %v284_v43  ;;  %v346_v46 = vadd.f32 %v335_v41, %v294_v44  ;;  %v286_v47 = vpop.f32.mrb[1].mxu0  ;;  %v296_v48 = vpop.f32.mrb[1].mxu1 }
 0x117   :  { %v343_v49 = vadd.f32 %v339_v42, %v286_v47  ;;  %v347_v50 = vadd.f32 %v339_v42, %v296_v48  ;;  %v288_v51 = vpop.f32.mrb[2].mxu0  ;;  %v298_v52 = vpop.f32.mrb[2].mxu1 }
 0x118   :  { %v344_v53 = vadd.f32 %v335_v41, %v288_v51  ;;  %v348_v54 = vadd.f32 %v335_v41, %v298_v52  ;;  %v290_v55 = vpop.f32.mrb[3].mxu0  ;;  %v300_v56 = vpop.f32.mrb[3].mxu1 }
 0x119   :  { %v422_v57 = vpack.c.bf16 %v343_v49, %v342_v45  ;;  %v424_v58 = vpack.c.bf16 %v347_v50, %v346_v46  ;;  %v345_v59 = vadd.f32 %v339_v42, %v290_v55  ;;  %v349_v60 = vadd.f32 %v339_v42, %v300_v56 }
 0x11b   :  { %374 = vst [vmem:[%s658_s3] sm:$0xff] %v422_v57  ;;  %376 = vst [vmem:[%s658_s3 + $0x10] sm:$0xff] %v424_v58  ;;  %v423_v61 = vpack.c.bf16 %v345_v59, %v344_v53  ;;  %v425_v62 = vpack.c.bf16 %v349_v60, %v348_v54 }
 0x11d   :  { %375 = vst [vmem:[%s658_s3 + $0x8] sm:$0xff] %v423_v61  ;;  %377 = vst [vmem:[%s658_s3 + $0x18] sm:$0xff] %v425_v62 }

// kernel: _lambda_.7
= control target key start
LH: loop header
LB: loop body
LE: loop exit
PB: predicated region body
PF: predicated region fallthrough
CT: control target
= control target key end

     0   :  { %s4080_s0 = inlined_call_operand.vmem [shape: s32[2,1,2], index: 0, kind: input, shape index: {}]   ;;  %s4081_s1 = inlined_call_operand.vmem [shape: bf16[2,16,256], index: 1, kind: input, shape index: {}]   ;;  %s4082_s2 = inlined_call_operand.vmem [shape: s32[2,256,4], index: 2, kind: input, shape index: {}]   ;;  %s4083_s3 = inlined_call_operand.vmem [shape: f32[2,256,4], index: 3, kind: input, shape index: {}]   ;;  %s4084_s4 = inlined_call_operand.vmem [shape: f32[2,16,256], index: 4, kind: output, shape index: {}]  }
   0x1   :  { %s9_s17 = sshll.u32 %s4080_s0, 4  ;;  %s10_s17 = int_to_ptr.vmem [resolvable:$true] %s9_s17 }
   0x2   :  { %s2508_s18 = scalar_lea.vmem %s10_s17, 32  ;;  %p2513_p1 = scmp.lt.s32.totalorder %s10_s17, %s10_s17 }
   0x3   :  { %p2509_p0 = scmp.ne.s32.totalorder %s10_s17, %s2508_s18  ;;  %p2514_p2 = scmp.lt.s32.totalorder %s2508_s18, %s2508_s18 }
   0x5   :  { %p2515_p3 = por %p2514_p2, %p2513_p1 }
   0x7   :  { %p2516_p4 = pnand %p2515_p3, %p2509_p0 }
   0x9   :  { %2519 = shalt.err (!%p2516_p4)  }
   0xa   :  { %s2546_s19 = smov [#allocation4]  }
   0xb   :  { %12 = dma.vmem_to_smem %s10_s17, 32, %s2546_s19, [#allocation3] }
   0xc   :  { %2532 = dma.done.wait [#allocation3], 32 }
   0xd   :  { %2533 = vsyncadd [#allocation3], 4294967264 }
   0xe   :  { %14 = sfence }
   0xf   :  { %s2580_s20 = smov 0   ;;  %s2582_s21 = smov 0  }
  0x10   :  { %s2584_s22 = smov 0  }
  0x11 LB: > { %s39_s0 = sadd.s32 1, %s2540_s21  ;;  %p2387_p5 = scmp.ge.s32.totalorder %s2544_s22, 1  ;;  %s2544_s22 = sphi %s2584_s22, %s20_s22   ;;  %s2540_s21 = sphi %s2582_s21, %s4490_s21   ;;  %s2536_s20 = sphi %s2580_s20, %s4489_s20  }
  0x12   : > { %p41_p6 = scmp.ge.s32.totalorder %s39_s0, 2  ;;  %p242_p7 = scmp.lt.s32.totalorder %s2544_s22, 3 }
  0x14   : > { %s4492_s0 = smov (%p41_p6, %s39_s0), 0  ;;  %p243_p8 = pnand %p2387_p5, %p242_p7 }
  0x15   : > { %s2388_s23 = sshll.u32 (!%p243_p8), %s2536_s20, 7  ;;  %p311_p9 = scmp.lt.s32.totalorder (!%p243_p8), %s2536_s20, 1  ;;  %v2547_v0 = vmov (!%p243_p8), 0.0  }
  0x16   : > { %246 = sbr.rel (%p243_p8) target bundleno = 1018 (0x3fa), region = 32  ;;  %s303_s24 = sld [smem:[#allocation4 + %s2388_s23]] (!%p243_p8)  ;;  %363 = vst [vmem:[#allocation2] sm:$0xff] (!%p243_p8), %v2547_v0  ;;  %364 = vst [vmem:[#allocation2 + $0x8] sm:$0xff] (!%p243_p8), %v2547_v0 }
  0x17   : > { %s304_s25 = sadd.s32 (!%p243_p8), 1, %s2388_s23  ;;  %365 = vst [vmem:[#allocation2 + $0x10] sm:$0xff] (!%p243_p8), %v2547_v0  ;;  %366 = vst [vmem:[#allocation2 + $0x18] sm:$0xff] (!%p243_p8), %v2547_v0  ;;  %s369_s27 = sld [smem:[#allocation4 + %s2388_s23]] (!%p243_p8) }
  0x18   : > { %s305_s26 = sld [smem:[#allocation4 + %s304_s25]] (!%p243_p8) }
  0x19   : > { %s371_s28 = sld [smem:[#allocation4 + %s304_s25]] (!%p243_p8) }
  0x1c   : > { %p306_p10 = scmp.gt.s32.totalorder (!%p243_p8), %s303_s24, 0 }
  0x1d   : > { %s4494_s20 = smov (!%p311_p9, %s2536_s20), 1  ;;  %p2399_p11 = scmp.le.s32.totalorder %s369_s27, 0 }
  0x1e   : > { %s2405_s29 = sshll.u32 %s4494_s20, 8  ;;  %s2407_s10 = sshll.u32 %s4494_s20, 5 }
  0x1f   : > { %s2601_s6 = scalar_lea.vmem %s4082_s2, %s2405_s29  ;;  %s2606_s9 = scalar_lea.vmem %s4083_s3, %s2405_s29 }
  0x20   : > { %s2611_s13 = scalar_lea.vmem %s4084_s4, %s2407_s10  ;;  %s4496_s24 = smov (!%p306_p10, %s303_s24), 0 }
  0x21   : > { %p2400_p12 = scmp.ge.s32.totalorder %s371_s28, 0  ;;  %p308_p13 = scmp.lt.s32.totalorder %s305_s26, %s4496_s24 }
  0x22   : > { %s2390_s15 = sshll.u32 %s4494_s20, 2 }
  0x23   : > { %p374_p0 = pnand %p2400_p12, %p2399_p11  ;;  %s4498_s26 = smov (!%p308_p13, %s305_s26), %s4496_s24 }
  0x24   : > { %s2389_s14 = sshll.u32 %s4498_s26, 1 }
  0x25   : > { %p313_p1 = scmp.lt.s32.totalorder %s2389_s14, 1  ;;  %377 = sbr.rel (%p374_p0) target bundleno = 1010 (0x3f2), region = 40 }
  0x27   : > { %s4500_s14 = smov (!%p313_p1, %s2389_s14), 1 }
  0x28   : > { %s316_s16 = sadd.s32 %s2390_s15, %s4500_s14 }
  0x29   : > { %s2391_s17 = sshll.u32 %s316_s16, 2 }
  0x2a   : > { %s2616_s23 = scalar_lea.vmem %s4081_s1, %s2391_s17 }
  0x2c   : > { %v2619_v1 = vld [vmem:[%s2601_s6 + $0x10] sm:$0xff]  ;;  %v2622_v2 = vld [vmem:[%s2601_s6] sm:$0xff]  ;;  %v2548_v3 = vmov 0   ;;  %v2627_v4 = vld [vmem:[%s2601_s6 + $0x18] sm:$0xff] }
  0x2d   : > { %2439 = vset.pattern.permute.xlu1 %v2548_v3  ;;  %2438 = vset.pattern.permute.xlu0 %v2548_v3  ;;  %v2630_v5 = vld [vmem:[%s2601_s6 + $0x8] sm:$0xff]  ;;  %v2638_v7 = vld [vmem:[%s2601_s6 + $0x20] sm:$0xff]  ;;  %v2643_v8 = vld [vmem:[%s2601_s6 + $0x38] sm:$0xff] }
  0x2e   : > { %458 = vperm.xlu1 %2439, %v2619_v1   ;;  %452 = vperm.xlu0 %2438, %v2622_v2   ;;  %v2635_v6 = vld [vmem:[%s2601_s6 + $0x28] sm:$0xff]  ;;  %v2646_v9 = vld [vmem:[%s2601_s6 + $0x30] sm:$0xff]  ;;  %v2654_v11 = vld [vmem:[%s2601_s6 + $0x40] sm:$0xff] }
  0x2f   : > { %v2651_v10 = vld [vmem:[%s2601_s6 + $0x48] sm:$0xff]  ;;  %v2659_v12 = vld [vmem:[%s2601_s6 + $0x58] sm:$0xff]  ;;  %v2662_v13 = vld [vmem:[%s2601_s6 + $0x50] sm:$0xff] }
  0x30   : > { %v2667_v14 = vld [vmem:[%s2601_s6 + $0x68] sm:$0xff]  ;;  %v2670_v15 = vld [vmem:[%s2601_s6 + $0x60] sm:$0xff]  ;;  %v2675_v16 = vld [vmem:[%s2601_s6 + $0x78] sm:$0xff] }
  0x31   : > { %v2678_v17 = vld [vmem:[%s2601_s6 + $0x70] sm:$0xff]  ;;  %v2683_v18 = vld [vmem:[%s2601_s6 + $0x88] sm:$0xff]  ;;  %v2686_v19 = vld [vmem:[%s2601_s6 + $0x80] sm:$0xff] }
  0x32   : > { %461 = vperm.xlu1 %2439, %v2627_v4   ;;  %455 = vperm.xlu0 %2438, %v2630_v5   ;;  %v2691_v20 = vld [vmem:[%s2601_s6 + $0x98] sm:$0xff]  ;;  %v2694_v21 = vld [vmem:[%s2601_s6 + $0x90] sm:$0xff]  ;;  %v2699_v22 = vld [vmem:[%s2601_s6 + $0xa8] sm:$0xff] }
  0x33   : > { %v2702_v23 = vld [vmem:[%s2601_s6 + $0xa0] sm:$0xff]  ;;  %v2707_v24 = vld [vmem:[%s2601_s6 + $0xb8] sm:$0xff]  ;;  %v2710_v25 = vld [vmem:[%s2601_s6 + $0xb0] sm:$0xff] }
  0x34   : > { %v2715_v26 = vld [vmem:[%s2601_s6 + $0xc8] sm:$0xff]  ;;  %v2718_v27 = vld [vmem:[%s2601_s6 + $0xc0] sm:$0xff]  ;;  %v2723_v28 = vld [vmem:[%s2601_s6 + $0xd8] sm:$0xff] }
  0x35   : > { %4224 = vst [vmem:[#allocation6_spill] sm:$0xff] %v2718_v27  ;;  %v2726_v29 = vld [vmem:[%s2601_s6 + $0xd0] sm:$0xff]  ;;  %v2731_v30 = vld [vmem:[%s2601_s6 + $0xe8] sm:$0xff]  ;;  %v2734_v31 = vld [vmem:[%s2601_s6 + $0xe0] sm:$0xff] }
  0x36   : > { %467 = vperm.xlu1 %2439, %v2635_v6   ;;  %464 = vperm.xlu0 %2438, %v2638_v7   ;;  %4225 = vst [vmem:[#allocation7_spill] sm:$0xff] %v2726_v29  ;;  %4226 = vst [vmem:[#allocation8_spill] sm:$0xff] %v2734_v31  ;;  %v2739_v32 = vld [vmem:[%s2601_s6 + $0xf8] sm:$0xff]  ;;  %v2742_v33 = vld [vmem:[%s2601_s6 + $0xf0] sm:$0xff] }
  0x37   : > { %4227 = vst [vmem:[#allocation9_spill] sm:$0xff] %v2742_v33  ;;  %v2747_v34 = vld [vmem:[%s2606_s9 + $0x8] sm:$0xff]  ;;  %v2750_v35 = vld [vmem:[%s2606_s9] sm:$0xff]  ;;  %v2755_v36 = vld [vmem:[%s2606_s9 + $0x18] sm:$0xff] }
  0x38   : > { %v2758_v37 = vld [vmem:[%s2606_s9 + $0x10] sm:$0xff]  ;;  %v2763_v38 = vld [vmem:[%s2606_s9 + $0x28] sm:$0xff]  ;;  %v2766_v39 = vld [vmem:[%s2606_s9 + $0x20] sm:$0xff] }
  0x39   : > { %v2771_v40 = vld [vmem:[%s2606_s9 + $0x38] sm:$0xff]  ;;  %v2774_v41 = vld [vmem:[%s2606_s9 + $0x30] sm:$0xff]  ;;  %v2779_v42 = vld [vmem:[%s2606_s9 + $0x48] sm:$0xff] }
  0x3a   : > { %473 = vperm.xlu1 %2439, %v2643_v8   ;;  %470 = vperm.xlu0 %2438, %v2646_v9   ;;  %v2782_v43 = vld [vmem:[%s2606_s9 + $0x40] sm:$0xff]  ;;  %v2787_v44 = vld [vmem:[%s2606_s9 + $0x58] sm:$0xff]  ;;  %v2790_v45 = vld [vmem:[%s2606_s9 + $0x50] sm:$0xff] }
  0x3b   : > { %v2795_v46 = vld [vmem:[%s2606_s9 + $0x68] sm:$0xff]  ;;  %v2798_v47 = vld [vmem:[%s2606_s9 + $0x60] sm:$0xff]  ;;  %v2803_v48 = vld [vmem:[%s2606_s9 + $0x78] sm:$0xff] }
  0x3c   : > { %v2806_v49 = vld [vmem:[%s2606_s9 + $0x70] sm:$0xff]  ;;  %v2811_v50 = vld [vmem:[%s2606_s9 + $0x88] sm:$0xff]  ;;  %v2814_v51 = vld [vmem:[%s2606_s9 + $0x80] sm:$0xff] }
  0x3d   : > { %v2819_v52 = vld [vmem:[%s2606_s9 + $0x98] sm:$0xff]  ;;  %v2822_v53 = vld [vmem:[%s2606_s9 + $0x90] sm:$0xff]  ;;  %v2827_v54 = vld [vmem:[%s2606_s9 + $0xa8] sm:$0xff] }
  0x3e   : > { %479 = vperm.xlu1 %2439, %v2651_v10   ;;  %476 = vperm.xlu0 %2438, %v2654_v11   ;;  %v2830_v55 = vld [vmem:[%s2606_s9 + $0xa0] sm:$0xff]  ;;  %v2835_v56 = vld [vmem:[%s2606_s9 + $0xb8] sm:$0xff]  ;;  %v2838_v57 = vld [vmem:[%s2606_s9 + $0xb0] sm:$0xff] }
  0x3f   : > { %v2843_v58 = vld [vmem:[%s2606_s9 + $0xc8] sm:$0xff]  ;;  %v2846_v59 = vld [vmem:[%s2606_s9 + $0xc0] sm:$0xff]  ;;  %v2851_v60 = vld [vmem:[%s2606_s9 + $0xd8] sm:$0xff] }
  0x40   : > { %4228 = vst [vmem:[#allocation10_spill] sm:$0xff] %v2843_v58  ;;  %4229 = vst [vmem:[#allocation11_spill] sm:$0xff] %v2851_v60  ;;  %v2854_v61 = vld [vmem:[%s2606_s9 + $0xd0] sm:$0xff]  ;;  %v2859_v62 = vld [vmem:[%s2606_s9 + $0xe8] sm:$0xff] }
  0x41   : > { %4230 = vst [vmem:[#allocation12_spill] sm:$0xff] %v2854_v61  ;;  %4231 = vst [vmem:[#allocation13_spill] sm:$0xff] %v2859_v62  ;;  %v2862_v63 = vld [vmem:[%s2606_s9 + $0xe0] sm:$0xff]  ;;  %v2867_v0 = vld [vmem:[%s2606_s9 + $0xf8] sm:$0xff] }
  0x42   : > { %485 = vperm.xlu1 %2439, %v2659_v12   ;;  %482 = vperm.xlu0 %2438, %v2662_v13   ;;  %4232 = vst [vmem:[#allocation14_spill] sm:$0xff] %v2862_v63  ;;  %4233 = vst [vmem:[#allocation15_spill] sm:$0xff] %v2867_v0  ;;  %v2870_v3 = vld [vmem:[%s2606_s9 + $0xf0] sm:$0xff] }
  0x46   : > { %491 = vperm.xlu1 %2439, %v2667_v14   ;;  %488 = vperm.xlu0 %2438, %v2670_v15  }
  0x4a   : > { %497 = vperm.xlu1 %2439, %v2675_v16   ;;  %494 = vperm.xlu0 %2438, %v2678_v17  }
  0x4e   : > { %503 = vperm.xlu1 %2439, %v2683_v18   ;;  %500 = vperm.xlu0 %2438, %v2686_v19  }
  0x52   : > { %509 = vperm.xlu1 %2439, %v2691_v20   ;;  %506 = vperm.xlu0 %2438, %v2694_v21  }
  0x56   : > { %515 = vperm.xlu1 %2439, %v2699_v22   ;;  %512 = vperm.xlu0 %2438, %v2702_v23  }
  0x5a   : > { %521 = vperm.xlu1 %2439, %v2707_v24   ;;  %518 = vperm.xlu0 %2438, %v2710_v25  }
  0x5e   : > { %527 = vperm.xlu1 %2439, %v2715_v26   ;;  %524 = vperm.xlu0 %2438, %v2718_v27  }
  0x62   : > { %533 = vperm.xlu1 %2439, %v2723_v28   ;;  %530 = vperm.xlu0 %2438, %v2726_v29  }
  0x66   : > { %539 = vperm.xlu1 %2439, %v2731_v30   ;;  %536 = vperm.xlu0 %2438, %v2734_v31  }
  0x6a   : > { %545 = vperm.xlu1 %2439, %v2739_v32   ;;  %542 = vperm.xlu0 %2438, %v2742_v33  }
  0x6e   : > { %618 = vperm.xlu1 %2439, %v2747_v34   ;;  %613 = vperm.xlu0 %2438, %v2750_v35  }
  0x72   : > { %628 = vperm.xlu1 %2439, %v2755_v36   ;;  %623 = vperm.xlu0 %2438, %v2758_v37  }
  0x76   : > { %638 = vperm.xlu1 %2439, %v2763_v38   ;;  %633 = vperm.xlu0 %2438, %v2766_v39  }
  0x7a   : > { %648 = vperm.xlu1 %2439, %v2771_v40   ;;  %643 = vperm.xlu0 %2438, %v2774_v41  }
  0x7e   : > { %658 = vperm.xlu1 %2439, %v2779_v42   ;;  %653 = vperm.xlu0 %2438, %v2782_v43  }
  0x82   : > { %668 = vperm.xlu1 %2439, %v2787_v44   ;;  %663 = vperm.xlu0 %2438, %v2790_v45  }
  0x86   : > { %678 = vperm.xlu1 %2439, %v2795_v46   ;;  %673 = vperm.xlu0 %2438, %v2798_v47  }
  0x8a   : > { %688 = vperm.xlu1 %2439, %v2803_v48   ;;  %683 = vperm.xlu0 %2438, %v2806_v49  }
  0x8e   : > { %698 = vperm.xlu1 %2439, %v2811_v50   ;;  %693 = vperm.xlu0 %2438, %v2814_v51  }
  0x92   : > { %708 = vperm.xlu1 %2439, %v2819_v52   ;;  %703 = vperm.xlu0 %2438, %v2822_v53  }
  0x96   : > { %718 = vperm.xlu1 %2439, %v2827_v54   ;;  %713 = vperm.xlu0 %2438, %v2830_v55  }
  0x9a   : > { %728 = vperm.xlu1 %2439, %v2835_v56   ;;  %723 = vperm.xlu0 %2438, %v2838_v57  }
  0x9e   : > { %738 = vperm.xlu1 %2439, %v2843_v58   ;;  %733 = vperm.xlu0 %2438, %v2846_v59  }
  0xa2   : > { %748 = vperm.xlu1 %2439, %v2851_v60   ;;  %743 = vperm.xlu0 %2438, %v2854_v61   ;;  %v2549_v61 = vmov 1  }
  0xa6   : > { %758 = vperm.xlu1 %2439, %v2859_v62   ;;  %753 = vperm.xlu0 %2438, %v2862_v63  }
  0xaa   : > { %768 = vperm.xlu1 %2439, %v2867_v0   ;;  %763 = vperm.xlu0 %2438, %v2870_v3  }
  0xad   : > { %v2874_v58 = vpop.permute.xlu1 %458  ;;  %v2876_v60 = vpop.permute.xlu0 %452 }
  0xae   : > { %4234 = vst [vmem:[#allocation16_spill] sm:$0xff] %v2874_v58  ;;  %4235 = vst [vmem:[#allocation17_spill] sm:$0xff] %v2876_v60  ;;  %2441 = vset.pattern.permute.xlu1 %v2549_v61  ;;  %2440 = vset.pattern.permute.xlu0 %v2549_v61 }
  0xaf   : > { %903 = vperm.xlu1 %2441, %v2630_v5   ;;  %900 = vperm.xlu0 %2440, %v2622_v2  }
  0xb1   : > { %v2880_v62 = vpop.permute.xlu1 %461  ;;  %v2882_v63 = vpop.permute.xlu0 %455 }
  0xb2   : > { %4236 = vst [vmem:[#allocation18_spill] sm:$0xff] %v2880_v62  ;;  %4237 = vst [vmem:[#allocation19_spill] sm:$0xff] %v2882_v63 }
  0xb3   : > { %906 = vperm.xlu1 %2441, %v2619_v1   ;;  %909 = vperm.xlu0 %2440, %v2627_v4  }
  0xb5   : > { %v2886_v0 = vpop.permute.xlu1 %467  ;;  %v2888_v58 = vpop.permute.xlu0 %464 }
  0xb6   : > { %4238 = vst [vmem:[#allocation20_spill] sm:$0xff] %v2886_v0  ;;  %4239 = vst [vmem:[#allocation21_spill] sm:$0xff] %v2888_v58 }
  0xb7   : > { %912 = vperm.xlu1 %2441, %v2638_v7   ;;  %915 = vperm.xlu0 %2440, %v2635_v6  }
  0xb9   : > { %v2892_v61 = vpop.permute.xlu1 %473  ;;  %v2894_v60 = vpop.permute.xlu0 %470 }
  0xba   : > { %4240 = vst [vmem:[#allocation22_spill] sm:$0xff] %v2892_v61  ;;  %4241 = vst [vmem:[#allocation23_spill] sm:$0xff] %v2894_v60 }
  0xbb   : > { %918 = vperm.xlu1 %2441, %v2646_v9   ;;  %921 = vperm.xlu0 %2440, %v2643_v8  }
  0xbd   : > { %v2898_v62 = vpop.permute.xlu1 %479  ;;  %v2900_v63 = vpop.permute.xlu0 %476 }
  0xbe   : > { %4242 = vst [vmem:[#allocation24_spill] sm:$0xff] %v2898_v62  ;;  %4243 = vst [vmem:[#allocation25_spill] sm:$0xff] %v2900_v63 }
  0xbf   : > { %924 = vperm.xlu1 %2441, %v2654_v11   ;;  %927 = vperm.xlu0 %2440, %v2651_v10  }
  0xc1   : > { %v2904_v0 = vpop.permute.xlu1 %485  ;;  %v2906_v58 = vpop.permute.xlu0 %482 }
  0xc2   : > { %4244 = vst [vmem:[#allocation26_spill] sm:$0xff] %v2904_v0  ;;  %4245 = vst [vmem:[#allocation27_spill] sm:$0xff] %v2906_v58 }
  0xc3   : > { %930 = vperm.xlu1 %2441, %v2662_v13   ;;  %933 = vperm.xlu0 %2440, %v2659_v12  }
  0xc5   : > { %v2910_v61 = vpop.permute.xlu1 %491  ;;  %v2912_v60 = vpop.permute.xlu0 %488 }
  0xc6   : > { %4246 = vst [vmem:[#allocation28_spill] sm:$0xff] %v2910_v61  ;;  %4247 = vst [vmem:[#allocation29_spill] sm:$0xff] %v2912_v60 }
  0xc7   : > { %936 = vperm.xlu1 %2441, %v2670_v15   ;;  %939 = vperm.xlu0 %2440, %v2667_v14  }
  0xc9   : > { %v2916_v62 = vpop.permute.xlu1 %497  ;;  %v2918_v63 = vpop.permute.xlu0 %494 }
  0xca   : > { %4248 = vst [vmem:[#allocation30_spill] sm:$0xff] %v2916_v62  ;;  %4249 = vst [vmem:[#allocation31_spill] sm:$0xff] %v2918_v63 }
  0xcb   : > { %942 = vperm.xlu1 %2441, %v2678_v17   ;;  %945 = vperm.xlu0 %2440, %v2675_v16  }
  0xcd   : > { %v2922_v0 = vpop.permute.xlu1 %503  ;;  %v2924_v58 = vpop.permute.xlu0 %500 }
  0xce   : > { %4250 = vst [vmem:[#allocation32_spill] sm:$0xff] %v2922_v0  ;;  %4251 = vst [vmem:[#allocation33_spill] sm:$0xff] %v2924_v58 }
  0xcf   : > { %948 = vperm.xlu1 %2441, %v2686_v19   ;;  %951 = vperm.xlu0 %2440, %v2683_v18  }
  0xd1   : > { %v2928_v61 = vpop.permute.xlu1 %509  ;;  %v2930_v60 = vpop.permute.xlu0 %506 }
  0xd2   : > { %4252 = vst [vmem:[#allocation34_spill] sm:$0xff] %v2928_v61  ;;  %4253 = vst [vmem:[#allocation35_spill] sm:$0xff] %v2930_v60 }
  0xd3   : > { %954 = vperm.xlu1 %2441, %v2694_v21   ;;  %957 = vperm.xlu0 %2440, %v2691_v20  }
  0xd5   : > { %v2934_v62 = vpop.permute.xlu1 %515  ;;  %v2936_v63 = vpop.permute.xlu0 %512 }
  0xd6   : > { %4254 = vst [vmem:[#allocation36_spill] sm:$0xff] %v2934_v62  ;;  %4255 = vst [vmem:[#allocation37_spill] sm:$0xff] %v2936_v63 }
  0xd7   : > { %960 = vperm.xlu1 %2441, %v2702_v23   ;;  %963 = vperm.xlu0 %2440, %v2699_v22  }
  0xd9   : > { %v2940_v0 = vpop.permute.xlu1 %521  ;;  %v2942_v58 = vpop.permute.xlu0 %518 }
  0xda   : > { %4256 = vst [vmem:[#allocation38_spill] sm:$0xff] %v2940_v0  ;;  %4257 = vst [vmem:[#allocation39_spill] sm:$0xff] %v2942_v58 }
  0xdb   : > { %966 = vperm.xlu1 %2441, %v2710_v25   ;;  %969 = vperm.xlu0 %2440, %v2707_v24  }
  0xdd   : > { %v2946_v61 = vpop.permute.xlu1 %527  ;;  %v2948_v60 = vpop.permute.xlu0 %524 }
  0xde   : > { %4258 = vst [vmem:[#allocation40_spill] sm:$0xff] %v2946_v61  ;;  %4259 = vst [vmem:[#allocation41_spill] sm:$0xff] %v2948_v60 }
  0xdf   : > { %972 = vperm.xlu1 %2441, %v2718_v27   ;;  %975 = vperm.xlu0 %2440, %v2715_v26   ;;  %v4299_v27 = vld [vmem:[#allocation14_spill] sm:$0xff] }
  0xe1   : > { %v2952_v62 = vpop.permute.xlu1 %533  ;;  %v2954_v63 = vpop.permute.xlu0 %530 }
  0xe2   : > { %4260 = vst [vmem:[#allocation42_spill] sm:$0xff] %v2952_v62  ;;  %4261 = vst [vmem:[#allocation43_spill] sm:$0xff] %v2954_v63 }
  0xe3   : > { %978 = vperm.xlu1 %2441, %v2726_v29   ;;  %981 = vperm.xlu0 %2440, %v2723_v28  }
  0xe5   : > { %v2958_v0 = vpop.permute.xlu1 %539  ;;  %v2960_v58 = vpop.permute.xlu0 %536 }
  0xe6   : > { %4262 = vst [vmem:[#allocation44_spill] sm:$0xff] %v2958_v0  ;;  %4263 = vst [vmem:[#allocation45_spill] sm:$0xff] %v2960_v58 }
  0xe7   : > { %984 = vperm.xlu1 %2441, %v2734_v31   ;;  %987 = vperm.xlu0 %2440, %v2731_v30   ;;  %v4295_v31 = vld [vmem:[#allocation12_spill] sm:$0xff] }
  0xe9   : > { %v2964_v60 = vpop.permute.xlu1 %545  ;;  %v2966_v61 = vpop.permute.xlu0 %542 }
  0xea   : > { %4264 = vst [vmem:[#allocation46_spill] sm:$0xff] %v2964_v60  ;;  %4265 = vst [vmem:[#allocation47_spill] sm:$0xff] %v2966_v61 }
  0xeb   : > { %990 = vperm.xlu1 %2441, %v2742_v33   ;;  %993 = vperm.xlu0 %2440, %v2739_v32  }
  0xed   : > { %v2970_v62 = vpop.permute.xlu1 %618  ;;  %v2972_v63 = vpop.permute.xlu0 %613 }
  0xee   : > { %4266 = vst [vmem:[#allocation48_spill] sm:$0xff] %v2970_v62  ;;  %4267 = vst [vmem:[#allocation49_spill] sm:$0xff] %v2972_v63 }
  0xef   : > { %1060 = vperm.xlu1 %2441, %v2750_v35   ;;  %1064 = vperm.xlu0 %2440, %v2747_v34  }
  0xf1   : > { %v2976_v0 = vpop.permute.xlu1 %628  ;;  %v2978_v58 = vpop.permute.xlu0 %623 }
  0xf2   : > { %4268 = vst [vmem:[#allocation50_spill] sm:$0xff] %v2976_v0  ;;  %4269 = vst [vmem:[#allocation51_spill] sm:$0xff] %v2978_v58 }
  0xf3   : > { %1068 = vperm.xlu1 %2441, %v2758_v37   ;;  %1072 = vperm.xlu0 %2440, %v2755_v36  }
  0xf5   : > { %v2982_v61 = vpop.permute.xlu1 %638  ;;  %v2984_v60 = vpop.permute.xlu0 %633 }
  0xf6   : > { %4270 = vst [vmem:[#allocation52_spill] sm:$0xff] %v2982_v61  ;;  %4271 = vst [vmem:[#allocation53_spill] sm:$0xff] %v2984_v60 }
  0xf7   : > { %1076 = vperm.xlu1 %2441, %v2766_v39   ;;  %1080 = vperm.xlu0 %2440, %v2763_v38  }
  0xf9   : > { %v2988_v63 = vpop.permute.xlu1 %648  ;;  %v2990_v62 = vpop.permute.xlu0 %643 }
  0xfa   : > { %4272 = vst [vmem:[#allocation54_spill] sm:$0xff] %v2988_v63  ;;  %4273 = vst [vmem:[#allocation55_spill] sm:$0xff] %v2990_v62 }
  0xfb   : > { %1084 = vperm.xlu1 %2441, %v2774_v41   ;;  %1088 = vperm.xlu0 %2440, %v2771_v40  }
  0xfd   : > { %v2994_v58 = vpop.permute.xlu1 %658  ;;  %v2996_v0 = vpop.permute.xlu0 %653 }
  0xfe   : > { %4274 = vst [vmem:[#allocation56_spill] sm:$0xff] %v2994_v58  ;;  %4275 = vst [vmem:[#allocation57_spill] sm:$0xff] %v2996_v0 }
  0xff   : > { %1092 = vperm.xlu1 %2441, %v2782_v43   ;;  %1096 = vperm.xlu0 %2440, %v2779_v42  }
 0x101   : > { %v3000_v60 = vpop.permute.xlu1 %668  ;;  %v3002_v61 = vpop.permute.xlu0 %663 }
 0x102   : > { %4276 = vst [vmem:[#allocation58_spill] sm:$0xff] %v3000_v60  ;;  %4277 = vst [vmem:[#allocation59_spill] sm:$0xff] %v3002_v61 }
 0x103   : > { %1100 = vperm.xlu1 %2441, %v2790_v45   ;;  %1104 = vperm.xlu0 %2440, %v2787_v44  }
 0x105   : > { %v3006_v62 = vpop.permute.xlu1 %678  ;;  %v3008_v63 = vpop.permute.xlu0 %673 }
 0x106   : > { %4278 = vst [vmem:[#allocation60_spill] sm:$0xff] %v3006_v62  ;;  %4279 = vst [vmem:[#allocation61_spill] sm:$0xff] %v3008_v63 }
 0x107   : > { %1108 = vperm.xlu1 %2441, %v2798_v47   ;;  %1112 = vperm.xlu0 %2440, %v2795_v46  }
 0x109   : > { %v3012_v0 = vpop.permute.xlu1 %688  ;;  %v3014_v58 = vpop.permute.xlu0 %683 }
 0x10a   : > { %4280 = vst [vmem:[#allocation62_spill] sm:$0xff] %v3012_v0  ;;  %4281 = vst [vmem:[#allocation63_spill] sm:$0xff] %v3014_v58 }
 0x10b   : > { %1116 = vperm.xlu1 %2441, %v2806_v49   ;;  %1120 = vperm.xlu0 %2440, %v2803_v48  }
 0x10d   : > { %v3018_v61 = vpop.permute.xlu1 %698  ;;  %v3020_v60 = vpop.permute.xlu0 %693 }
 0x10e   : > { %4282 = vst [vmem:[#allocation64_spill] sm:$0xff] %v3018_v61  ;;  %4283 = vst [vmem:[#allocation65_spill] sm:$0xff] %v3020_v60 }
 0x10f   : > { %1124 = vperm.xlu1 %2441, %v2814_v51   ;;  %1128 = vperm.xlu0 %2440, %v2811_v50  }
 0x111   : > { %v3024_v63 = vpop.permute.xlu1 %708  ;;  %v3026_v62 = vpop.permute.xlu0 %703 }
 0x112   : > { %4284 = vst [vmem:[#allocation66_spill] sm:$0xff] %v3024_v63  ;;  %4285 = vst [vmem:[#allocation67_spill] sm:$0xff] %v3026_v62 }
 0x113   : > { %1132 = vperm.xlu1 %2441, %v2822_v53   ;;  %1136 = vperm.xlu0 %2440, %v2819_v52  }
 0x115   : > { %v3030_v58 = vpop.permute.xlu1 %718  ;;  %v3032_v0 = vpop.permute.xlu0 %713 }
 0x116   : > { %4286 = vst [vmem:[#allocation68_spill] sm:$0xff] %v3030_v58  ;;  %4287 = vst [vmem:[#allocation69_spill] sm:$0xff] %v3032_v0  ;;  %v4292_v58 = vld [vmem:[#allocation10_spill] sm:$0xff] }
 0x117   : > { %1140 = vperm.xlu1 %2441, %v2830_v55   ;;  %1144 = vperm.xlu0 %2440, %v2827_v54  }
 0x119   : > { %v3036_v60 = vpop.permute.xlu1 %728  ;;  %v3038_v61 = vpop.permute.xlu0 %723 }
 0x11a   : > { %4288 = vst [vmem:[#allocation70_spill] sm:$0xff] %v3036_v60  ;;  %4289 = vst [vmem:[#allocation71_spill] sm:$0xff] %v3038_v61  ;;  %v4296_v60 = vld [vmem:[#allocation11_spill] sm:$0xff] }
 0x11b   : > { %1148 = vperm.xlu1 %2441, %v2838_v57   ;;  %1152 = vperm.xlu0 %2440, %v2835_v56  }
 0x11d   : > { %v3042_v63 = vpop.permute.xlu1 %738  ;;  %v3044_v62 = vpop.permute.xlu0 %733 }
 0x11e   : > { %4290 = vst [vmem:[#allocation72_spill] sm:$0xff] %v3042_v63  ;;  %4291 = vst [vmem:[#allocation73_spill] sm:$0xff] %v3044_v62  ;;  %v4300_v63 = vld [vmem:[#allocation13_spill] sm:$0xff] }
 0x11f   : > { %1156 = vperm.xlu1 %2441, %v2846_v59   ;;  %1160 = vperm.xlu0 %2440, %v4292_v58  }
 0x121   : > { %v3048_v0 = vpop.permute.xlu1 %748  ;;  %v3050_v33 = vpop.permute.xlu0 %743 }
 0x122   : > { %4293 = vst [vmem:[#allocation10_spill] sm:$0xff] %v3048_v0  ;;  %4294 = vst [vmem:[#allocation74_spill] sm:$0xff] %v3050_v33  ;;  %v4303_v0 = vld [vmem:[#allocation15_spill] sm:$0xff] }
 0x123   : > { %1164 = vperm.xlu1 %2441, %v4295_v31   ;;  %1168 = vperm.xlu0 %2440, %v4296_v60   ;;  %v4161_v60 = vmov 2  }
 0x125   : > { %v3054_v61 = vpop.permute.xlu1 %758  ;;  %v3056_v29 = vpop.permute.xlu0 %753 }
 0x126   : > { %4297 = vst [vmem:[#allocation12_spill] sm:$0xff] %v3054_v61  ;;  %4298 = vst [vmem:[#allocation75_spill] sm:$0xff] %v3056_v29 }
 0x127   : > { %1172 = vperm.xlu1 %2441, %v4299_v27   ;;  %1176 = vperm.xlu0 %2440, %v4300_v63  }
 0x129   : > { %v3060_v62 = vpop.permute.xlu1 %768  ;;  %v3062_v59 = vpop.permute.xlu0 %763 }
 0x12a   : > { %4301 = vst [vmem:[#allocation14_spill] sm:$0xff] %v3060_v62  ;;  %4302 = vst [vmem:[#allocation13_spill] sm:$0xff] %v3062_v59 }
 0x12b   : > { %1180 = vperm.xlu1 %2441, %v2870_v3   ;;  %1184 = vperm.xlu0 %2440, %v4303_v0  }
 0x12e   : > { %v3066_v33 = vpop.permute.xlu1 %903  ;;  %v3068_v31 = vpop.permute.xlu0 %900 }
 0x12f   : > { %2442 = vset.pattern.permute.xlu1 %v4161_v60  ;;  %2443 = vset.pattern.permute.xlu0 %v4161_v60 }
 0x130   : > { %1316 = vperm.xlu1 %2442, %v2622_v2   ;;  %1319 = vperm.xlu0 %2443, %v2630_v5  }
 0x132   : > { %v3074_v27 = vpop.permute.xlu1 %906  ;;  %v3076_v59 = vpop.permute.xlu0 %909 }
 0x133   : > { %4304 = vst [vmem:[#allocation15_spill] sm:$0xff] %v3076_v59 }
 0x134   : > { %1322 = vperm.xlu1 %2442, %v2619_v1   ;;  %1328 = vperm.xlu0 %2443, %v2638_v7  }
 0x136   : > { %v3080_v3 = vpop.permute.xlu1 %912  ;;  %v3082_v62 = vpop.permute.xlu0 %915 }
 0x137   : > { %4305 = vst [vmem:[#allocation76_spill] sm:$0xff] %v3080_v3  ;;  %4306 = vst [vmem:[#allocation77_spill] sm:$0xff] %v3082_v62 }
 0x138   : > { %1325 = vperm.xlu1 %2442, %v2627_v4   ;;  %1334 = vperm.xlu0 %2443, %v2646_v9  }
 0x13a   : > { %v3086_v60 = vpop.permute.xlu1 %918  ;;  %v3088_v29 = vpop.permute.xlu0 %921 }
 0x13b   : > { %4307 = vst [vmem:[#allocation78_spill] sm:$0xff] %v3086_v60  ;;  %4308 = vst [vmem:[#allocation79_spill] sm:$0xff] %v3088_v29 }
 0x13c   : > { %1331 = vperm.xlu1 %2442, %v2635_v6   ;;  %1340 = vperm.xlu0 %2443, %v2654_v11  }
 0x13e   : > { %v3092_v61 = vpop.permute.xlu1 %924  ;;  %v3094_v59 = vpop.permute.xlu0 %927 }
 0x13f   : > { %4309 = vst [vmem:[#allocation80_spill] sm:$0xff] %v3092_v61  ;;  %4310 = vst [vmem:[#allocation81_spill] sm:$0xff] %v3094_v59 }
 0x140   : > { %1337 = vperm.xlu1 %2442, %v2643_v8   ;;  %1346 = vperm.xlu0 %2443, %v2662_v13  }
 0x142   : > { %v3098_v3 = vpop.permute.xlu1 %930  ;;  %v3100_v62 = vpop.permute.xlu0 %933 }
 0x143   : > { %4311 = vst [vmem:[#allocation82_spill] sm:$0xff] %v3098_v3  ;;  %4312 = vst [vmem:[#allocation83_spill] sm:$0xff] %v3100_v62 }
 0x144   : > { %1343 = vperm.xlu1 %2442, %v2651_v10   ;;  %1352 = vperm.xlu0 %2443, %v2670_v15  }
 0x146   : > { %v3104_v60 = vpop.permute.xlu1 %936  ;;  %v3106_v29 = vpop.permute.xlu0 %939 }
 0x147   : > { %4313 = vst [vmem:[#allocation84_spill] sm:$0xff] %v3104_v60  ;;  %4314 = vst [vmem:[#allocation85_spill] sm:$0xff] %v3106_v29 }
 0x148   : > { %1349 = vperm.xlu1 %2442, %v2659_v12   ;;  %1358 = vperm.xlu0 %2443, %v2678_v17  }
 0x14a   : > { %v3110_v61 = vpop.permute.xlu1 %942  ;;  %v3112_v59 = vpop.permute.xlu0 %945 }
 0x14b   : > { %4315 = vst [vmem:[#allocation86_spill] sm:$0xff] %v3110_v61  ;;  %4316 = vst [vmem:[#allocation87_spill] sm:$0xff] %v3112_v59 }
 0x14c   : > { %1355 = vperm.xlu1 %2442, %v2667_v14   ;;  %1364 = vperm.xlu0 %2443, %v2686_v19  }
 0x14e   : > { %v3116_v3 = vpop.permute.xlu1 %948  ;;  %v3118_v62 = vpop.permute.xlu0 %951 }
 0x14f   : > { %4317 = vst [vmem:[#allocation88_spill] sm:$0xff] %v3116_v3  ;;  %4318 = vst [vmem:[#allocation89_spill] sm:$0xff] %v3118_v62 }
 0x150   : > { %1361 = vperm.xlu1 %2442, %v2675_v16   ;;  %1370 = vperm.xlu0 %2443, %v2694_v21  }
 0x152   : > { %v3122_v60 = vpop.permute.xlu1 %954  ;;  %v3124_v29 = vpop.permute.xlu0 %957 }
 0x153   : > { %4319 = vst [vmem:[#allocation90_spill] sm:$0xff] %v3122_v60  ;;  %4320 = vst [vmem:[#allocation91_spill] sm:$0xff] %v3124_v29 }
 0x154   : > { %1367 = vperm.xlu1 %2442, %v2683_v18   ;;  %1376 = vperm.xlu0 %2443, %v2702_v23  }
 0x156   : > { %v3128_v61 = vpop.permute.xlu1 %960  ;;  %v3130_v59 = vpop.permute.xlu0 %963 }
 0x157   : > { %4321 = vst [vmem:[#allocation92_spill] sm:$0xff] %v3128_v61  ;;  %4322 = vst [vmem:[#allocation93_spill] sm:$0xff] %v3130_v59 }
 0x158   : > { %1373 = vperm.xlu1 %2442, %v2691_v20   ;;  %1382 = vperm.xlu0 %2443, %v2710_v25  }
 0x15a   : > { %v3134_v3 = vpop.permute.xlu1 %966  ;;  %v3136_v62 = vpop.permute.xlu0 %969 }
 0x15b   : > { %4323 = vst [vmem:[#allocation94_spill] sm:$0xff] %v3134_v3  ;;  %4324 = vst [vmem:[#allocation95_spill] sm:$0xff] %v3136_v62  ;;  %v4186_v3 = vmov 3  }
 0x15c   : > { %1379 = vperm.xlu1 %2442, %v2699_v22   ;;  %1476 = vperm.xlu0 %2443, %v2750_v35  }
 0x15e   : > { %v3140_v21 = vpop.permute.xlu1 %972  ;;  %v3142_v29 = vpop.permute.xlu0 %975 }
 0x15f   : > { %4325 = vst [vmem:[#allocation96_spill] sm:$0xff] %v3140_v21  ;;  %4326 = vst [vmem:[#allocation97_spill] sm:$0xff] %v3142_v29 }
 0x160   : > { %1385 = vperm.xlu1 %2442, %v2707_v24   ;;  %1488 = vperm.xlu0 %2443, %v2755_v36  }
 0x162   : > { %v3146_v23 = vpop.permute.xlu1 %978  ;;  %v3148_v20 = vpop.permute.xlu0 %981 }
 0x163   : > { %4327 = vst [vmem:[#allocation98_spill] sm:$0xff] %v3146_v23  ;;  %4328 = vst [vmem:[#allocation99_spill] sm:$0xff] %v3148_v20 }
 0x164   : > { %1480 = vperm.xlu1 %2442, %v2747_v34   ;;  %1496 = vperm.xlu0 %2443, %v2763_v38  }
 0x166   : > { %v3152_v25 = vpop.permute.xlu1 %984  ;;  %v3154_v22 = vpop.permute.xlu0 %987 }
 0x167   : > { %4329 = vst [vmem:[#allocation100_spill] sm:$0xff] %v3152_v25  ;;  %4330 = vst [vmem:[#allocation101_spill] sm:$0xff] %v3154_v22  ;;  %v4333_v22 = vmov 2  }
 0x168   : > { %2444 = vset.pattern.permute.xlu1 %v4186_v3  ;;  %1504 = vperm.xlu0 %2443, %v2771_v40  }
 0x169   : > { %1735 = vperm.xlu1 %2444, %v2630_v5  }
 0x16a   : > { %v3159_v24 = vpop.permute.xlu1 %990  ;;  %v3161_v23 = vpop.permute.xlu0 %993 }
 0x16b   : > { %4331 = vst [vmem:[#allocation102_spill] sm:$0xff] %v3159_v24  ;;  %4332 = vst [vmem:[#allocation103_spill] sm:$0xff] %v3161_v23  ;;  %v4334_v24 = vmov 3  }
 0x16c   : > { %1512 = vperm.xlu0 %2443, %v2779_v42  }
 0x16d   : > { %1892 = vperm.xlu1 %2444, %v2750_v35  }
 0x16e   : > { %v3165_v20 = vpop.permute.xlu1 %1060  ;;  %v3167_v25 = vpop.permute.xlu0 %1064 }
 0x170   : > { %1520 = vperm.xlu0 %2443, %v2787_v44  }
 0x171   : > { %2445 = vset.pattern.permute.xlu1 %v4333_v22 }
 0x172   : > { %v3171_v3 = vpop.permute.xlu1 %1068  ;;  %1484 = vperm.xlu1 %2445, %v2758_v37   ;;  %v3174_v5 = vpop.permute.xlu0 %1072 }
 0x174   : > { %2454 = vset.pattern.permute.xlu0 %v4334_v24 }
 0x175   : > { %1732 = vperm.xlu0 %2454, %v2622_v2  }
 0x176   : > { %v3178_v23 = vpop.permute.xlu1 %1076  ;;  %2446 = vset.pattern.permute.xlu1 %v4334_v24  ;;  %v3181_v35 = vpop.permute.xlu0 %1080 }
 0x177   : > { %1738 = vperm.xlu1 %2446, %v2619_v1  }
 0x179   : > { %1896 = vperm.xlu0 %2454, %v2747_v34  }
 0x17a   : > { %v3185_v29 = vpop.permute.xlu1 %1084  ;;  %v3187_v21 = vpop.permute.xlu0 %1088 }
 0x17b   : > { %1741 = vperm.xlu1 %2446, %v2627_v4  }
 0x17d   : > { %1900 = vperm.xlu0 %2454, %v2758_v37  }
 0x17e   : > { %v3191_v62 = vpop.permute.xlu1 %1092  ;;  %v3193_v2 = vpop.permute.xlu0 %1096 }
 0x17f   : > { %1904 = vperm.xlu1 %2446, %v2755_v36  }
 0x181   : > { %1908 = vperm.xlu0 %2454, %v2766_v39  }
 0x182   : > { %v3197_v61 = vpop.permute.xlu1 %1100  ;;  %v3199_v1 = vpop.permute.xlu0 %1104 }
 0x183   : > { %2447 = vset.pattern.permute.xlu1 %v4333_v22 }
 0x184   : > { %1492 = vperm.xlu1 %2447, %v2766_v39  }
 0x185   : > { %1916 = vperm.xlu0 %2454, %v2774_v41  }
 0x186   : > { %v3204_v4 = vpop.permute.xlu1 %1108  ;;  %v3206_v34 = vpop.permute.xlu0 %1112 }
 0x188   : > { %2448 = vset.pattern.permute.xlu1 %v4334_v24 }
 0x189   : > { %1744 = vperm.xlu1 %2448, %v2638_v7   ;;  %1924 = vperm.xlu0 %2454, %v2782_v43  }
 0x18a   : > { %v3211_v36 = vpop.permute.xlu1 %1116  ;;  %v3213_v37 = vpop.permute.xlu0 %1120 }
 0x18b   : > { %4335 = vst [vmem:[#allocation104_spill] sm:$0xff] %v3211_v36  ;;  %4336 = vst [vmem:[#allocation105_spill] sm:$0xff] %v3213_v37 }
 0x18d   : > { %1747 = vperm.xlu1 %2448, %v2635_v6   ;;  %1932 = vperm.xlu0 %2454, %v2790_v45  }
 0x18e   : > { %v3217_v39 = vpop.permute.xlu1 %1124  ;;  %v3219_v59 = vpop.permute.xlu0 %1128 }
 0x18f   : > { %4337 = vst [vmem:[#allocation106_spill] sm:$0xff] %v3217_v39  ;;  %4338 = vst [vmem:[#allocation107_spill] sm:$0xff] %v3219_v59 }
 0x191   : > { %1912 = vperm.xlu1 %2448, %v2763_v38   ;;  %1940 = vperm.xlu0 %2454, %v2798_v47  }
 0x192   : > { %v3223_v60 = vpop.permute.xlu1 %1132  ;;  %v3225_v7 = vpop.permute.xlu0 %1136 }
 0x193   : > { %4339 = vst [vmem:[#allocation108_spill] sm:$0xff] %v3223_v60  ;;  %4340 = vst [vmem:[#allocation109_spill] sm:$0xff] %v3225_v7 }
 0x195   : > { %2449 = vset.pattern.permute.xlu1 %v4333_v22  ;;  %1948 = vperm.xlu0 %2454, %v2806_v49  }
 0x196   : > { %v3229_v37 = vpop.permute.xlu1 %1140  ;;  %1500 = vperm.xlu1 %2449, %v2774_v41   ;;  %v3232_v6 = vpop.permute.xlu0 %1144 }
 0x197   : > { %4341 = vst [vmem:[#allocation110_spill] sm:$0xff] %v3229_v37  ;;  %4342 = vst [vmem:[#allocation111_spill] sm:$0xff] %v3232_v6  ;;  %v4373_v37 = vld [vmem:[#allocation49_spill] sm:$0xff] }
 0x199   : > { %1956 = vperm.xlu0 %2454, %v2814_v51  }
 0x19a   : > { %v3235_v59 = vpop.permute.xlu1 %1148  ;;  %2450 = vset.pattern.permute.xlu1 %v4334_v24  ;;  %v3238_v38 = vpop.permute.xlu0 %1152 }
 0x19b   : > { %4343 = vst [vmem:[#allocation112_spill] sm:$0xff] %v3235_v59  ;;  %4344 = vst [vmem:[#allocation113_spill] sm:$0xff] %v3238_v38  ;;  %1750 = vperm.xlu1 %2450, %v2646_v9  }
 0x19d   : > { %1964 = vperm.xlu0 %2454, %v2822_v53  }
 0x19e   : > { %v3242_v7 = vpop.permute.xlu1 %1156  ;;  %v3244_v60 = vpop.permute.xlu0 %1160 }
 0x19f   : > { %4345 = vst [vmem:[#allocation114_spill] sm:$0xff] %v3242_v7  ;;  %4346 = vst [vmem:[#allocation115_spill] sm:$0xff] %v3244_v60  ;;  %1753 = vperm.xlu1 %2450, %v2643_v8   ;;  %v4365_v7 = vld [vmem:[#allocation11_spill] sm:$0xff] }
 0x1a1   : > { %1972 = vperm.xlu0 %2454, %v2830_v55  }
 0x1a2   : > { %v3248_v41 = vpop.permute.xlu1 %1164  ;;  %v3250_v6 = vpop.permute.xlu0 %1168 }
 0x1a3   : > { %4347 = vst [vmem:[#allocation116_spill] sm:$0xff] %v3248_v41  ;;  %4348 = vst [vmem:[#allocation117_spill] sm:$0xff] %v3250_v6  ;;  %1920 = vperm.xlu1 %2450, %v2771_v40  }
 0x1a5   : > { %2466 = vset.pattern.permute.xlu0 %v4333_v22 }
 0x1a6   : > { %v3254_v38 = vpop.permute.xlu1 %1172  ;;  %1528 = vperm.xlu0 %2466, %v2795_v46   ;;  %v3257_v9 = vpop.permute.xlu0 %1176 }
 0x1a7   : > { %4349 = vst [vmem:[#allocation118_spill] sm:$0xff] %v3254_v38  ;;  %4350 = vst [vmem:[#allocation119_spill] sm:$0xff] %v3257_v9  ;;  %2451 = vset.pattern.permute.xlu1 %v4333_v22 }
 0x1a8   : > { %1508 = vperm.xlu1 %2451, %v2782_v43  }
 0x1aa   : > { %v3261_v8 = vpop.permute.xlu1 %1180  ;;  %1536 = vperm.xlu0 %2466, %v2803_v48   ;;  %v3264_v55 = vpop.permute.xlu0 %1184 }
 0x1ab   : > { %4351 = vst [vmem:[#allocation120_spill] sm:$0xff] %v3261_v8  ;;  %4352 = vst [vmem:[#allocation121_spill] sm:$0xff] %v3264_v55 }
 0x1ac   : > { %2452 = vset.pattern.permute.xlu1 %v4334_v24 }
 0x1ad   : > { %1756 = vperm.xlu1 %2452, %v2654_v11  }
 0x1ae   : > { %1544 = vperm.xlu0 %2466, %v2811_v50  }
 0x1af   : > { %v3269_v40 = vpop.permute.xlu1 %1316  ;;  %v3271_v38 = vpop.permute.xlu0 %1319 }
 0x1b1   : > { %1759 = vperm.xlu1 %2452, %v2651_v10  }
 0x1b2   : > { %1552 = vperm.xlu0 %2466, %v2819_v52  }
 0x1b3   : > { %v3275_v43 = vpop.permute.xlu1 %1322  ;;  %v3277_v8 = vpop.permute.xlu0 %1328 }
 0x1b5   : > { %1928 = vperm.xlu1 %2452, %v2779_v42  }
 0x1b6   : > { %1560 = vperm.xlu0 %2466, %v2827_v54  }
 0x1b7   : > { %v3281_v55 = vpop.permute.xlu1 %1325  ;;  %v3283_v11 = vpop.permute.xlu0 %1334 }
 0x1b9   : > { %2453 = vset.pattern.permute.xlu1 %v4333_v22 }
 0x1ba   : > { %1516 = vperm.xlu1 %2453, %v2790_v45   ;;  %1568 = vperm.xlu0 %2466, %v2835_v56  }
 0x1bb   : > { %v3288_v10 = vpop.permute.xlu1 %1331  ;;  %v3290_v52 = vpop.permute.xlu0 %1340 }
 0x1be   : > { %2455 = vset.pattern.permute.xlu1 %v4334_v24  ;;  %1391 = vperm.xlu0 %2466, %v2715_v26  }
 0x1bf   : > { %1762 = vperm.xlu1 %2455, %v2662_v13   ;;  %v3294_v42 = vpop.permute.xlu1 %1337  ;;  %v3297_v54 = vpop.permute.xlu0 %1346 }
 0x1c2   : > { %1397 = vperm.xlu0 %2466, %v2723_v28  }
 0x1c3   : > { %1765 = vperm.xlu1 %2455, %v2659_v12   ;;  %v3300_v9 = vpop.permute.xlu1 %1343  ;;  %v3303_v45 = vpop.permute.xlu0 %1352 }
 0x1c6   : > { %1403 = vperm.xlu0 %2466, %v2731_v30  }
 0x1c7   : > { %1936 = vperm.xlu1 %2455, %v2787_v44   ;;  %v3306_v56 = vpop.permute.xlu1 %1349  ;;  %v3309_v13 = vpop.permute.xlu0 %1358 }
 0x1c8   : > { %4353 = vst [vmem:[#allocation122_spill] sm:$0xff] %v3309_v13 }
 0x1ca   : > { %1409 = vperm.xlu0 %2466, %v2739_v32   ;;  %v4359_v32 = vld [vmem:[#allocation6_spill] sm:$0xff] }
 0x1cb   : > { %2456 = vset.pattern.permute.xlu1 %v4333_v22  ;;  %v3312_v26 = vpop.permute.xlu1 %1355  ;;  %v3315_v12 = vpop.permute.xlu0 %1364 }
 0x1cc   : > { %4354 = vst [vmem:[#allocation123_spill] sm:$0xff] %v3315_v12  ;;  %1524 = vperm.xlu1 %2456, %v2798_v47  }
 0x1ce   : > { %2476 = vset.pattern.permute.xlu0 %v4334_v24 }
 0x1cf   : > { %v3318_v28 = vpop.permute.xlu1 %1361  ;;  %v3321_v44 = vpop.permute.xlu0 %1370  ;;  %1980 = vperm.xlu0 %2476, %v2838_v57  }
 0x1d0   : > { %4355 = vst [vmem:[#allocation124_spill] sm:$0xff] %v3318_v28  ;;  %4356 = vst [vmem:[#allocation125_spill] sm:$0xff] %v3321_v44  ;;  %2457 = vset.pattern.permute.xlu1 %v4334_v24  ;;  %v4374_v44 = vld [vmem:[#allocation50_spill] sm:$0xff] }
 0x1d1   : > { %1768 = vperm.xlu1 %2457, %v2670_v15   ;;  %v4363_v15 = vld [vmem:[#allocation7_spill] sm:$0xff] }
 0x1d3   : > { %v3326_v30 = vpop.permute.xlu1 %1367  ;;  %v3328_v6 = vpop.permute.xlu0 %1376  ;;  %1804 = vperm.xlu0 %2476, %v4359_v32  }
 0x1d4   : > { %4357 = vst [vmem:[#allocation126_spill] sm:$0xff] %v3326_v30  ;;  %4358 = vst [vmem:[#allocation127_spill] sm:$0xff] %v3328_v6 }
 0x1d5   : > { %1771 = vperm.xlu1 %2457, %v2667_v14  }
 0x1d7   : > { %v3332_v47 = vpop.permute.xlu1 %1373  ;;  %v3334_v41 = vpop.permute.xlu0 %1382  ;;  %1992 = vperm.xlu0 %2476, %v4292_v58  }
 0x1d8   : > { %4360 = vst [vmem:[#allocation6_spill] sm:$0xff] %v3332_v47  ;;  %4361 = vst [vmem:[#allocation128_spill] sm:$0xff] %v3334_v41  ;;  %v445_v41 = vlaneseq }
 0x1d9   : > { %1944 = vperm.xlu1 %2457, %v2795_v46  }
 0x1da   : > { %v3357_v59 = vand.u32 127, %v445_v41  ;;  %v4368_v41 = vld [vmem:[#allocation19_spill] sm:$0xff] }
 0x1db   : > { %v3338_v60 = vpop.permute.xlu1 %1379  ;;  %v3340_v57 = vpop.permute.xlu0 %1476  ;;  %1810 = vperm.xlu0 %2476, %v4363_v15   ;;  %v4366_v15 = vld [vmem:[#allocation8_spill] sm:$0xff] }
 0x1dc   : > { %4362 = vst [vmem:[#allocation129_spill] sm:$0xff] %v3338_v60  ;;  %vm549_vm2 = vcmp.eq.s32.totalorder %v4368_v41, %v3357_v59  ;;  %vm995_vm4 = vcmp.eq.s32.totalorder %v3068_v31, %v3357_v59  ;;  %v4370_v60 = vld [vmem:[#allocation16_spill] sm:$0xff]  ;;  %vm997_vm10 = vcmp.eq.s32.totalorder %v3066_v33, %v3357_v59  ;;  %vm999_vm12 = vcmp.eq.s32.totalorder %v3074_v27, %v3357_v59 }
 0x1dd   : > { %2458 = vset.pattern.permute.xlu1 %v4333_v22  ;;  %vm551_vm6 = vcmp.eq.s32.totalorder %v4370_v60, %v3357_v59  ;;  %v1189_v39 = vsel %vm997_vm10, %v3167_v25, 0.0 }
 0x1de   : > { %1532 = vperm.xlu1 %2458, %v2806_v49  }
 0x1df   : > { %v3345_v32 = vpop.permute.xlu1 %1385  ;;  %v3347_v14 = vpop.permute.xlu0 %1488  ;;  %2000 = vperm.xlu0 %2476, %v4365_v7   ;;  %v3366_v7 = vadd.s32 128, %v3357_v59 }
 0x1e0   : > { %4364 = vst [vmem:[#allocation7_spill] sm:$0xff] %v3345_v32 }
 0x1e1   : > { %vm550_vm3 = vcmp.eq.s32.totalorder %v4368_v41, %v3366_v7  ;;  %vm996_vm5 = vcmp.eq.s32.totalorder %v3068_v31, %v3366_v7  ;;  %vm552_vm7 = vcmp.eq.s32.totalorder %v4370_v60, %v3366_v7  ;;  %v4371_v41 = vld [vmem:[#allocation18_spill] sm:$0xff]  ;;  %vm998_vm11 = vcmp.eq.s32.totalorder %v3066_v33, %v3366_v7  ;;  %v4375_v33 = vld [vmem:[#allocation51_spill] sm:$0xff] }
 0x1e2   : > { %2459 = vset.pattern.permute.xlu1 %v4334_v24  ;;  %vm553_vm8 = vcmp.eq.s32.totalorder %v4371_v41, %v3357_v59  ;;  %vm554_vm9 = vcmp.eq.s32.totalorder %v4371_v41, %v3366_v7  ;;  %v1187_v41 = vsel %vm995_vm4, %v3165_v20, 0.0  ;;  %vm1000_vm14 = vcmp.eq.s32.totalorder %v3074_v27, %v3366_v7 }
 0x1e3   : > { %1774 = vperm.xlu1 %2459, %v2678_v17   ;;  %v3352_v46 = vpop.permute.xlu1 %1480  ;;  %v3354_v58 = vpop.permute.xlu0 %1496  ;;  %1816 = vperm.xlu0 %2476, %v4366_v15   ;;  %v4367_v17 = vld [vmem:[#allocation17_spill] sm:$0xff]  ;;  %v777_v30 = vsel %vm553_vm8, %v4374_v44, 0.0  ;;  %v778_v12 = vsel %vm554_vm9, %v4374_v44, 0.0  ;;  %v776_v44 = vsel %vm552_vm7, %v4375_v33, 0.0  ;;  %v1191_v60 = vsel %vm999_vm12, %v3171_v3, 0.0 }
 0x1e4   : > { %vm547_vm0 = vcmp.eq.s32.totalorder %v4367_v17, %v3357_v59  ;;  %vm548_vm1 = vcmp.eq.s32.totalorder %v4367_v17, %v3366_v7  ;;  %v4369_v15 = vld [vmem:[#allocation9_spill] sm:$0xff]  ;;  %v1192_v27 = vsel %vm1000_vm14, %v3171_v3, 0.0  ;;  %vm1417_vm7 = vcmp.eq.s32.totalorder %v3281_v55, %v3357_v59 }
 0x1e5   : > { %v772_v47 = vsel %vm548_vm1, %v4373_v37, 0.0  ;;  %vm1414_vm1 = vcmp.eq.s32.totalorder %v3271_v38, %v3366_v7  ;;  %vm1418_vm8 = vcmp.eq.s32.totalorder %v3281_v55, %v3366_v7 }
 0x1e7   : > { %1777 = vperm.xlu1 %2459, %v2675_v16   ;;  %v3360_v49 = vpop.permute.xlu0 %1504  ;;  %2008 = vperm.xlu0 %2476, %v4300_v63  }
 0x1e8   : > { %v3362_v32 = vpop.permute.xlu1 %1735 }
 0x1e9   : > { %vm1829_vm9 = vcmp.eq.s32.totalorder %v3362_v32, %v3357_v59  ;;  %vm1830_vm10 = vcmp.eq.s32.totalorder %v3362_v32, %v3366_v7 }
 0x1eb   : > { %1952 = vperm.xlu1 %2459, %v2803_v48   ;;  %v3381_v16 = vpop.permute.xlu0 %1512  ;;  %1822 = vperm.xlu0 %2476, %v4369_v15   ;;  %v4372_v48 = vld [vmem:[#allocation48_spill] sm:$0xff]  ;;  %v771_v15 = vsel %vm547_vm0, %v4373_v37, 0.0  ;;  %v1190_v37 = vsel %vm998_vm11, %v3167_v25, 0.0  ;;  %v4376_v25 = vld [vmem:[#allocation15_spill] sm:$0xff]  ;;  %vm1413_vm0 = vcmp.eq.s32.totalorder %v3271_v38, %v3357_v59  ;;  %vm1415_vm11 = vcmp.eq.s32.totalorder %v3275_v43, %v3357_v59 }
 0x1ec   : > { %v1893_v63 = vpop.permute.xlu1 %1892  ;;  %v773_v6 = vsel %vm549_vm2, %v4372_v48, 0.0  ;;  %v774_v31 = vsel %vm550_vm3, %v4372_v48, 0.0  ;;  %v1188_v48 = vsel %vm996_vm5, %v3165_v20, 0.0  ;;  %v3421_v20 = vsel %vm551_vm6, %v4375_v33, 0.0 }
 0x1ed   : > { %vm1002_vm13 = vcmp.eq.s32.totalorder %v4376_v25, %v3366_v7  ;;  %vm1001_vm15 = vcmp.eq.s32.totalorder %v4376_v25, %v3357_v59  ;;  %v1252_v28 = vadd.f32 %v1188_v48, %v772_v47  ;;  %v1253_v13 = vadd.f32 %v1189_v39, %v773_v6 }
 0x1ee   : > { %v1254_v36 = vadd.f32 %v1190_v37, %v774_v31  ;;  %v1194_v33 = vsel %vm1002_vm13, %v3174_v5, 0.0  ;;  %vm1411_vm2 = vcmp.eq.s32.totalorder %v3269_v40, %v3357_v59  ;;  %vm1412_vm3 = vcmp.eq.s32.totalorder %v3269_v40, %v3366_v7 }
 0x1ef   : > { %2460 = vset.pattern.permute.xlu1 %v4333_v22  ;;  %v3413_v17 = vpop.permute.xlu0 %1520  ;;  %2016 = vperm.xlu0 %2476, %v4303_v0   ;;  %v1251_v0 = vadd.f32 %v1187_v41, %v771_v15  ;;  %v1193_v39 = vsel %vm1001_vm15, %v3174_v5, 0.0  ;;  %v1603_v6 = vsel %vm1411_vm2, %v3340_v57, 0.0  ;;  %v1604_v38 = vsel %vm1412_vm3, %v3340_v57, 0.0 }
 0x1f0   : > { %1540 = vperm.xlu1 %2460, %v2814_v51   ;;  %v1605_v31 = vsel %vm1413_vm0, %v3352_v46, 0.0  ;;  %v1606_v15 = vsel %vm1414_vm1, %v3352_v46, 0.0  ;;  %v1258_v41 = vadd.f32 %v1194_v33, %v778_v12  ;;  %vm1416_vm6 = vcmp.eq.s32.totalorder %v3275_v43, %v3366_v7 }
 0x1f1   : > { %v3431_v51 = vpop.permute.xlu1 %1484  ;;  %v1668_v3 = vadd.f32 %v1604_v38, %v1252_v28  ;;  %v1669_v46 = vadd.f32 %v1605_v31, %v1253_v13  ;;  %v1670_v48 = vadd.f32 %v1606_v15, %v1254_v36  ;;  %v1610_v37 = vsel %vm1418_vm8, %v3347_v14, 0.0 }
 0x1f2   : > { %v1608_v25 = vsel %vm1416_vm6, %v3431_v51, 0.0  ;;  %v1257_v31 = vadd.f32 %v1193_v39, %v777_v30  ;;  %v1674_v36 = vadd.f32 %v1610_v37, %v1258_v41  ;;  %v1607_v55 = vsel %vm1415_vm11, %v3431_v51, 0.0  ;;  %v2481_v37 = vld [vmem:[%s2601_s6 + $0x90] sm:$0xff] }
 0x1f3   : > { %vm1419_vm8 = vcmp.eq.s32.totalorder %v3277_v8, %v3357_v59  ;;  %vm1422_vm11 = vcmp.eq.s32.totalorder %v3288_v10, %v3366_v7 }
 0x1f4   : > { %2461 = vset.pattern.permute.xlu1 %v4334_v24  ;;  %v1733_v47 = vpop.permute.xlu0 %1732 }
 0x1f5   : > { %1780 = vperm.xlu1 %2461, %v2686_v19   ;;  %vm1827_vm4 = vcmp.eq.s32.totalorder %v1733_v47, %v3357_v59  ;;  %vm1828_vm5 = vcmp.eq.s32.totalorder %v1733_v47, %v3366_v7  ;;  %v1667_v19 = vadd.f32 %v1603_v6, %v1251_v0  ;;  %v1256_v47 = vadd.f32 %v1192_v27, %v776_v44 }
 0x1f6   : > { %v1739_v40 = vpop.permute.xlu1 %1738  ;;  %v2019_v5 = vsel %vm1827_vm4, %v1893_v63, 0.0  ;;  %v2020_v57 = vsel %vm1828_vm5, %v1893_v63, 0.0  ;;  %v1255_v44 = vadd.f32 %v1191_v60, %v3421_v20 }
 0x1f7   : > { %v2084_v63 = vadd.f32 %v2020_v57, %v1668_v3  ;;  %v2083_v38 = vadd.f32 %v2019_v5, %v1667_v19  ;;  %vm1832_vm12 = vcmp.eq.s32.totalorder %v1739_v40, %v3366_v7  ;;  %v1672_v57 = vadd.f32 %v1608_v25, %v1256_v47  ;;  %v4380_v25 = vld [vmem:[#allocation52_spill] sm:$0xff] }
 0x1f8   : > { %v1897_v12 = vpop.permute.xlu0 %1896  ;;  %vm1831_vm15 = vcmp.eq.s32.totalorder %v1739_v40, %v3357_v59  ;;  %v1671_v5 = vadd.f32 %v1607_v55, %v1255_v44 }
 0x1f9   : > { %1783 = vperm.xlu1 %2461, %v2683_v18   ;;  %v2021_v33 = vsel %vm1829_vm9, %v1897_v12, 0.0  ;;  %v2022_v0 = vsel %vm1830_vm10, %v1897_v12, 0.0  ;;  %v1609_v18 = vsel %vm1417_vm7, %v3347_v14, 0.0  ;;  %v4377_v12 = vld [vmem:[#allocation21_spill] sm:$0xff]  ;;  %vm1420_vm9 = vcmp.eq.s32.totalorder %v3277_v8, %v3366_v7 }
 0x1fa   : > { %v1742_v28 = vpop.permute.xlu1 %1741  ;;  %v2085_v6 = vadd.f32 %v2021_v33, %v1669_v46  ;;  %v2086_v13 = vadd.f32 %v2022_v0, %v1670_v48  ;;  %v1673_v39 = vadd.f32 %v1609_v18, %v1257_v31  ;;  %vm555_vm0 = vcmp.eq.s32.totalorder %v4377_v12, %v3357_v59  ;;  %v4378_v48 = vld [vmem:[#allocation20_spill] sm:$0xff] }
 0x1fb   : > { %vm1833_vm13 = vcmp.eq.s32.totalorder %v1742_v28, %v3357_v59  ;;  %vm1834_vm14 = vcmp.eq.s32.totalorder %v1742_v28, %v3366_v7  ;;  %vm556_vm1 = vcmp.eq.s32.totalorder %v4377_v12, %v3366_v7  ;;  %vm557_vm2 = vcmp.eq.s32.totalorder %v4378_v48, %v3357_v59 }
 0x1fc   : > { %v1901_v32 = vpop.permute.xlu0 %1900  ;;  %v2152_v15 = vpack.c.bf16 %v2086_v13, %v2084_v63  ;;  %v2151_v3 = vpack.c.bf16 %v2085_v6, %v2083_v38  ;;  %vm558_vm3 = vcmp.eq.s32.totalorder %v4378_v48, %v3366_v7  ;;  %v781_v33 = vsel %vm557_vm2, %v4380_v25, 0.0  ;;  %v4381_v6 = vld [vmem:[#allocation53_spill] sm:$0xff]  ;;  %v4382_v38 = vld [vmem:[#allocation76_spill] sm:$0xff] }
 0x1fd   : > { %1960 = vperm.xlu1 %2461, %v2811_v50   ;;  %v2024_v30 = vsel %vm1832_vm12, %v1901_v32, 0.0  ;;  %v2023_v19 = vsel %vm1831_vm15, %v1901_v32, 0.0  ;;  %v782_v0 = vsel %vm558_vm3, %v4380_v25, 0.0  ;;  %v779_v63 = vsel %vm555_vm0, %v4381_v6, 0.0  ;;  %v2482_v32 = vld [vmem:[%s2601_s6 + $0x98] sm:$0xff]  ;;  %v4383_v25 = vld [vmem:[#allocation23_spill] sm:$0xff] }
 0x1fe   : > { %v1905_v43 = vpop.permute.xlu1 %1904  ;;  %2193 = vmatprep.subr.bf16.mxu0 %v2152_v15  ;;  %v2088_v50 = vadd.f32 %v2024_v30, %v1672_v57  ;;  %v2087_v51 = vadd.f32 %v2023_v19, %v1671_v5  ;;  %v780_v13 = vsel %vm556_vm1, %v4381_v6, 0.0  ;;  %vm1003_vm6 = vcmp.eq.s32.totalorder %v4382_v38, %v3357_v59  ;;  %v4386_v6 = vld [vmem:[#allocation54_spill] sm:$0xff] }
 0x1ff   : > { %v2025_v14 = vsel %vm1833_vm13, %v1905_v43, 0.0  ;;  %v2026_v27 = vsel %vm1834_vm14, %v1905_v43, 0.0  ;;  %2194 = vmatpush1.bf16.xpose.msra.mxu0 %v2151_v3  ;;  %vm1004_vm7 = vcmp.eq.s32.totalorder %v4382_v38, %v3366_v7  ;;  %v1195_v18 = vsel %vm1003_vm6, %v3178_v23, 0.0 }
 0x200   : > { %v2090_v41 = vadd.f32 %v2026_v27, %v1674_v36  ;;  %v2089_v46 = vadd.f32 %v2025_v14, %v1673_v39  ;;  %v1196_v36 = vsel %vm1004_vm7, %v3178_v23, 0.0  ;;  %vm1421_vm10 = vcmp.eq.s32.totalorder %v3288_v10, %v3357_v59  ;;  %v1909_v55 = vpop.permute.xlu0 %1908 }
 0x201   : > { %2462 = vset.pattern.permute.xlu1 %v4333_v22  ;;  %v1614_v15 = vsel %vm1422_vm11, %v3354_v58, 0.0  ;;  %v1259_v43 = vadd.f32 %v1195_v18, %v779_v63  ;;  %v1260_v44 = vadd.f32 %v1196_v36, %v780_v13  ;;  %vm559_vm0 = vcmp.eq.s32.totalorder %v4383_v25, %v3357_v59  ;;  %v4388_v36 = vld [vmem:[#allocation78_spill] sm:$0xff] }
 0x202   : > { %1548 = vperm.xlu1 %2462, %v2822_v53   ;;  %v2154_v20 = vpack.c.bf16 %v2090_v41, %v2088_v50  ;;  %v2153_v40 = vpack.c.bf16 %v2089_v46, %v2087_v51  ;;  %v4379_v53 = vld [vmem:[#allocation77_spill] sm:$0xff]  ;;  %vm560_vm1 = vcmp.eq.s32.totalorder %v4383_v25, %v3366_v7  ;;  %vm1007_vm6 = vcmp.eq.s32.totalorder %v4388_v36, %v3357_v59 }
 0x203   : > { %v1493_v60 = vpop.permute.xlu1 %1492  ;;  %vm1005_vm4 = vcmp.eq.s32.totalorder %v4379_v53, %v3357_v59  ;;  %vm1006_vm5 = vcmp.eq.s32.totalorder %v4379_v53, %v3366_v7  ;;  %v2483_v50 = vld [vmem:[%s2606_s9 + $0x98] sm:$0xff]  ;;  %vm1008_vm7 = vcmp.eq.s32.totalorder %v4388_v36, %v3366_v7  ;;  %vm1426_vm11 = vcmp.eq.s32.totalorder %v3294_v42, %v3366_v7  ;;  %v4394_v36 = vld [vmem:[#allocation80_spill] sm:$0xff] }
 0x204   : > { %2195 = vmatprep.subr.bf16.mxu0 %v2154_v20  ;;  %v1197_v47 = vsel %vm1005_vm4, %v3181_v35, 0.0  ;;  %v1198_v31 = vsel %vm1006_vm5, %v3181_v35, 0.0  ;;  %v1613_v35 = vsel %vm1421_vm10, %v3354_v58, 0.0  ;;  %v1611_v57 = vsel %vm1419_vm8, %v1493_v60, 0.0  ;;  %v4389_v25 = vld [vmem:[#allocation25_spill] sm:$0xff] }
 0x205   : > { %v1261_v3 = vadd.f32 %v1197_v47, %v781_v33  ;;  %v1262_v23 = vadd.f32 %v1198_v31, %v782_v0  ;;  %v1612_v30 = vsel %vm1420_vm9, %v1493_v60, 0.0  ;;  %v1675_v58 = vadd.f32 %v1611_v57, %v1259_v43  ;;  %v4384_v33 = vld [vmem:[#allocation22_spill] sm:$0xff]  ;;  %v4385_v0 = vld [vmem:[#allocation79_spill] sm:$0xff] }
 0x206   : > { %2463 = vset.pattern.permute.xlu1 %v4334_v24  ;;  %v1676_v41 = vadd.f32 %v1612_v30, %v1260_v44  ;;  %vm561_vm2 = vcmp.eq.s32.totalorder %v4384_v33, %v3357_v59  ;;  %vm562_vm3 = vcmp.eq.s32.totalorder %v4384_v33, %v3366_v7  ;;  %vm1009_vm4 = vcmp.eq.s32.totalorder %v4385_v0, %v3357_v59  ;;  %v4387_v47 = vld [vmem:[#allocation55_spill] sm:$0xff]  ;;  %v4390_v33 = vld [vmem:[#allocation24_spill] sm:$0xff] }
 0x207   : > { %1786 = vperm.xlu1 %2463, %v2481_v37   ;;  %2196 = vmatpush1.bf16.xpose.msra.mxu0 %v2153_v40  ;;  %v1677_v10 = vadd.f32 %v1613_v35, %v1261_v3  ;;  %v1678_v14 = vadd.f32 %v1614_v15, %v1262_v23  ;;  %v2484_v40 = vld [vmem:[%s2606_s9 + $0xa0] sm:$0xff]  ;;  %vm1010_vm5 = vcmp.eq.s32.totalorder %v4385_v0, %v3366_v7  ;;  %v785_v63 = vsel %vm561_vm2, %v4386_v6, 0.0  ;;  %v2486_v3 = vld [vmem:[%s2601_s6 + $0xa8] sm:$0xff]  ;;  %v4391_v0 = vld [vmem:[#allocation81_spill] sm:$0xff] }
 0x208   : > { %v1745_v28 = vpop.permute.xlu1 %1744  ;;  %v786_v13 = vsel %vm562_vm3, %v4386_v6, 0.0  ;;  %v783_v31 = vsel %vm559_vm0, %v4387_v47, 0.0  ;;  %v784_v18 = vsel %vm560_vm1, %v4387_v47, 0.0  ;;  %v1202_v35 = vsel %vm1010_vm5, %v3187_v21, 0.0  ;;  %v4392_v6 = vld [vmem:[#allocation56_spill] sm:$0xff]  ;;  %v4393_v47 = vld [vmem:[#allocation57_spill] sm:$0xff] }
 0x209   : > { %vm1835_vm12 = vcmp.eq.s32.totalorder %v1745_v28, %v3357_v59  ;;  %vm1836_vm13 = vcmp.eq.s32.totalorder %v1745_v28, %v3366_v7  ;;  %v2485_v28 = vld [vmem:[%s2601_s6 + $0xa0] sm:$0xff]  ;;  %vm1423_vm8 = vcmp.eq.s32.totalorder %v3283_v11, %v3357_v59  ;;  %vm1424_vm9 = vcmp.eq.s32.totalorder %v3283_v11, %v3366_v7 }
 0x20a   : > { %v2027_v27 = vsel %vm1835_vm12, %v1909_v55, 0.0  ;;  %v2028_v39 = vsel %vm1836_vm13, %v1909_v55, 0.0  ;;  %v1199_v15 = vsel %vm1007_vm6, %v3185_v29, 0.0  ;;  %vm1425_vm10 = vcmp.eq.s32.totalorder %v3294_v42, %v3357_v59 }
 0x20b   : > { %1789 = vperm.xlu1 %2463, %v2482_v32   ;;  %v2091_v20 = vadd.f32 %v2027_v27, %v1675_v58  ;;  %v2092_v60 = vadd.f32 %v2028_v39, %v1676_v41  ;;  %v1201_v32 = vsel %vm1009_vm4, %v3187_v21, 0.0  ;;  %v1617_v21 = vsel %vm1425_vm10, %v3360_v49, 0.0 }
 0x20c   : > { %v1748_v8 = vpop.permute.xlu1 %1747  ;;  %v1618_v23 = vsel %vm1426_vm11, %v3360_v49, 0.0  ;;  %v1265_v57 = vadd.f32 %v1201_v32, %v785_v63  ;;  %v1263_v44 = vadd.f32 %v1199_v15, %v783_v31  ;;  %vm563_vm0 = vcmp.eq.s32.totalorder %v4389_v25, %v3357_v59 }
 0x20d   : > { %vm1837_vm14 = vcmp.eq.s32.totalorder %v1748_v8, %v3357_v59  ;;  %vm1838_vm15 = vcmp.eq.s32.totalorder %v1748_v8, %v3366_v7  ;;  %v1200_v8 = vsel %vm1008_vm7, %v3185_v29, 0.0  ;;  %v1266_v29 = vadd.f32 %v1202_v35, %v786_v13 }
 0x20e   : > { %v1264_v55 = vadd.f32 %v1200_v8, %v784_v18  ;;  %v1681_v42 = vadd.f32 %v1617_v21, %v1265_v57  ;;  %vm564_vm1 = vcmp.eq.s32.totalorder %v4389_v25, %v3366_v7  ;;  %vm565_vm2 = vcmp.eq.s32.totalorder %v4390_v33, %v3357_v59  ;;  %v2490_v21 = vld [vmem:[%s2601_s6 + $0xb8] sm:$0xff]  ;;  %v4398_v25 = vld [vmem:[#allocation58_spill] sm:$0xff] }
 0x20f   : > { %1968 = vperm.xlu1 %2463, %v2483_v50   ;;  %v2487_v50 = vld [vmem:[%s2606_s9 + $0xa8] sm:$0xff]  ;;  %vm566_vm3 = vcmp.eq.s32.totalorder %v4390_v33, %v3366_v7  ;;  %vm1013_vm4 = vcmp.eq.s32.totalorder %v4391_v0, %v3357_v59  ;;  %vm1014_vm5 = vcmp.eq.s32.totalorder %v4391_v0, %v3366_v7  ;;  %v789_v63 = vsel %vm565_vm2, %v4392_v6, 0.0 }
 0x210   : > { %v1913_v19 = vpop.permute.xlu1 %1912  ;;  %v790_v13 = vsel %vm566_vm3, %v4392_v6, 0.0  ;;  %v787_v31 = vsel %vm563_vm0, %v4393_v47, 0.0  ;;  %v788_v18 = vsel %vm564_vm1, %v4393_v47, 0.0  ;;  %vm1011_vm6 = vcmp.eq.s32.totalorder %v4394_v36, %v3357_v59  ;;  %v4399_v6 = vld [vmem:[#allocation59_spill] sm:$0xff] }
 0x211   : > { %v2029_v5 = vsel %vm1837_vm14, %v1913_v19, 0.0  ;;  %v2030_v46 = vsel %vm1838_vm15, %v1913_v19, 0.0  ;;  %vm1012_vm7 = vcmp.eq.s32.totalorder %v4394_v36, %v3366_v7  ;;  %v1205_v35 = vsel %vm1013_vm4, %v3193_v2, 0.0  ;;  %v2494_v36 = vld [vmem:[%s2606_s9 + $0xc8] sm:$0xff] }
 0x212   : > { %v2093_v51 = vadd.f32 %v2029_v5, %v1677_v10  ;;  %v2094_v12 = vadd.f32 %v2030_v46, %v1678_v14  ;;  %v1917_v10 = vpop.permute.xlu0 %1916  ;;  %v1682_v14 = vadd.f32 %v1618_v23, %v1266_v29  ;;  %v1206_v15 = vsel %vm1014_vm5, %v3193_v2, 0.0 }
 0x213   : > { %2464 = vset.pattern.permute.xlu1 %v4333_v22  ;;  %v1203_v8 = vsel %vm1011_vm6, %v3191_v62, 0.0  ;;  %vm1429_vm10 = vcmp.eq.s32.totalorder %v3300_v9, %v3357_v59  ;;  %vm1430_vm11 = vcmp.eq.s32.totalorder %v3300_v9, %v3366_v7 }
 0x214   : > { %1556 = vperm.xlu1 %2464, %v2484_v40   ;;  %v2156_v48 = vpack.c.bf16 %v2094_v12, %v2092_v60  ;;  %v2155_v53 = vpack.c.bf16 %v2093_v51, %v2091_v20  ;;  %v2488_v12 = vld [vmem:[%s2606_s9 + $0xb0] sm:$0xff]  ;;  %v1621_v2 = vsel %vm1429_vm10, %v3381_v16, 0.0  ;;  %v1622_v23 = vsel %vm1430_vm11, %v3381_v16, 0.0 }
 0x215   : > { %v1501_v37 = vpop.permute.xlu1 %1500  ;;  %vm1433_vm10 = vcmp.eq.s32.totalorder %v3306_v56, %v3357_v59  ;;  %vm1434_vm11 = vcmp.eq.s32.totalorder %v3306_v56, %v3366_v7 }
 0x216   : > { %2197 = vmatprep.subr.bf16.mxu0 %v2156_v48  ;;  %v1615_v30 = vsel %vm1423_vm8, %v1501_v37, 0.0  ;;  %v1616_v43 = vsel %vm1424_vm9, %v1501_v37, 0.0  ;;  %vm1427_vm8 = vcmp.eq.s32.totalorder %v3290_v52, %v3357_v59  ;;  %vm1428_vm9 = vcmp.eq.s32.totalorder %v3290_v52, %v3366_v7 }
 0x217   : > { %2198 = vmatpush1.bf16.xpose.msra.mxu0 %v2155_v53  ;;  %v1679_v49 = vadd.f32 %v1615_v30, %v1263_v44  ;;  %v1680_v58 = vadd.f32 %v1616_v43, %v1264_v55  ;;  %v1925_v53 = vpop.permute.xlu0 %1924  ;;  %v1267_v30 = vadd.f32 %v1203_v8, %v787_v31  ;;  %v1626_v8 = vsel %vm1434_vm11, %v3413_v17, 0.0 }
 0x218   : > { %2465 = vset.pattern.permute.xlu1 %v4334_v24  ;;  %vm1438_vm11 = vcmp.eq.s32.totalorder %v3312_v26, %v3366_v7 }
 0x219   : > { %1792 = vperm.xlu1 %2465, %v2485_v28   ;;  %v2489_v28 = vld [vmem:[%s2601_s6 + $0xb0] sm:$0xff] }
 0x21a   : > { %v1751_v38 = vpop.permute.xlu1 %1750 }
 0x21b   : > { %vm1839_vm12 = vcmp.eq.s32.totalorder %v1751_v38, %v3357_v59  ;;  %vm1840_vm13 = vcmp.eq.s32.totalorder %v1751_v38, %v3366_v7  ;;  %v3595_v32 = vpop.permute.xlu0 %1932 }
 0x21c   : > { %v2031_v27 = vsel %vm1839_vm12, %v1917_v10, 0.0  ;;  %v2032_v39 = vsel %vm1840_vm13, %v1917_v10, 0.0 }
 0x21d   : > { %1795 = vperm.xlu1 %2465, %v2486_v3   ;;  %v2095_v46 = vadd.f32 %v2031_v27, %v1679_v49  ;;  %v2096_v20 = vadd.f32 %v2032_v39, %v1680_v58  ;;  %v1204_v3 = vsel %vm1012_vm7, %v3191_v62, 0.0  ;;  %v1270_v62 = vadd.f32 %v1206_v15, %v790_v13 }
 0x21e   : > { %v1754_v11 = vpop.permute.xlu1 %1753  ;;  %v1268_v43 = vadd.f32 %v1204_v3, %v788_v18 }
 0x21f   : > { %vm1841_vm14 = vcmp.eq.s32.totalorder %v1754_v11, %v3357_v59  ;;  %vm1842_vm15 = vcmp.eq.s32.totalorder %v1754_v11, %v3366_v7  ;;  %v1269_v11 = vadd.f32 %v1205_v35, %v789_v63  ;;  %v1686_v9 = vadd.f32 %v1622_v23, %v1270_v62  ;;  %v3614_v55 = vpop.permute.xlu0 %1940 }
 0x221   : > { %1976 = vperm.xlu1 %2465, %v2487_v50   ;;  %v1685_v44 = vadd.f32 %v1621_v2, %v1269_v11 }
 0x222   : > { %v1921_v41 = vpop.permute.xlu1 %1920 }
 0x223   : > { %v2033_v19 = vsel %vm1841_vm14, %v1921_v41, 0.0  ;;  %v2034_v5 = vsel %vm1842_vm15, %v1921_v41, 0.0 }
 0x224   : > { %v2097_v60 = vadd.f32 %v2033_v19, %v1681_v42  ;;  %v2098_v51 = vadd.f32 %v2034_v5, %v1682_v14  ;;  %v2491_v14 = vld [vmem:[%s2606_s9 + $0xb8] sm:$0xff] }
 0x225   : > { %2467 = vset.pattern.permute.xlu1 %v4333_v22 }
 0x226   : > { %1564 = vperm.xlu1 %2467, %v2488_v12   ;;  %v2158_v40 = vpack.c.bf16 %v2098_v51, %v2096_v20  ;;  %v2157_v48 = vpack.c.bf16 %v2097_v60, %v2095_v46  ;;  %v2492_v46 = vld [vmem:[%s2601_s6 + $0xc0] sm:$0xff]  ;;  %v3621_v51 = vpop.permute.xlu0 %1948 }
 0x227   : > { %v1509_v37 = vpop.permute.xlu1 %1508 }
 0x228   : > { %2199 = vmatprep.subr.bf16.mxu0 %v2158_v40  ;;  %v1619_v57 = vsel %vm1427_vm8, %v1509_v37, 0.0  ;;  %v1620_v29 = vsel %vm1428_vm9, %v1509_v37, 0.0  ;;  %v4395_v40 = vld [vmem:[#allocation27_spill] sm:$0xff]  ;;  %vm1431_vm8 = vcmp.eq.s32.totalorder %v3297_v54, %v3357_v59  ;;  %vm1432_vm9 = vcmp.eq.s32.totalorder %v3297_v54, %v3366_v7 }
 0x229   : > { %2200 = vmatpush1.bf16.xpose.msra.mxu0 %v2157_v48  ;;  %v1683_v16 = vadd.f32 %v1619_v57, %v1267_v30  ;;  %v1684_v27 = vadd.f32 %v1620_v29, %v1268_v43  ;;  %vm567_vm0 = vcmp.eq.s32.totalorder %v4395_v40, %v3357_v59  ;;  %vm568_vm1 = vcmp.eq.s32.totalorder %v4395_v40, %v3366_v7  ;;  %v2493_v48 = vld [vmem:[%s2606_s9 + $0xc0] sm:$0xff]  ;;  %v4397_v37 = vld [vmem:[#allocation83_spill] sm:$0xff]  ;;  %v4405_v40 = vld [vmem:[#allocation61_spill] sm:$0xff] }
 0x22a   : > { %2468 = vset.pattern.permute.xlu1 %v4334_v24  ;;  %vm1017_vm4 = vcmp.eq.s32.totalorder %v4397_v37, %v3357_v59  ;;  %vm1018_vm5 = vcmp.eq.s32.totalorder %v4397_v37, %v3366_v7  ;;  %v791_v63 = vsel %vm567_vm0, %v4399_v6, 0.0  ;;  %v792_v13 = vsel %vm568_vm1, %v4399_v6, 0.0  ;;  %v3644_v47 = vpop.permute.xlu0 %1956  ;;  %v2495_v29 = vld [vmem:[%s2601_s6 + $0xc8] sm:$0xff]  ;;  %v4406_v37 = vld [vmem:[#allocation84_spill] sm:$0xff] }
 0x22b   : > { %1798 = vperm.xlu1 %2468, %v2489_v28   ;;  %v1209_v31 = vsel %vm1017_vm4, %v3199_v1, 0.0  ;;  %v1210_v18 = vsel %vm1018_vm5, %v3199_v1, 0.0  ;;  %v1625_v1 = vsel %vm1433_vm10, %v3413_v17, 0.0  ;;  %vm1437_vm10 = vcmp.eq.s32.totalorder %v3312_v26, %v3357_v59 }
 0x22c   : > { %v1757_v38 = vpop.permute.xlu1 %1756 }
 0x22d   : > { %vm1843_vm12 = vcmp.eq.s32.totalorder %v1757_v38, %v3357_v59  ;;  %vm1844_vm13 = vcmp.eq.s32.totalorder %v1757_v38, %v3366_v7  ;;  %v4400_v38 = vld [vmem:[#allocation82_spill] sm:$0xff] }
 0x22e   : > { %v2035_v10 = vsel %vm1843_vm12, %v1925_v53, 0.0  ;;  %v2036_v42 = vsel %vm1844_vm13, %v1925_v53, 0.0  ;;  %v4396_v53 = vld [vmem:[#allocation26_spill] sm:$0xff]  ;;  %vm1015_vm6 = vcmp.eq.s32.totalorder %v4400_v38, %v3357_v59  ;;  %vm1016_vm7 = vcmp.eq.s32.totalorder %v4400_v38, %v3366_v7  ;;  %v3664_v62 = vpop.permute.xlu0 %1964 }
 0x22f   : > { %1801 = vperm.xlu1 %2468, %v2490_v21   ;;  %v2099_v58 = vadd.f32 %v2035_v10, %v1683_v16  ;;  %v2100_v41 = vadd.f32 %v2036_v42, %v1684_v27  ;;  %vm569_vm2 = vcmp.eq.s32.totalorder %v4396_v53, %v3357_v59  ;;  %vm570_vm3 = vcmp.eq.s32.totalorder %v4396_v53, %v3366_v7 }
 0x230   : > { %v1760_v52 = vpop.permute.xlu1 %1759  ;;  %v793_v33 = vsel %vm569_vm2, %v4398_v25, 0.0  ;;  %v794_v0 = vsel %vm570_vm3, %v4398_v25, 0.0  ;;  %v1207_v35 = vsel %vm1015_vm6, %v3197_v61, 0.0  ;;  %v1208_v15 = vsel %vm1016_vm7, %v3197_v61, 0.0 }
 0x231   : > { %vm1845_vm14 = vcmp.eq.s32.totalorder %v1760_v52, %v3357_v59  ;;  %vm1846_vm15 = vcmp.eq.s32.totalorder %v1760_v52, %v3366_v7  ;;  %v1273_v3 = vadd.f32 %v1209_v31, %v793_v33  ;;  %v1274_v21 = vadd.f32 %v1210_v18, %v794_v0 }
 0x232   : > { %v1271_v23 = vadd.f32 %v1207_v35, %v791_v63  ;;  %v1272_v52 = vadd.f32 %v1208_v15, %v792_v13  ;;  %vm1019_vm6 = vcmp.eq.s32.totalorder %v4406_v37, %v3357_v59  ;;  %vm1020_vm7 = vcmp.eq.s32.totalorder %v4406_v37, %v3366_v7 }
 0x233   : > { %1984 = vperm.xlu1 %2468, %v2491_v14   ;;  %v1689_v11 = vadd.f32 %v1625_v1, %v1273_v3  ;;  %v1690_v56 = vadd.f32 %v1626_v8, %v1274_v21  ;;  %v1211_v6 = vsel %vm1019_vm6, %v3204_v4, 0.0  ;;  %v1212_v63 = vsel %vm1020_vm7, %v3204_v4, 0.0  ;;  %v2498_v4 = vld [vmem:[%s2606_s9 + $0xd8] sm:$0xff] }
 0x234   : > { %v1929_v39 = vpop.permute.xlu1 %1928 }
 0x235   : > { %v2037_v50 = vsel %vm1845_vm14, %v1929_v39, 0.0  ;;  %v2038_v49 = vsel %vm1846_vm15, %v1929_v39, 0.0 }
 0x236   : > { %v2101_v19 = vadd.f32 %v2037_v50, %v1685_v44  ;;  %v2102_v5 = vadd.f32 %v2038_v49, %v1686_v9 }
 0x237   : > { %2469 = vset.pattern.permute.xlu1 %v4333_v22 }
 0x238   : > { %1388 = vperm.xlu1 %2469, %v2492_v46   ;;  %v2160_v20 = vpack.c.bf16 %v2102_v5, %v2100_v41  ;;  %v2159_v60 = vpack.c.bf16 %v2101_v19, %v2099_v58  ;;  %v4401_v58 = vld [vmem:[#allocation29_spill] sm:$0xff]  ;;  %v2496_v41 = vld [vmem:[%s2601_s6 + $0xd0] sm:$0xff] }
 0x239   : > { %v1517_v12 = vpop.permute.xlu1 %1516  ;;  %vm571_vm0 = vcmp.eq.s32.totalorder %v4401_v58, %v3357_v59  ;;  %vm572_vm1 = vcmp.eq.s32.totalorder %v4401_v58, %v3366_v7  ;;  %v4402_v19 = vld [vmem:[#allocation28_spill] sm:$0xff]  ;;  %v4403_v5 = vld [vmem:[#allocation85_spill] sm:$0xff] }
 0x23a   : > { %2201 = vmatprep.subr.bf16.mxu0 %v2160_v20  ;;  %v1623_v2 = vsel %vm1431_vm8, %v1517_v12, 0.0  ;;  %v1624_v61 = vsel %vm1432_vm9, %v1517_v12, 0.0  ;;  %vm573_vm2 = vcmp.eq.s32.totalorder %v4402_v19, %v3357_v59  ;;  %vm574_vm3 = vcmp.eq.s32.totalorder %v4402_v19, %v3366_v7  ;;  %v4404_v46 = vld [vmem:[#allocation60_spill] sm:$0xff] }
 0x23b   : > { %2202 = vmatpush1.bf16.xpose.msra.mxu0 %v2159_v60  ;;  %v1687_v30 = vadd.f32 %v1623_v2, %v1271_v23  ;;  %v1688_v43 = vadd.f32 %v1624_v61, %v1272_v52  ;;  %vm1021_vm4 = vcmp.eq.s32.totalorder %v4403_v5, %v3357_v59  ;;  %vm1022_vm5 = vcmp.eq.s32.totalorder %v4403_v5, %v3366_v7 }
 0x23c   : > { %1572 = vperm.xlu1 %2469, %v2493_v48   ;;  %v797_v20 = vsel %vm573_vm2, %v4404_v46, 0.0  ;;  %v798_v60 = vsel %vm574_vm3, %v4404_v46, 0.0  ;;  %v796_v53 = vsel %vm572_vm1, %v4405_v40, 0.0  ;;  %v1213_v33 = vsel %vm1021_vm4, %v3206_v34, 0.0  ;;  %v4414_v46 = vld [vmem:[#allocation105_spill] sm:$0xff] }
 0x23d   : > { %v1214_v0 = vsel %vm1022_vm5, %v3206_v34, 0.0  ;;  %vm1435_vm8 = vcmp.eq.s32.totalorder %v3303_v45, %v3357_v59  ;;  %vm1436_vm9 = vcmp.eq.s32.totalorder %v3303_v45, %v3366_v7  ;;  %v1277_v38 = vadd.f32 %v1213_v33, %v797_v20 }
 0x23e   : > { %v1763_v28 = vpop.permute.xlu1 %1762  ;;  %v1278_v31 = vadd.f32 %v1214_v0, %v798_v60  ;;  %v1276_v15 = vadd.f32 %v1212_v63, %v796_v53 }
 0x23f   : > { %vm1847_vm12 = vcmp.eq.s32.totalorder %v1763_v28, %v3357_v59  ;;  %vm1848_vm13 = vcmp.eq.s32.totalorder %v1763_v28, %v3366_v7  ;;  %v2497_v28 = vld [vmem:[%s2606_s9 + $0xd0] sm:$0xff] }
 0x240   : > { %1576 = vperm.xlu1 %2469, %v2494_v36   ;;  %v2039_v17 = vsel %vm1847_vm12, %v3595_v32, 0.0  ;;  %v2040_v57 = vsel %vm1848_vm13, %v3595_v32, 0.0  ;;  %v3671_v32 = vpop.permute.xlu0 %1972 }
 0x241   : > { %v2103_v42 = vadd.f32 %v2039_v17, %v1687_v30  ;;  %v2104_v14 = vadd.f32 %v2040_v57, %v1688_v43  ;;  %v2499_v57 = vld [vmem:[%s2601_s6 + $0xd8] sm:$0xff]  ;;  %v4407_v43 = vld [vmem:[#allocation31_spill] sm:$0xff] }
 0x242   : > { %v1766_v54 = vpop.permute.xlu1 %1765  ;;  %vm576_vm1 = vcmp.eq.s32.totalorder %v4407_v43, %v3366_v7 }
 0x243   : > { %vm1849_vm14 = vcmp.eq.s32.totalorder %v1766_v54, %v3357_v59  ;;  %vm1850_vm15 = vcmp.eq.s32.totalorder %v1766_v54, %v3366_v7 }
 0x244   : > { %2470 = vset.pattern.permute.xlu1 %v4334_v24  ;;  %v1529_v25 = vpop.permute.xlu0 %1528 }
 0x245   : > { %1807 = vperm.xlu1 %2470, %v2495_v29   ;;  %v1629_v34 = vsel %vm1437_vm10, %v1529_v25, 0.0  ;;  %v1630_v13 = vsel %vm1438_vm11, %v1529_v25, 0.0 }
 0x246   : > { %v1937_v44 = vpop.permute.xlu1 %1936  ;;  %v1693_v1 = vadd.f32 %v1629_v34, %v1277_v38  ;;  %v1694_v8 = vadd.f32 %v1630_v13, %v1278_v31  ;;  %v2501_v13 = vld [vmem:[%s2606_s9 + $0xe0] sm:$0xff] }
 0x247   : > { %v2041_v9 = vsel %vm1849_vm14, %v1937_v44, 0.0  ;;  %v2042_v10 = vsel %vm1850_vm15, %v1937_v44, 0.0  ;;  %v4408_v44 = vld [vmem:[#allocation30_spill] sm:$0xff] }
 0x248   : > { %v2105_v16 = vadd.f32 %v2041_v9, %v1689_v11  ;;  %v2106_v27 = vadd.f32 %v2042_v10, %v1690_v56  ;;  %vm577_vm2 = vcmp.eq.s32.totalorder %v4408_v44, %v3357_v59  ;;  %vm578_vm3 = vcmp.eq.s32.totalorder %v4408_v44, %v3366_v7  ;;  %v4409_v9 = vld [vmem:[#allocation87_spill] sm:$0xff]  ;;  %v4410_v10 = vld [vmem:[#allocation62_spill] sm:$0xff]  ;;  %v1537_v58 = vpop.permute.xlu0 %1536 }
 0x249   : > { %1988 = vperm.xlu1 %2470, %v2493_v48   ;;  %v795_v48 = vsel %vm571_vm0, %v4405_v40, 0.0  ;;  %vm575_vm0 = vcmp.eq.s32.totalorder %v4407_v43, %v3357_v59  ;;  %vm1025_vm4 = vcmp.eq.s32.totalorder %v4409_v9, %v3357_v59  ;;  %vm1026_vm5 = vcmp.eq.s32.totalorder %v4409_v9, %v3366_v7  ;;  %v4415_v40 = vld [vmem:[#allocation122_spill] sm:$0xff]  ;;  %v4422_v9 = vld [vmem:[#allocation88_spill] sm:$0xff] }
 0x24a   : > { %v2162_v39 = vpack.c.bf16 %v2106_v27, %v2104_v14  ;;  %v2161_v50 = vpack.c.bf16 %v2105_v16, %v2103_v42  ;;  %v1275_v35 = vadd.f32 %v1211_v6, %v795_v48  ;;  %v801_v42 = vsel %vm577_vm2, %v4410_v10, 0.0  ;;  %v4411_v27 = vld [vmem:[#allocation63_spill] sm:$0xff]  ;;  %v4416_v48 = vld [vmem:[#allocation124_spill] sm:$0xff] }
 0x24b   : > { %v1525_v49 = vpop.permute.xlu1 %1524  ;;  %v802_v14 = vsel %vm578_vm3, %v4410_v10, 0.0  ;;  %v1217_v20 = vsel %vm1025_vm4, %v4414_v46, 0.0  ;;  %v1218_v60 = vsel %vm1026_vm5, %v4414_v46, 0.0  ;;  %vm1441_vm10 = vcmp.eq.s32.totalorder %v4416_v48, %v3357_v59 }
 0x24c   : > { %2203 = vmatprep.subr.bf16.mxu0 %v2162_v39  ;;  %v1627_v18 = vsel %vm1435_vm8, %v1525_v49, 0.0  ;;  %v1628_v36 = vsel %vm1436_vm9, %v1525_v49, 0.0  ;;  %v799_v39 = vsel %vm575_vm0, %v4411_v27, 0.0  ;;  %v4412_v49 = vld [vmem:[#allocation86_spill] sm:$0xff]  ;;  %vm1439_vm8 = vcmp.eq.s32.totalorder %v4415_v40, %v3357_v59  ;;  %v1545_v10 = vpop.permute.xlu0 %1544 }
 0x24d   : > { %2471 = vset.pattern.permute.xlu1 %v4333_v22  ;;  %2204 = vmatpush1.bf16.xpose.msra.mxu0 %v2161_v50  ;;  %v1691_v3 = vadd.f32 %v1627_v18, %v1275_v35  ;;  %v1692_v21 = vadd.f32 %v1628_v36, %v1276_v15  ;;  %v800_v50 = vsel %vm576_vm1, %v4411_v27, 0.0  ;;  %vm1023_vm6 = vcmp.eq.s32.totalorder %v4412_v49, %v3357_v59  ;;  %v4424_v27 = vld [vmem:[#allocation107_spill] sm:$0xff] }
 0x24e   : > { %1394 = vperm.xlu1 %2471, %v2496_v41   ;;  %vm1024_vm7 = vcmp.eq.s32.totalorder %v4412_v49, %v3366_v7  ;;  %v4413_v41 = vld [vmem:[#allocation104_spill] sm:$0xff]  ;;  %vm1440_vm9 = vcmp.eq.s32.totalorder %v4415_v40, %v3366_v7  ;;  %vm1442_vm11 = vcmp.eq.s32.totalorder %v4416_v48, %v3366_v7  ;;  %v1633_v53 = vsel %vm1441_vm10, %v1537_v58, 0.0  ;;  %v4425_v49 = vld [vmem:[#allocation123_spill] sm:$0xff] }
 0x24f   : > { %v1215_v19 = vsel %vm1023_vm6, %v4413_v41, 0.0  ;;  %v1216_v5 = vsel %vm1024_vm7, %v4413_v41, 0.0  ;;  %v1634_v37 = vsel %vm1442_vm11, %v1537_v58, 0.0  ;;  %v1281_v33 = vadd.f32 %v1217_v20, %v801_v42  ;;  %v4423_v42 = vld [vmem:[#allocation106_spill] sm:$0xff] }
 0x250   : > { %v1769_v12 = vpop.permute.xlu1 %1768  ;;  %v1282_v0 = vadd.f32 %v1218_v60, %v802_v14  ;;  %v1279_v63 = vadd.f32 %v1215_v19, %v799_v39  ;;  %v1280_v34 = vadd.f32 %v1216_v5, %v800_v50  ;;  %vm1027_vm6 = vcmp.eq.s32.totalorder %v4422_v9, %v3357_v59  ;;  %v4426_v58 = vld [vmem:[#allocation126_spill] sm:$0xff] }
 0x251   : > { %vm1851_vm12 = vcmp.eq.s32.totalorder %v1769_v12, %v3357_v59  ;;  %vm1852_vm13 = vcmp.eq.s32.totalorder %v1769_v12, %v3366_v7  ;;  %v2500_v12 = vld [vmem:[%s2601_s6 + $0xe0] sm:$0xff]  ;;  %vm1028_vm7 = vcmp.eq.s32.totalorder %v4422_v9, %v3366_v7  ;;  %v1219_v14 = vsel %vm1027_vm6, %v4423_v42, 0.0  ;;  %v4433_v9 = vld [vmem:[#allocation109_spill] sm:$0xff] }
 0x252   : > { %1580 = vperm.xlu1 %2471, %v2497_v28   ;;  %v2043_v26 = vsel %vm1851_vm12, %v3614_v55, 0.0  ;;  %v2044_v54 = vsel %vm1852_vm13, %v3614_v55, 0.0  ;;  %v1698_v38 = vadd.f32 %v1634_v37, %v1282_v0  ;;  %vm1445_vm10 = vcmp.eq.s32.totalorder %v4426_v58, %v3357_v59 }
 0x253   : > { %v2107_v52 = vadd.f32 %v2043_v26, %v1691_v3  ;;  %v2108_v11 = vadd.f32 %v2044_v54, %v1692_v21  ;;  %v2502_v21 = vld [vmem:[%s2606_s9 + $0xe8] sm:$0xff]  ;;  %vm1446_vm11 = vcmp.eq.s32.totalorder %v4426_v58, %v3366_v7  ;;  %v1637_v41 = vsel %vm1445_vm10, %v1545_v10, 0.0 }
 0x254   : > { %v1772_v45 = vpop.permute.xlu1 %1771  ;;  %v1638_v19 = vsel %vm1446_vm11, %v1545_v10, 0.0 }
 0x255   : > { %vm1853_vm14 = vcmp.eq.s32.totalorder %v1772_v45, %v3357_v59  ;;  %vm1854_vm15 = vcmp.eq.s32.totalorder %v1772_v45, %v3366_v7  ;;  %v1697_v45 = vadd.f32 %v1633_v53, %v1281_v33  ;;  %v2504_v53 = vld [vmem:[%s2601_s6 + $0xf0] sm:$0xff] }
 0x256   : > { %1584 = vperm.xlu1 %2471, %v2498_v4  }
 0x258   : > { %v1945_v2 = vpop.permute.xlu1 %1944 }
 0x259   : > { %v2045_v61 = vsel %vm1853_vm14, %v1945_v2, 0.0  ;;  %v2046_v23 = vsel %vm1854_vm15, %v1945_v2, 0.0 }
 0x25a   : > { %v2109_v56 = vadd.f32 %v2045_v61, %v1693_v1  ;;  %v2110_v17 = vadd.f32 %v2046_v23, %v1694_v8  ;;  %2472 = vset.pattern.permute.xlu1 %v4334_v24 }
 0x25b   : > { %1813 = vperm.xlu1 %2472, %v2499_v57  }
 0x25c   : > { %v2164_v29 = vpack.c.bf16 %v2110_v17, %v2108_v11  ;;  %v2163_v30 = vpack.c.bf16 %v2109_v56, %v2107_v52  ;;  %v4417_v52 = vld [vmem:[#allocation33_spill] sm:$0xff]  ;;  %v4418_v11 = vld [vmem:[#allocation32_spill] sm:$0xff] }
 0x25d   : > { %v1533_v55 = vpop.permute.xlu1 %1532  ;;  %vm579_vm0 = vcmp.eq.s32.totalorder %v4417_v52, %v3357_v59  ;;  %vm580_vm1 = vcmp.eq.s32.totalorder %v4417_v52, %v3366_v7  ;;  %vm581_vm2 = vcmp.eq.s32.totalorder %v4418_v11, %v3357_v59  ;;  %vm582_vm3 = vcmp.eq.s32.totalorder %v4418_v11, %v3366_v7  ;;  %v4419_v56 = vld [vmem:[#allocation89_spill] sm:$0xff]  ;;  %v4420_v17 = vld [vmem:[#allocation64_spill] sm:$0xff] }
 0x25e   : > { %2205 = vmatprep.subr.bf16.mxu0 %v2164_v29  ;;  %v1632_v6 = vsel %vm1440_vm9, %v1533_v55, 0.0  ;;  %vm1029_vm4 = vcmp.eq.s32.totalorder %v4419_v56, %v3357_v59  ;;  %vm1030_vm5 = vcmp.eq.s32.totalorder %v4419_v56, %v3366_v7  ;;  %v805_v57 = vsel %vm581_vm2, %v4420_v17, 0.0  ;;  %v4432_v56 = vld [vmem:[#allocation91_spill] sm:$0xff] }
 0x25f   : > { %1996 = vperm.xlu1 %2472, %v2497_v28   ;;  %2206 = vmatpush1.bf16.xpose.msra.mxu0 %v2163_v30  ;;  %v1631_v28 = vsel %vm1439_vm8, %v1533_v55, 0.0  ;;  %v1696_v35 = vadd.f32 %v1632_v6, %v1280_v34  ;;  %v806_v29 = vsel %vm582_vm3, %v4420_v17, 0.0  ;;  %v4421_v55 = vld [vmem:[#allocation65_spill] sm:$0xff]  ;;  %v1221_v39 = vsel %vm1029_vm4, %v4424_v27, 0.0  ;;  %v1553_v17 = vpop.permute.xlu0 %1552 }
 0x260   : > { %v1695_v36 = vadd.f32 %v1631_v28, %v1279_v63  ;;  %v803_v43 = vsel %vm579_vm0, %v4421_v55, 0.0  ;;  %v804_v44 = vsel %vm580_vm1, %v4421_v55, 0.0  ;;  %v1222_v50 = vsel %vm1030_vm5, %v4424_v27, 0.0  ;;  %v2507_v55 = vld [vmem:[%s2601_s6 + $0xf8] sm:$0xff]  ;;  %v4435_v27 = vld [vmem:[#allocation6_spill] sm:$0xff] }
 0x261   : > { %vm1443_vm8 = vcmp.eq.s32.totalorder %v4425_v49, %v3357_v59  ;;  %vm1444_vm9 = vcmp.eq.s32.totalorder %v4425_v49, %v3366_v7  ;;  %v1285_v46 = vadd.f32 %v1221_v39, %v805_v57  ;;  %v1286_v20 = vadd.f32 %v1222_v50, %v806_v29 }
 0x262   : > { %v1775_v16 = vpop.permute.xlu1 %1774  ;;  %v1283_v40 = vadd.f32 %v1219_v14, %v803_v43  ;;  %vm1033_vm6 = vcmp.eq.s32.totalorder %v4432_v56, %v3357_v59 }
 0x263   : > { %2473 = vset.pattern.permute.xlu1 %v4333_v22  ;;  %vm1855_vm12 = vcmp.eq.s32.totalorder %v1775_v16, %v3357_v59  ;;  %vm1856_vm13 = vcmp.eq.s32.totalorder %v1775_v16, %v3366_v7  ;;  %v1220_v16 = vsel %vm1028_vm7, %v4423_v42, 0.0  ;;  %v1701_v37 = vadd.f32 %v1637_v41, %v1285_v46  ;;  %v1561_v46 = vpop.permute.xlu0 %1560 }
 0x264   : > { %1400 = vperm.xlu1 %2473, %v2500_v12   ;;  %v2047_v31 = vsel %vm1855_vm12, %v3621_v51, 0.0  ;;  %v2048_v18 = vsel %vm1856_vm13, %v3621_v51, 0.0  ;;  %v2503_v51 = vld [vmem:[%s2601_s6 + $0xe8] sm:$0xff]  ;;  %v1284_v48 = vadd.f32 %v1220_v16, %v804_v44  ;;  %vm1034_vm7 = vcmp.eq.s32.totalorder %v4432_v56, %v3366_v7 }
 0x265   : > { %v2111_v8 = vadd.f32 %v2047_v31, %v1695_v36  ;;  %v2112_v26 = vadd.f32 %v2048_v18, %v1696_v35  ;;  %v2505_v18 = vld [vmem:[%s2606_s9 + $0xf0] sm:$0xff]  ;;  %v1225_v10 = vsel %vm1033_vm6, %v4433_v9, 0.0  ;;  %v1226_v42 = vsel %vm1034_vm7, %v4433_v9, 0.0 }
 0x266   : > { %v1778_v25 = vpop.permute.xlu1 %1777 }
 0x267   : > { %vm1857_vm14 = vcmp.eq.s32.totalorder %v1778_v25, %v3357_v59  ;;  %vm1858_vm15 = vcmp.eq.s32.totalorder %v1778_v25, %v3366_v7  ;;  %v1702_v25 = vadd.f32 %v1638_v19, %v1286_v20 }
 0x268   : > { %1588 = vperm.xlu1 %2473, %v2501_v13  }
 0x26a   : > { %v1953_v15 = vpop.permute.xlu1 %1952 }
 0x26b   : > { %v2049_v4 = vsel %vm1857_vm14, %v1953_v15, 0.0  ;;  %v2050_v1 = vsel %vm1858_vm15, %v1953_v15, 0.0  ;;  %v4428_v15 = vld [vmem:[#allocation90_spill] sm:$0xff] }
 0x26c   : > { %v2113_v54 = vadd.f32 %v2049_v4, %v1697_v45  ;;  %v2114_v3 = vadd.f32 %v2050_v1, %v1698_v38  ;;  %1592 = vperm.xlu1 %2473, %v2502_v21   ;;  %vm1031_vm2 = vcmp.eq.s32.totalorder %v4428_v15, %v3357_v59  ;;  %vm1032_vm3 = vcmp.eq.s32.totalorder %v4428_v15, %v3366_v7  ;;  %v4429_v1 = vld [vmem:[#allocation108_spill] sm:$0xff]  ;;  %v4431_v21 = vld [vmem:[#allocation67_spill] sm:$0xff] }
 0x26d   : > { %v4442_v15 = vld [vmem:[#allocation92_spill] sm:$0xff] }
 0x26e   : > { %v2166_v2 = vpack.c.bf16 %v2114_v3, %v2112_v26  ;;  %v2165_v61 = vpack.c.bf16 %v2113_v54, %v2111_v8  ;;  %v1223_v8 = vsel %vm1031_vm2, %v4429_v1, 0.0  ;;  %v1224_v26 = vsel %vm1032_vm3, %v4429_v1, 0.0  ;;  %v2506_v54 = vld [vmem:[%s2606_s9 + $0xf8] sm:$0xff] }
 0x26f   : > { %v1541_v23 = vpop.permute.xlu1 %1540  ;;  %v4430_v3 = vld [vmem:[#allocation125_spill] sm:$0xff]  ;;  %vm1035_vm6 = vcmp.eq.s32.totalorder %v4442_v15, %v3357_v59  ;;  %vm1036_vm7 = vcmp.eq.s32.totalorder %v4442_v15, %v3366_v7 }
 0x270   : > { %2474 = vset.pattern.permute.xlu1 %v4334_v24  ;;  %2207 = vmatprep.subr.bf16.mxu0 %v2166_v2  ;;  %v1635_v60 = vsel %vm1443_vm8, %v1541_v23, 0.0  ;;  %v1636_v12 = vsel %vm1444_vm9, %v1541_v23, 0.0  ;;  %vm1447_vm4 = vcmp.eq.s32.totalorder %v4430_v3, %v3357_v59  ;;  %vm1448_vm5 = vcmp.eq.s32.totalorder %v4430_v3, %v3366_v7 }
 0x271   : > { %1819 = vperm.xlu1 %2474, %v2503_v51   ;;  %2208 = vmatpush1.bf16.xpose.msra.mxu0 %v2165_v61  ;;  %v1699_v28 = vadd.f32 %v1635_v60, %v1283_v40  ;;  %v1700_v6 = vadd.f32 %v1636_v12, %v1284_v48 }
 0x274   : > { %v1781_v30 = vpop.permute.xlu1 %1780 }
 0x275   : > { %2004 = vperm.xlu1 %2474, %v2501_v13   ;;  %vm1859_vm12 = vcmp.eq.s32.totalorder %v1781_v30, %v3357_v59  ;;  %vm1860_vm13 = vcmp.eq.s32.totalorder %v1781_v30, %v3366_v7 }
 0x276   : > { %v2051_v33 = vsel %vm1859_vm12, %v3644_v47, 0.0  ;;  %v2052_v0 = vsel %vm1860_vm13, %v3644_v47, 0.0  ;;  %v4427_v47 = vld [vmem:[#allocation35_spill] sm:$0xff]  ;;  %vm1449_vm12 = vcmp.eq.s32.totalorder %v4435_v27, %v3357_v59  ;;  %vm1450_vm13 = vcmp.eq.s32.totalorder %v4435_v27, %v3366_v7 }
 0x277   : > { %v2115_v13 = vadd.f32 %v2051_v33, %v1699_v28  ;;  %v2116_v45 = vadd.f32 %v2052_v0, %v1700_v6  ;;  %vm583_vm0 = vcmp.eq.s32.totalorder %v4427_v47, %v3357_v59  ;;  %vm584_vm1 = vcmp.eq.s32.totalorder %v4427_v47, %v3366_v7  ;;  %v3844_v33 = vpop.permute.xlu0 %1568 }
 0x278   : > { %v1784_v5 = vpop.permute.xlu1 %1783  ;;  %v807_v2 = vsel %vm583_vm0, %v4431_v21, 0.0  ;;  %v808_v61 = vsel %vm584_vm1, %v4431_v21, 0.0  ;;  %v1641_v58 = vsel %vm1449_vm12, %v1553_v17, 0.0  ;;  %v1642_v41 = vsel %vm1450_vm13, %v1553_v17, 0.0  ;;  %v4445_v21 = vld [vmem:[#allocation127_spill] sm:$0xff] }
 0x279   : > { %2475 = vset.pattern.permute.xlu1 %v4333_v22  ;;  %vm1861_vm14 = vcmp.eq.s32.totalorder %v1784_v5, %v3357_v59  ;;  %vm1862_vm15 = vcmp.eq.s32.totalorder %v1784_v5, %v3366_v7  ;;  %v1287_v52 = vadd.f32 %v1223_v8, %v807_v2  ;;  %v1288_v11 = vadd.f32 %v1224_v26, %v808_v61  ;;  %v4444_v26 = vld [vmem:[#allocation111_spill] sm:$0xff]  ;;  %v4446_v2 = vld [vmem:[#allocation129_spill] sm:$0xff] }
 0x27a   : > { %1406 = vperm.xlu1 %2475, %v2504_v53  }
 0x27c   : > { %v1961_v63 = vpop.permute.xlu1 %1960 }
 0x27d   : > { %v2053_v34 = vsel %vm1861_vm14, %v1961_v63, 0.0  ;;  %v2054_v22 = vsel %vm1862_vm15, %v1961_v63, 0.0  ;;  %v4437_v63 = vld [vmem:[#allocation37_spill] sm:$0xff] }
 0x27e   : > { %v2117_v38 = vadd.f32 %v2053_v34, %v1701_v37  ;;  %v2118_v31 = vadd.f32 %v2054_v22, %v1702_v25  ;;  %1596 = vperm.xlu1 %2475, %v2505_v18   ;;  %v2480_v25 = vld [vmem:[%s2616_s23 + $0x4] ss:$8 sps:$4 sm:$0xff]   ;;  %vm587_vm0 = vcmp.eq.s32.totalorder %v4437_v63, %v3357_v59  ;;  %vm588_vm1 = vcmp.eq.s32.totalorder %v4437_v63, %v3366_v7  ;;  %v3850_v34 = vpop.permute.xlu0 %1391  ;;  %v4438_v22 = vld [vmem:[#allocation36_spill] sm:$0xff] }
 0x27f   : > { %2225 = vmatprep.mubr.bf16.mxu0 %v2480_v25  ;;  %vm589_vm2 = vcmp.eq.s32.totalorder %v4438_v22, %v3357_v59  ;;  %vm590_vm3 = vcmp.eq.s32.totalorder %v4438_v22, %v3366_v7  ;;  %v4454_v22 = vld [vmem:[#allocation113_spill] sm:$0xff] }
 0x280   : > { %v2168_v36 = vpack.c.bf16 %v2118_v31, %v2116_v45  ;;  %v2167_v35 = vpack.c.bf16 %v2117_v38, %v2115_v13  ;;  %v4439_v13 = vld [vmem:[#allocation93_spill] sm:$0xff]  ;;  %v4440_v45 = vld [vmem:[#allocation68_spill] sm:$0xff] }
 0x281   : > { %v1549_v4 = vpop.permute.xlu1 %1548  ;;  %v813_v38 = vsel %vm589_vm2, %v4440_v45, 0.0  ;;  %v814_v31 = vsel %vm590_vm3, %v4440_v45, 0.0 }
 0x282   : > { %1600 = vperm.xlu1 %2475, %v2506_v54   ;;  %2209 = vmatprep.subr.bf16.mxu0 %v2168_v36  ;;  %v1639_v23 = vsel %vm1447_vm4, %v1549_v4, 0.0  ;;  %v1640_v51 = vsel %vm1448_vm5, %v1549_v4, 0.0  ;;  %vm1037_vm4 = vcmp.eq.s32.totalorder %v4439_v13, %v3357_v59  ;;  %vm1038_vm5 = vcmp.eq.s32.totalorder %v4439_v13, %v3366_v7  ;;  %v4441_v36 = vld [vmem:[#allocation69_spill] sm:$0xff]  ;;  %v4443_v4 = vld [vmem:[#allocation110_spill] sm:$0xff] }
 0x283   : > { %2210 = vmatpush1.bf16.xpose.msra.mxu0 %v2167_v35  ;;  %v1703_v29 = vadd.f32 %v1639_v23, %v1287_v52  ;;  %v1704_v30 = vadd.f32 %v1640_v51, %v1288_v11  ;;  %v811_v35 = vsel %vm587_vm0, %v4441_v36, 0.0  ;;  %v812_v47 = vsel %vm588_vm1, %v4441_v36, 0.0  ;;  %v3882_v52 = vpop.permute.xlu0 %1397 }
 0x284   : > { %v1227_v1 = vsel %vm1035_vm6, %v4443_v4, 0.0  ;;  %v1228_v8 = vsel %vm1036_vm7, %v4443_v4, 0.0  ;;  %v1229_v54 = vsel %vm1037_vm4, %v4444_v26, 0.0  ;;  %v1230_v3 = vsel %vm1038_vm5, %v4444_v26, 0.0 }
 0x285   : > { %v1293_v11 = vadd.f32 %v1229_v54, %v813_v38  ;;  %v1294_v56 = vadd.f32 %v1230_v3, %v814_v31  ;;  %v4455_v38 = vld [vmem:[#allocation128_spill] sm:$0xff]  ;;  %v4456_v31 = vld [vmem:[#allocation7_spill] sm:$0xff] }
 0x286   : > { %2477 = vset.pattern.permute.xlu1 %v4334_v24  ;;  %v1787_v57 = vpop.permute.xlu1 %1786  ;;  %v4434_v24 = vld [vmem:[#allocation34_spill] sm:$0xff] }
 0x287   : > { %vm1863_vm8 = vcmp.eq.s32.totalorder %v1787_v57, %v3357_v59  ;;  %vm1864_vm9 = vcmp.eq.s32.totalorder %v1787_v57, %v3366_v7  ;;  %1825 = vperm.xlu1 %2477, %v2507_v55   ;;  %vm585_vm10 = vcmp.eq.s32.totalorder %v4434_v24, %v3357_v59  ;;  %vm586_vm11 = vcmp.eq.s32.totalorder %v4434_v24, %v3366_v7 }
 0x288   : > { %v2055_v43 = vsel %vm1863_vm8, %v3664_v62, 0.0  ;;  %v2056_v44 = vsel %vm1864_vm9, %v3664_v62, 0.0  ;;  %v4436_v62 = vld [vmem:[#allocation66_spill] sm:$0xff]  ;;  %vm1451_vm8 = vcmp.eq.s32.totalorder %v4445_v21, %v3357_v59  ;;  %vm1452_vm9 = vcmp.eq.s32.totalorder %v4445_v21, %v3366_v7 }
 0x289   : > { %v2119_v14 = vadd.f32 %v2055_v43, %v1703_v29  ;;  %v2120_v16 = vadd.f32 %v2056_v44, %v1704_v30  ;;  %v809_v50 = vsel %vm585_vm10, %v4436_v62, 0.0  ;;  %v810_v49 = vsel %vm586_vm11, %v4436_v62, 0.0 }
 0x28a   : > { %v1790_v39 = vpop.permute.xlu1 %1789  ;;  %v1289_v19 = vadd.f32 %v1225_v10, %v809_v50  ;;  %v1290_v5 = vadd.f32 %v1226_v42, %v810_v49  ;;  %vm1453_vm10 = vcmp.eq.s32.totalorder %v4446_v2, %v3357_v59  ;;  %vm1454_vm11 = vcmp.eq.s32.totalorder %v4446_v2, %v3366_v7  ;;  %v3888_v49 = vpop.permute.xlu0 %1403 }
 0x28b   : > { %2012 = vperm.xlu1 %2477, %v2505_v18   ;;  %vm1865_vm14 = vcmp.eq.s32.totalorder %v1790_v39, %v3357_v59  ;;  %vm1866_vm15 = vcmp.eq.s32.totalorder %v1790_v39, %v3366_v7  ;;  %v1645_v61 = vsel %vm1453_vm10, %v1561_v46, 0.0  ;;  %v1646_v23 = vsel %vm1454_vm11, %v1561_v46, 0.0  ;;  %v4448_v46 = vld [vmem:[#allocation38_spill] sm:$0xff] }
 0x28c   : > { %v1705_v20 = vadd.f32 %v1641_v58, %v1289_v19  ;;  %v1706_v60 = vadd.f32 %v1642_v41, %v1290_v5  ;;  %v1291_v29 = vadd.f32 %v1227_v1, %v811_v35  ;;  %v1292_v30 = vadd.f32 %v1228_v8, %v812_v47 }
 0x28d   : > { %v1709_v55 = vadd.f32 %v1645_v61, %v1293_v11  ;;  %v1710_v43 = vadd.f32 %v1646_v23, %v1294_v56  ;;  %vm593_vm2 = vcmp.eq.s32.totalorder %v4448_v46, %v3357_v59  ;;  %vm594_vm3 = vcmp.eq.s32.totalorder %v4448_v46, %v3366_v7 }
 0x28e   : > { %v1969_v12 = vpop.permute.xlu1 %1968  ;;  %v3894_v5 = vpop.permute.xlu0 %1409  ;;  %vm1457_vm10 = vcmp.eq.s32.totalorder %v4456_v31, %v3357_v59  ;;  %vm1458_vm11 = vcmp.eq.s32.totalorder %v4456_v31, %v3366_v7 }
 0x28f   : > { %v2057_v40 = vsel %vm1865_vm14, %v1969_v12, 0.0  ;;  %v2058_v48 = vsel %vm1866_vm15, %v1969_v12, 0.0  ;;  %v1650_v36 = vsel %vm1458_vm11, %v3844_v33, 0.0 }
 0x290   : > { %v2121_v53 = vadd.f32 %v2057_v40, %v1705_v20  ;;  %v2122_v37 = vadd.f32 %v2058_v48, %v1706_v60  ;;  %v4449_v20 = vld [vmem:[#allocation95_spill] sm:$0xff]  ;;  %v4450_v60 = vld [vmem:[#allocation70_spill] sm:$0xff] }
 0x291   : > { %vm1041_vm4 = vcmp.eq.s32.totalorder %v4449_v20, %v3357_v59  ;;  %vm1042_vm5 = vcmp.eq.s32.totalorder %v4449_v20, %v3366_v7  ;;  %v817_v12 = vsel %vm593_vm2, %v4450_v60, 0.0  ;;  %v818_v40 = vsel %vm594_vm3, %v4450_v60, 0.0  ;;  %v4464_v60 = vld [vmem:[#allocation115_spill] sm:$0xff] }
 0x292   : > { %v2170_v0 = vpack.c.bf16 %v2122_v37, %v2120_v16  ;;  %v2169_v28 = vpack.c.bf16 %v2121_v53, %v2119_v14  ;;  %v4451_v53 = vld [vmem:[#allocation71_spill] sm:$0xff]  ;;  %v1233_v13 = vsel %vm1041_vm4, %v4454_v22, 0.0  ;;  %v1234_v45 = vsel %vm1042_vm5, %v4454_v22, 0.0  ;;  %v1981_v35 = vpop.permute.xlu0 %1980 }
 0x293   : > { %v1557_v6 = vpop.permute.xlu1 %1556  ;;  %v1297_v15 = vadd.f32 %v1233_v13, %v817_v12  ;;  %v1298_v4 = vadd.f32 %v1234_v45, %v818_v40 }
 0x294   : > { %2211 = vmatprep.subr.bf16.mxu0 %v2170_v0  ;;  %v1643_v17 = vsel %vm1451_vm8, %v1557_v6, 0.0  ;;  %v1644_v57 = vsel %vm1452_vm9, %v1557_v6, 0.0  ;;  %v4452_v0 = vld [vmem:[#allocation94_spill] sm:$0xff]  ;;  %vm1455_vm8 = vcmp.eq.s32.totalorder %v4455_v38, %v3357_v59  ;;  %vm1456_vm9 = vcmp.eq.s32.totalorder %v4455_v38, %v3366_v7 }
 0x295   : > { %2212 = vmatpush1.bf16.xpose.msra.mxu0 %v2169_v28  ;;  %v1707_v10 = vadd.f32 %v1643_v17, %v1291_v29  ;;  %v1708_v42 = vadd.f32 %v1644_v57, %v1292_v30  ;;  %vm1039_vm6 = vcmp.eq.s32.totalorder %v4452_v0, %v3357_v59  ;;  %vm1040_vm7 = vcmp.eq.s32.totalorder %v4452_v0, %v3366_v7  ;;  %v4453_v28 = vld [vmem:[#allocation112_spill] sm:$0xff] }
 0x296   : > { %v1231_v6 = vsel %vm1039_vm6, %v4453_v28, 0.0  ;;  %v1232_v63 = vsel %vm1040_vm7, %v4453_v28, 0.0  ;;  %v1714_v21 = vadd.f32 %v1650_v36, %v1298_v4 }
 0x298   : > { %v1793_v18 = vpop.permute.xlu1 %1792 }
 0x299   : > { %vm1867_vm12 = vcmp.eq.s32.totalorder %v1793_v18, %v3357_v59  ;;  %vm1868_vm13 = vcmp.eq.s32.totalorder %v1793_v18, %v3366_v7  ;;  %v1649_v18 = vsel %vm1457_vm10, %v3844_v33, 0.0 }
 0x29a   : > { %v2059_v44 = vsel %vm1867_vm12, %v3671_v32, 0.0  ;;  %v2060_v9 = vsel %vm1868_vm13, %v3671_v32, 0.0  ;;  %v4447_v32 = vld [vmem:[#allocation39_spill] sm:$0xff]  ;;  %v1713_v3 = vadd.f32 %v1649_v18, %v1297_v15 }
 0x29b   : > { %v2123_v27 = vadd.f32 %v2059_v44, %v1707_v10  ;;  %v2124_v39 = vadd.f32 %v2060_v9, %v1708_v42  ;;  %vm591_vm0 = vcmp.eq.s32.totalorder %v4447_v32, %v3357_v59  ;;  %vm592_vm1 = vcmp.eq.s32.totalorder %v4447_v32, %v3366_v7  ;;  %v1805_v10 = vpop.permute.xlu0 %1804  ;;  %v4457_v42 = vld [vmem:[#allocation40_spill] sm:$0xff]  ;;  %v4463_v32 = vld [vmem:[#allocation73_spill] sm:$0xff] }
 0x29c   : > { %v1796_v51 = vpop.permute.xlu1 %1795  ;;  %v815_v37 = vsel %vm591_vm0, %v4451_v53, 0.0  ;;  %v816_v25 = vsel %vm592_vm1, %v4451_v53, 0.0  ;;  %vm597_vm0 = vcmp.eq.s32.totalorder %v4457_v42, %v3357_v59  ;;  %vm598_vm1 = vcmp.eq.s32.totalorder %v4457_v42, %v3366_v7 }
 0x29d   : > { %vm1869_vm14 = vcmp.eq.s32.totalorder %v1796_v51, %v3357_v59  ;;  %vm1870_vm15 = vcmp.eq.s32.totalorder %v1796_v51, %v3366_v7  ;;  %v1295_v26 = vadd.f32 %v1231_v6, %v815_v37  ;;  %v1296_v54 = vadd.f32 %v1232_v63, %v816_v25 }
 0x29f   : > { %v1993_v28 = vpop.permute.xlu0 %1992 }
 0x2a0   : > { %v1977_v14 = vpop.permute.xlu1 %1976 }
 0x2a1   : > { %v2061_v16 = vsel %vm1869_vm14, %v1977_v14, 0.0  ;;  %v2062_v24 = vsel %vm1870_vm15, %v1977_v14, 0.0  ;;  %v4458_v14 = vld [vmem:[#allocation41_spill] sm:$0xff] }
 0x2a2   : > { %v2125_v62 = vadd.f32 %v2061_v16, %v1709_v55  ;;  %v2126_v50 = vadd.f32 %v2062_v24, %v1710_v43  ;;  %vm595_vm2 = vcmp.eq.s32.totalorder %v4458_v14, %v3357_v59  ;;  %vm596_vm3 = vcmp.eq.s32.totalorder %v4458_v14, %v3366_v7  ;;  %v4459_v24 = vld [vmem:[#allocation96_spill] sm:$0xff] }
 0x2a3   : > { %vm1043_vm4 = vcmp.eq.s32.totalorder %v4459_v24, %v3357_v59  ;;  %vm1044_vm5 = vcmp.eq.s32.totalorder %v4459_v24, %v3366_v7  ;;  %v819_v46 = vsel %vm595_vm2, %v4463_v32, 0.0  ;;  %v820_v20 = vsel %vm596_vm3, %v4463_v32, 0.0 }
 0x2a4   : > { %v2172_v58 = vpack.c.bf16 %v2126_v50, %v2124_v39  ;;  %v2171_v41 = vpack.c.bf16 %v2125_v62, %v2123_v27  ;;  %v4460_v27 = vld [vmem:[#allocation97_spill] sm:$0xff]  ;;  %v4461_v39 = vld [vmem:[#allocation72_spill] sm:$0xff] }
 0x2a5   : > { %v1565_v19 = vpop.permute.xlu1 %1564  ;;  %vm1045_vm6 = vcmp.eq.s32.totalorder %v4460_v27, %v3357_v59  ;;  %vm1046_vm7 = vcmp.eq.s32.totalorder %v4460_v27, %v3366_v7  ;;  %v821_v62 = vsel %vm597_vm0, %v4461_v39, 0.0  ;;  %v822_v50 = vsel %vm598_vm1, %v4461_v39, 0.0 }
 0x2a6   : > { %2213 = vmatprep.subr.bf16.mxu0 %v2172_v58  ;;  %v1647_v1 = vsel %vm1455_vm8, %v1565_v19, 0.0  ;;  %v1648_v8 = vsel %vm1456_vm9, %v1565_v19, 0.0  ;;  %v4462_v58 = vld [vmem:[#allocation114_spill] sm:$0xff]  ;;  %vm1461_vm8 = vcmp.eq.s32.totalorder %v3850_v34, %v3357_v59  ;;  %vm1462_vm9 = vcmp.eq.s32.totalorder %v3850_v34, %v3366_v7 }
 0x2a7   : > { %2214 = vmatpush1.bf16.xpose.msra.mxu0 %v2171_v41  ;;  %v1711_v23 = vadd.f32 %v1647_v1, %v1295_v26  ;;  %v1712_v51 = vadd.f32 %v1648_v8, %v1296_v54  ;;  %v1235_v41 = vsel %vm1043_vm4, %v4462_v58, 0.0  ;;  %v1236_v19 = vsel %vm1044_vm5, %v4462_v58, 0.0 }
 0x2a8   : > { %v1237_v12 = vsel %vm1045_vm6, %v4464_v60, 0.0  ;;  %v1238_v40 = vsel %vm1046_vm7, %v4464_v60, 0.0  ;;  %v1300_v53 = vadd.f32 %v1236_v19, %v820_v20 }
 0x2a9   : > { %v1301_v34 = vadd.f32 %v1237_v12, %v821_v62  ;;  %v1302_v22 = vadd.f32 %v1238_v40, %v822_v50 }
 0x2aa   : > { %v1799_v48 = vpop.permute.xlu1 %1798 }
 0x2ab   : > { %vm1871_vm12 = vcmp.eq.s32.totalorder %v1799_v48, %v3357_v59  ;;  %vm1872_vm13 = vcmp.eq.s32.totalorder %v1799_v48, %v3366_v7  ;;  %v1299_v48 = vadd.f32 %v1235_v41, %v819_v46 }
 0x2ac   : > { %v2063_v2 = vsel %vm1871_vm12, %v1981_v35, 0.0  ;;  %v2064_v61 = vsel %vm1872_vm13, %v1981_v35, 0.0 }
 0x2ad   : > { %v2127_v17 = vadd.f32 %v2063_v2, %v1711_v23  ;;  %v2128_v57 = vadd.f32 %v2064_v61, %v1712_v51  ;;  %v4465_v61 = vld [vmem:[#allocation43_spill] sm:$0xff]  ;;  %v4466_v23 = vld [vmem:[#allocation98_spill] sm:$0xff]  ;;  %v1811_v51 = vpop.permute.xlu0 %1810 }
 0x2ae   : > { %v1802_v47 = vpop.permute.xlu1 %1801  ;;  %vm599_vm0 = vcmp.eq.s32.totalorder %v4465_v61, %v3357_v59  ;;  %vm600_vm1 = vcmp.eq.s32.totalorder %v4465_v61, %v3366_v7  ;;  %vm1047_vm2 = vcmp.eq.s32.totalorder %v4466_v23, %v3357_v59  ;;  %vm1048_vm3 = vcmp.eq.s32.totalorder %v4466_v23, %v3366_v7  ;;  %v4480_v61 = vld [vmem:[#allocation119_spill] sm:$0xff] }
 0x2af   : > { %vm1873_vm14 = vcmp.eq.s32.totalorder %v1802_v47, %v3357_v59  ;;  %vm1874_vm15 = vcmp.eq.s32.totalorder %v1802_v47, %v3366_v7 }
 0x2b1   : > { %v2001_v58 = vpop.permute.xlu0 %2000 }
 0x2b2   : > { %v1985_v33 = vpop.permute.xlu1 %1984 }
 0x2b3   : > { %v2065_v11 = vsel %vm1873_vm14, %v1985_v33, 0.0  ;;  %v2066_v56 = vsel %vm1874_vm15, %v1985_v33, 0.0  ;;  %vm1875_vm14 = vcmp.eq.s32.totalorder %v1805_v10, %v3357_v59  ;;  %vm1876_vm15 = vcmp.eq.s32.totalorder %v1805_v10, %v3366_v7  ;;  %v4467_v33 = vld [vmem:[#allocation116_spill] sm:$0xff] }
 0x2b4   : > { %v2129_v29 = vadd.f32 %v2065_v11, %v1713_v3  ;;  %v2130_v30 = vadd.f32 %v2066_v56, %v1714_v21  ;;  %v1239_v11 = vsel %vm1047_vm2, %v4467_v33, 0.0  ;;  %v1240_v56 = vsel %vm1048_vm3, %v4467_v33, 0.0 }
 0x2b6   : > { %v2174_v55 = vpack.c.bf16 %v2130_v30, %v2128_v57  ;;  %v2173_v43 = vpack.c.bf16 %v2129_v29, %v2127_v17  ;;  %v4468_v57 = vld [vmem:[#allocation99_spill] sm:$0xff]  ;;  %v4469_v29 = vld [vmem:[#allocation42_spill] sm:$0xff] }
 0x2b7   : > { %v1389_v44 = vpop.permute.xlu1 %1388  ;;  %vm1049_vm4 = vcmp.eq.s32.totalorder %v4468_v57, %v3357_v59  ;;  %vm1050_vm5 = vcmp.eq.s32.totalorder %v4468_v57, %v3366_v7  ;;  %vm601_vm6 = vcmp.eq.s32.totalorder %v4469_v29, %v3357_v59  ;;  %vm602_vm7 = vcmp.eq.s32.totalorder %v4469_v29, %v3366_v7  ;;  %v4470_v30 = vld [vmem:[#allocation74_spill] sm:$0xff] }
 0x2b8   : > { %2215 = vmatprep.subr.bf16.mxu0 %v2174_v55  ;;  %vm1459_vm10 = vcmp.eq.s32.totalorder %v1389_v44, %v3357_v59  ;;  %vm1460_vm11 = vcmp.eq.s32.totalorder %v1389_v44, %v3366_v7  ;;  %v823_v55 = vsel %vm599_vm0, %v4470_v30, 0.0  ;;  %v4471_v44 = vld [vmem:[#allocation10_spill] sm:$0xff] }
 0x2b9   : > { %2216 = vmatpush1.bf16.xpose.msra.mxu0 %v2173_v43  ;;  %v824_v43 = vsel %vm600_vm1, %v4470_v30, 0.0  ;;  %v826_v10 = vsel %vm602_vm7, %v4471_v44, 0.0  ;;  %v1303_v42 = vadd.f32 %v1239_v11, %v823_v55 }
 0x2ba   : > { %v1304_v14 = vadd.f32 %v1240_v56, %v824_v43 }
 0x2bb   : > { %v1573_v9 = vpop.permute.xlu1 %1572 }
 0x2bc   : > { %v1651_v37 = vsel %vm1459_vm10, %v1573_v9, 0.0  ;;  %v1652_v25 = vsel %vm1460_vm11, %v1573_v9, 0.0  ;;  %v825_v9 = vsel %vm601_vm6, %v4471_v44, 0.0  ;;  %vm1465_vm10 = vcmp.eq.s32.totalorder %v3882_v52, %v3357_v59 }
 0x2bd   : > { %v1715_v38 = vadd.f32 %v1651_v37, %v1299_v48  ;;  %v1716_v31 = vadd.f32 %v1652_v25, %v1300_v53  ;;  %vm1466_vm11 = vcmp.eq.s32.totalorder %v3882_v52, %v3366_v7 }
 0x2bf   : > { %v1577_v16 = vpop.permute.xlu1 %1576 }
 0x2c0   : > { %v1653_v6 = vsel %vm1461_vm8, %v1577_v16, 0.0  ;;  %v1654_v63 = vsel %vm1462_vm9, %v1577_v16, 0.0  ;;  %v4472_v16 = vld [vmem:[#allocation117_spill] sm:$0xff] }
 0x2c1   : > { %v1717_v18 = vadd.f32 %v1653_v6, %v1301_v34  ;;  %v1718_v36 = vadd.f32 %v1654_v63, %v1302_v22  ;;  %v1241_v24 = vsel %vm1049_vm4, %v4472_v16, 0.0  ;;  %v1242_v27 = vsel %vm1050_vm5, %v4472_v16, 0.0 }
 0x2c2   : > { %v1305_v32 = vadd.f32 %v1241_v24, %v825_v9  ;;  %v1306_v46 = vadd.f32 %v1242_v27, %v826_v10 }
 0x2c4   : > { %v1808_v0 = vpop.permute.xlu1 %1807 }
 0x2c5   : > { %vm1877_vm12 = vcmp.eq.s32.totalorder %v1808_v0, %v3357_v59  ;;  %vm1878_vm13 = vcmp.eq.s32.totalorder %v1808_v0, %v3366_v7 }
 0x2c6   : > { %v2069_v13 = vsel %vm1877_vm12, %v1993_v28, 0.0  ;;  %v2070_v45 = vsel %vm1878_vm13, %v1993_v28, 0.0 }
 0x2c7   : > { %v2133_v4 = vadd.f32 %v2069_v13, %v1717_v18  ;;  %v2134_v1 = vadd.f32 %v2070_v45, %v1718_v36  ;;  %v4474_v18 = vld [vmem:[#allocation44_spill] sm:$0xff]  ;;  %v4475_v36 = vld [vmem:[#allocation101_spill] sm:$0xff] }
 0x2c8   : > { %v1989_v35 = vpop.permute.xlu1 %1988  ;;  %vm605_vm2 = vcmp.eq.s32.totalorder %v4474_v18, %v3357_v59  ;;  %vm606_vm3 = vcmp.eq.s32.totalorder %v4474_v18, %v3366_v7  ;;  %vm1053_vm4 = vcmp.eq.s32.totalorder %v4475_v36, %v3357_v59  ;;  %vm1054_vm5 = vcmp.eq.s32.totalorder %v4475_v36, %v3366_v7  ;;  %v4487_v18 = vld [vmem:[#allocation120_spill] sm:$0xff] }
 0x2c9   : > { %v2067_v47 = vsel %vm1875_vm14, %v1989_v35, 0.0  ;;  %v2068_v15 = vsel %vm1876_vm15, %v1989_v35, 0.0  ;;  %vm1879_vm14 = vcmp.eq.s32.totalorder %v1811_v51, %v3357_v59  ;;  %vm1880_vm15 = vcmp.eq.s32.totalorder %v1811_v51, %v3366_v7  ;;  %v1817_v35 = vpop.permute.xlu0 %1816 }
 0x2ca   : > { %v2131_v8 = vadd.f32 %v2067_v47, %v1715_v38  ;;  %v2132_v26 = vadd.f32 %v2068_v15, %v1716_v31  ;;  %v4473_v38 = vld [vmem:[#allocation45_spill] sm:$0xff]  ;;  %v4476_v47 = vld [vmem:[#allocation12_spill] sm:$0xff]  ;;  %v1245_v23 = vsel %vm1053_vm4, %v4480_v61, 0.0  ;;  %v1246_v51 = vsel %vm1054_vm5, %v4480_v61, 0.0 }
 0x2cb   : > { %vm603_vm0 = vcmp.eq.s32.totalorder %v4473_v38, %v3357_v59  ;;  %vm604_vm1 = vcmp.eq.s32.totalorder %v4473_v38, %v3366_v7  ;;  %v829_v15 = vsel %vm605_vm2, %v4476_v47, 0.0  ;;  %vm1473_vm4 = vcmp.eq.s32.totalorder %v3894_v5, %v3357_v59 }
 0x2cc   : > { %v2176_v54 = vpack.c.bf16 %v2134_v1, %v2132_v26  ;;  %v2175_v3 = vpack.c.bf16 %v2133_v4, %v2131_v8  ;;  %v830_v4 = vsel %vm606_vm3, %v4476_v47, 0.0  ;;  %v4477_v1 = vld [vmem:[#allocation100_spill] sm:$0xff]  ;;  %v4478_v8 = vld [vmem:[#allocation75_spill] sm:$0xff]  ;;  %v1309_v55 = vadd.f32 %v1245_v23, %v829_v15 }
 0x2cd   : > { %v1395_v21 = vpop.permute.xlu1 %1394  ;;  %vm1051_vm6 = vcmp.eq.s32.totalorder %v4477_v1, %v3357_v59  ;;  %vm1052_vm7 = vcmp.eq.s32.totalorder %v4477_v1, %v3366_v7  ;;  %v827_v26 = vsel %vm603_vm0, %v4478_v8, 0.0  ;;  %v1310_v43 = vadd.f32 %v1246_v51, %v830_v4  ;;  %v2009_v44 = vpop.permute.xlu0 %2008 }
 0x2ce   : > { %2217 = vmatprep.subr.bf16.mxu0 %v2176_v54  ;;  %vm1463_vm8 = vcmp.eq.s32.totalorder %v1395_v21, %v3357_v59  ;;  %vm1464_vm9 = vcmp.eq.s32.totalorder %v1395_v21, %v3366_v7  ;;  %v828_v54 = vsel %vm604_vm1, %v4478_v8, 0.0  ;;  %vm1474_vm5 = vcmp.eq.s32.totalorder %v3894_v5, %v3366_v7 }
 0x2cf   : > { %2218 = vmatpush1.bf16.xpose.msra.mxu0 %v2175_v3  ;;  %v4479_v3 = vld [vmem:[#allocation118_spill] sm:$0xff] }
 0x2d0   : > { %v1243_v21 = vsel %vm1051_vm6, %v4479_v3, 0.0 }
 0x2d1   : > { %v1581_v2 = vpop.permute.xlu1 %1580  ;;  %v1307_v29 = vadd.f32 %v1243_v21, %v827_v26 }
 0x2d2   : > { %v1655_v39 = vsel %vm1463_vm8, %v1581_v2, 0.0  ;;  %v1656_v62 = vsel %vm1464_vm9, %v1581_v2, 0.0  ;;  %v1244_v2 = vsel %vm1052_vm7, %v4479_v3, 0.0 }
 0x2d3   : > { %v1719_v12 = vadd.f32 %v1655_v39, %v1303_v42  ;;  %v1720_v52 = vadd.f32 %v1656_v62, %v1304_v14  ;;  %v1308_v30 = vadd.f32 %v1244_v2, %v828_v54 }
 0x2d5   : > { %v1585_v17 = vpop.permute.xlu1 %1584 }
 0x2d6   : > { %v1657_v41 = vsel %vm1465_vm10, %v1585_v17, 0.0  ;;  %v1658_v19 = vsel %vm1466_vm11, %v1585_v17, 0.0  ;;  %vm1469_vm10 = vcmp.eq.s32.totalorder %v3888_v49, %v3357_v59  ;;  %vm1470_vm11 = vcmp.eq.s32.totalorder %v3888_v49, %v3366_v7 }
 0x2d7   : > { %v1721_v40 = vadd.f32 %v1657_v41, %v1305_v32  ;;  %v1722_v48 = vadd.f32 %v1658_v19, %v1306_v46 }
 0x2da   : > { %v1814_v50 = vpop.permute.xlu1 %1813 }
 0x2db   : > { %vm1881_vm12 = vcmp.eq.s32.totalorder %v1814_v50, %v3357_v59  ;;  %vm1882_vm13 = vcmp.eq.s32.totalorder %v1814_v50, %v3366_v7 }
 0x2dc   : > { %v2073_v20 = vsel %vm1881_vm12, %v2001_v58, 0.0  ;;  %v2074_v60 = vsel %vm1882_vm13, %v2001_v58, 0.0 }
 0x2dd   : > { %v2137_v0 = vadd.f32 %v2073_v20, %v1721_v40  ;;  %v2138_v28 = vadd.f32 %v2074_v60, %v1722_v48  ;;  %v4481_v20 = vld [vmem:[#allocation103_spill] sm:$0xff]  ;;  %v4483_v48 = vld [vmem:[#allocation46_spill] sm:$0xff] }
 0x2de   : > { %v1997_v53 = vpop.permute.xlu1 %1996  ;;  %vm1057_vm0 = vcmp.eq.s32.totalorder %v4481_v20, %v3357_v59  ;;  %vm1058_vm1 = vcmp.eq.s32.totalorder %v4481_v20, %v3366_v7  ;;  %vm609_vm2 = vcmp.eq.s32.totalorder %v4483_v48, %v3357_v59  ;;  %vm610_vm3 = vcmp.eq.s32.totalorder %v4483_v48, %v3366_v7 }
 0x2df   : > { %v2071_v37 = vsel %vm1879_vm14, %v1997_v53, 0.0  ;;  %v2072_v25 = vsel %vm1880_vm15, %v1997_v53, 0.0  ;;  %vm1883_vm14 = vcmp.eq.s32.totalorder %v1817_v35, %v3357_v59  ;;  %vm1884_vm15 = vcmp.eq.s32.totalorder %v1817_v35, %v3366_v7  ;;  %v4484_v53 = vld [vmem:[#allocation14_spill] sm:$0xff]  ;;  %v4488_v35 = vld [vmem:[#allocation13_spill] sm:$0xff] }
 0x2e0   : > { %v2135_v6 = vadd.f32 %v2071_v37, %v1719_v12  ;;  %v2136_v63 = vadd.f32 %v2072_v25, %v1720_v52  ;;  %v4482_v12 = vld [vmem:[#allocation121_spill] sm:$0xff]  ;;  %v833_v37 = vsel %vm609_vm2, %v4484_v53, 0.0  ;;  %v834_v25 = vsel %vm610_vm3, %v4484_v53, 0.0 }
 0x2e1   : > { %v1249_v52 = vsel %vm1057_vm0, %v4482_v12, 0.0  ;;  %v1250_v40 = vsel %vm1058_vm1, %v4482_v12, 0.0 }
 0x2e2   : > { %v2178_v34 = vpack.c.bf16 %v2138_v28, %v2136_v63  ;;  %v2177_v22 = vpack.c.bf16 %v2137_v0, %v2135_v6  ;;  %v1313_v0 = vadd.f32 %v1249_v52, %v833_v37  ;;  %v1314_v28 = vadd.f32 %v1250_v40, %v834_v25  ;;  %v1823_v63 = vpop.permute.xlu0 %1822 }
 0x2e3   : > { %v1401_v13 = vpop.permute.xlu1 %1400 }
 0x2e4   : > { %2219 = vmatprep.subr.bf16.mxu0 %v2178_v34  ;;  %vm1467_vm8 = vcmp.eq.s32.totalorder %v1401_v13, %v3357_v59  ;;  %vm1468_vm9 = vcmp.eq.s32.totalorder %v1401_v13, %v3366_v7  ;;  %v4485_v13 = vld [vmem:[#allocation47_spill] sm:$0xff] }
 0x2e5   : > { %2220 = vmatpush1.bf16.xpose.msra.mxu0 %v2177_v22  ;;  %vm607_vm6 = vcmp.eq.s32.totalorder %v4485_v13, %v3357_v59  ;;  %vm608_vm7 = vcmp.eq.s32.totalorder %v4485_v13, %v3366_v7 }
 0x2e6   : > { %v831_v47 = vsel %vm607_vm6, %v4488_v35, 0.0  ;;  %v832_v15 = vsel %vm608_vm7, %v4488_v35, 0.0  ;;  %v2017_v3 = vpop.permute.xlu0 %2016 }
 0x2e7   : > { %v1589_v45 = vpop.permute.xlu1 %1588 }
 0x2e8   : > { %v1659_v33 = vsel %vm1467_vm8, %v1589_v45, 0.0  ;;  %v1660_v11 = vsel %vm1468_vm9, %v1589_v45, 0.0 }
 0x2e9   : > { %v1723_v10 = vadd.f32 %v1659_v33, %v1307_v29  ;;  %v1724_v42 = vadd.f32 %v1660_v11, %v1308_v30 }
 0x2eb   : > { %v1593_v31 = vpop.permute.xlu1 %1592 }
 0x2ec   : > { %v1661_v17 = vsel %vm1469_vm10, %v1593_v31, 0.0  ;;  %v1662_v57 = vsel %vm1470_vm11, %v1593_v31, 0.0  ;;  %v4486_v31 = vld [vmem:[#allocation102_spill] sm:$0xff] }
 0x2ed   : > { %v1725_v14 = vadd.f32 %v1661_v17, %v1309_v55  ;;  %v1726_v16 = vadd.f32 %v1662_v57, %v1310_v43  ;;  %vm1055_vm8 = vcmp.eq.s32.totalorder %v4486_v31, %v3357_v59  ;;  %vm1056_vm9 = vcmp.eq.s32.totalorder %v4486_v31, %v3366_v7  ;;  %v2478_v43 = vld [vmem:[%s2616_s23] ss:$8 sps:$4 sm:$0xff]  }
 0x2ee   : > { %v1247_v5 = vsel %vm1055_vm8, %v4487_v18, 0.0  ;;  %v1248_v36 = vsel %vm1056_vm9, %v4487_v18, 0.0 }
 0x2ef   : > { %v1311_v26 = vadd.f32 %v1247_v5, %v831_v47  ;;  %v1312_v54 = vadd.f32 %v1248_v36, %v832_v15 }
 0x2f0   : > { %v1820_v56 = vpop.permute.xlu1 %1819 }
 0x2f1   : > { %vm1885_vm12 = vcmp.eq.s32.totalorder %v1820_v56, %v3357_v59  ;;  %vm1886_vm13 = vcmp.eq.s32.totalorder %v1820_v56, %v3366_v7 }
 0x2f2   : > { %v2077_v9 = vsel %vm1885_vm12, %v2009_v44, 0.0  ;;  %v2078_v49 = vsel %vm1886_vm13, %v2009_v44, 0.0  ;;  %v2147_v44 = vld [vmem:[#allocation2] sm:$0xff] }
 0x2f3   : > { %v2141_v62 = vadd.f32 %v2077_v9, %v1725_v14  ;;  %v2142_v50 = vadd.f32 %v2078_v49, %v1726_v16  ;;  %v2148_v9 = vld [vmem:[#allocation2 + $0x8] sm:$0xff]  ;;  %v2150_v14 = vld [vmem:[#allocation2 + $0x18] sm:$0xff] }
 0x2f4   : > { %v2005_v24 = vpop.permute.xlu1 %2004 }
 0x2f5   : > { %v2075_v27 = vsel %vm1883_vm14, %v2005_v24, 0.0  ;;  %v2076_v39 = vsel %vm1884_vm15, %v2005_v24, 0.0  ;;  %vm1887_vm14 = vcmp.eq.s32.totalorder %v1823_v63, %v3357_v59  ;;  %vm1888_vm15 = vcmp.eq.s32.totalorder %v1823_v63, %v3366_v7 }
 0x2f6   : > { %v2139_v58 = vadd.f32 %v2075_v27, %v1723_v10  ;;  %v2140_v41 = vadd.f32 %v2076_v39, %v1724_v42  ;;  %v2149_v10 = vld [vmem:[#allocation2 + $0x10] sm:$0xff] }
 0x2f8   : > { %v2180_v19 = vpack.c.bf16 %v2142_v50, %v2140_v41  ;;  %v2179_v32 = vpack.c.bf16 %v2141_v62, %v2139_v58 }
 0x2f9   : > { %v1407_v46 = vpop.permute.xlu1 %1406 }
 0x2fa   : > { %2221 = vmatprep.subr.bf16.mxu0 %v2180_v19  ;;  %vm1471_vm10 = vcmp.eq.s32.totalorder %v1407_v46, %v3357_v59  ;;  %vm1472_vm11 = vcmp.eq.s32.totalorder %v1407_v46, %v3366_v7 }
 0x2fb   : > { %2222 = vmatpush1.bf16.xpose.msra.mxu0 %v2179_v32 }
 0x2fd   : > { %v1597_v60 = vpop.permute.xlu1 %1596 }
 0x2fe   : > { %v1663_v1 = vsel %vm1471_vm10, %v1597_v60, 0.0  ;;  %v1664_v8 = vsel %vm1472_vm11, %v1597_v60, 0.0 }
 0x2ff   : > { %v1727_v61 = vadd.f32 %v1663_v1, %v1311_v26  ;;  %v1728_v23 = vadd.f32 %v1664_v8, %v1312_v54 }
 0x301   : > { %v1601_v6 = vpop.permute.xlu1 %1600 }
 0x302   : > { %v1665_v34 = vsel %vm1473_vm4, %v1601_v6, 0.0  ;;  %v1666_v22 = vsel %vm1474_vm5, %v1601_v6, 0.0 }
 0x303   : > { %v1729_v45 = vadd.f32 %v1665_v34, %v1313_v0  ;;  %v1730_v38 = vadd.f32 %v1666_v22, %v1314_v28 }
 0x306   : > { %v1826_v4 = vpop.permute.xlu1 %1825 }
 0x307   : > { %vm1889_vm12 = vcmp.eq.s32.totalorder %v1826_v4, %v3357_v59  ;;  %vm1890_vm13 = vcmp.eq.s32.totalorder %v1826_v4, %v3366_v7 }
 0x308   : > { %v2081_v21 = vsel %vm1889_vm12, %v2017_v3, 0.0  ;;  %v2082_v2 = vsel %vm1890_vm13, %v2017_v3, 0.0 }
 0x309   : > { %v2145_v56 = vadd.f32 %v2081_v21, %v1729_v45  ;;  %v2146_v17 = vadd.f32 %v2082_v2, %v1730_v38 }
 0x30a   : > { %v2013_v51 = vpop.permute.xlu1 %2012 }
 0x30b   : > { %v2079_v33 = vsel %vm1887_vm14, %v2013_v51, 0.0  ;;  %v2080_v11 = vsel %vm1888_vm15, %v2013_v51, 0.0 }
 0x30c   : > { %v2143_v57 = vadd.f32 %v2079_v33, %v1727_v61  ;;  %v2144_v29 = vadd.f32 %v2080_v11, %v1728_v23 }
 0x30e   : > { %v2181_v30 = vpack.c.bf16 %v2145_v56, %v2143_v57  ;;  %v2182_v55 = vpack.c.bf16 %v2146_v17, %v2144_v29 }
 0x310   : > { %2223 = vmatprep.subr.bf16.mxu0 %v2182_v55 }
 0x311   : > { %2224 = vmatpush1.bf16.xpose.msra.mxu0 %v2181_v30 }
 0x318   : > { %2226 = vmatmul.mubr.bf16.vlgmr.msra.gmra.mrb[0].mxu0 %v2478_v43 }
 0x3eb   : > { %v2227_v49 = vpop.f32.mrb[0].mxu0 }
 0x3ec   : > { %v2236_v42 = vadd.f32 %v2227_v49, %v2147_v44  ;;  %v2229_v59 = vpop.f32.mrb[1].mxu0 }
 0x3ed   : > { %v2237_v7 = vadd.f32 %v2229_v59, %v2148_v9  ;;  %v2231_v16 = vpop.f32.mrb[2].mxu0 }
 0x3ee   : > { %2240 = vst [vmem:[#allocation2] sm:$0xff] %v2236_v42  ;;  %v2238_v24 = vadd.f32 %v2231_v16, %v2149_v10  ;;  %v2233_v27 = vpop.f32.mrb[3].mxu0 }
 0x3ef   : > { %2241 = vst [vmem:[#allocation2 + $0x8] sm:$0xff] %v2237_v7  ;;  %v2239_v39 = vadd.f32 %v2233_v27, %v2150_v14 }
 0x3f0   : > { %2242 = vst [vmem:[#allocation2 + $0x10] sm:$0xff] %v2238_v24 }
 0x3f1   : > { %2243 = vst [vmem:[#allocation2 + $0x18] sm:$0xff] %v2239_v39 }
 0x3f2 PF:  {}
 0x3f5   : > { %v2247_v62 = vld [vmem:[#allocation2] sm:$0xff] }
 0x3f6   : > { %v2248_v50 = vld [vmem:[#allocation2 + $0x8] sm:$0xff]  ;;  %2251 = vst [vmem:[%s2611_s13] sm:$0xff] %v2247_v62 }
 0x3f7   : > { %v2249_v58 = vld [vmem:[#allocation2 + $0x10] sm:$0xff]  ;;  %2252 = vst [vmem:[%s2611_s13 + $0x8] sm:$0xff] %v2248_v50 }
 0x3f8   : > { %2253 = vst [vmem:[%s2611_s13 + $0x10] sm:$0xff] %v2249_v58  ;;  %v2250_v41 = vld [vmem:[#allocation2 + $0x18] sm:$0xff] }
 0x3f9   : > { %2254 = vst [vmem:[%s2611_s13 + $0x18] sm:$0xff] %v2250_v41 }
 0x3fa PF: > { %s20_s22 = sadd.s32 1, %s2544_s22   ;;  %s4489_s20 = smov %s2540_s21 }
 0x3fb   : > { %p17_p2 = scmp.ge.s32.totalorder %s20_s22, 4   ;;  %s4490_s21 = smov %s4492_s0 }
 0x3fd   :  { %19 = sbr.rel (!%p17_p2) target bundleno = 17 (0x11), region = 80 }

</bundles_post_ra>
